<compile_context>
chip_gen: v6e
topology: v6e:2x2x1
jax: 0.10.0
libtpu: 0.0.40
codegen_flags: <defaults>
</compile_context>

<pallas_src>
import math

import jax
import jax.numpy as jnp
from jax.experimental import pallas as pl
from jax.experimental.pallas import tpu as pltpu

# ---- model dims (small, consistent with SimpleKT config) -------------------
B = 2            # batch
S = 16           # seq_len
D = 64           # dim_model
H = 4            # num heads
DK = D // H      # per-head dim
DFF = 128        # dim_ff
NUM_BLOCK = 2
LN_EPS = 1e-5

WEIGHT_ORDER = ("wk", "bk", "wv", "bv", "wo", "bo", "g1", "be1",
                "w1", "bf1", "w2", "bf2", "g2", "be2")


# ---------------------------------------------------------------------------
# Fused Pallas kernel: PE add + NUM_BLOCK transformer blocks, whole batch.
# ---------------------------------------------------------------------------
def fused_forward_kernel(
    x_ref, y_ref, pe_ref, mask_ref, keep_ref,
    wk_ref, bk_ref, wv_ref, bv_ref, wo_ref, bo_ref,
    g1_ref, be1_ref, w1_ref, bf1_ref, w2_ref, bf2_ref, g2_ref, be2_ref,
    o_ref,
):
    pe = pe_ref[...]                                  # (S, D) f32

    # Fold batch into sublanes: (B, S, D) -> (B*S, D) = (32, 64).
    x = (x_ref[...] + pe[None]).reshape(B * S, D)     # query/key source
    y = (y_ref[...] + pe[None]).reshape(B * S, D)     # value source (fixed)

    mask_bias = mask_ref[...]                         # (S, S): 0 / -1e32
    keep_row = keep_ref[...]                          # (S, 1): 0 for row 0
    scale = 1.0 / math.sqrt(DK)

    def split_heads(t2d):
        # (B*S, D) -> (B*H, S, DK) using only lane slices + leading-dim stack
        # (no generic transpose inside the kernel).
        t3 = t2d.reshape(B, S, D)
        th = jnp.stack(
            [t3[:, :, h * DK:(h + 1) * DK] for h in range(H)], axis=1)
        return th.reshape(B * H, S, DK)

    for blk in range(NUM_BLOCK):                      # static loop, 2 blocks
        # kq_same=True and query == key == x  ->  q == k; one full DxD matmul.
        q = jnp.dot(x, wk_ref[blk],
                    preferred_element_type=jnp.float32) + bk_ref[blk]
        v = jnp.dot(y, wv_ref[blk],
                    preferred_element_type=jnp.float32) + bv_ref[blk]

        qh = split_heads(q)                           # (B*H, S, DK)
        vh = split_heads(v)                           # (B*H, S, DK)

        # attention scores, softmax in f32 (keeps -1e32 mask safe)
        s = jnp.einsum("nsk,ntk->nst", qh, qh,
                       preferred_element_type=jnp.float32) * scale
        s = s + mask_bias[None]                       # strictly-causal bias
        s = s - jnp.max(s, axis=-1, keepdims=True)
        e = jnp.exp(s)
        p = e * pl.reciprocal(jnp.sum(e, axis=-1, keepdims=True), approx=True)
        p = p * keep_row[None]                        # zero_pad: zero row 0

        oh = jnp.einsum("nst,ntk->nsk", p, vh,
                        preferred_element_type=jnp.float32)   # (B*H, S, DK)

        # merge heads back to (B*S, D) with lane concat, then one DxD out proj
        oh4 = oh.reshape(B, H, S, DK)
        ctx = jnp.concatenate([oh4[:, h] for h in range(H)], axis=-1)
        ctx = ctx.reshape(B * S, D)
        attn = jnp.dot(ctx, wo_ref[blk],
                       preferred_element_type=jnp.float32) + bo_ref[blk]

        # residual + LayerNorm1 (f32)
        x1 = x + attn
        mu = jnp.mean(x1, axis=-1, keepdims=True)
        var = jnp.mean((x1 - mu) ** 2, axis=-1, keepdims=True)
        x1 = (x1 - mu) * jax.lax.rsqrt(var + LN_EPS) * g1_ref[blk] + be1_ref[blk]

        # FFN (apply_pos=True): linear1 -> ReLU -> linear2, all (32, *) shapes
        hdn = jnp.dot(x1, w1_ref[blk],
                      preferred_element_type=jnp.float32) + bf1_ref[blk]
        hdn = jnp.maximum(hdn, 0.0)
        ffn = jnp.dot(hdn, w2_ref[blk],
                      preferred_element_type=jnp.float32) + bf2_ref[blk]

        # residual + LayerNorm2 (f32); result feeds the next block
        x2 = x1 + ffn
        mu2 = jnp.mean(x2, axis=-1, keepdims=True)
        var2 = jnp.mean((x2 - mu2) ** 2, axis=-1, keepdims=True)
        x = (x2 - mu2) * jax.lax.rsqrt(var2 + LN_EPS) * g2_ref[blk] + be2_ref[blk]

    o_ref[...] = x.reshape(B, S, D).astype(o_ref.dtype)


# ---------------------------------------------------------------------------
# Host-side parameter packing + wrapper.
# ---------------------------------------------------------------------------
def pack_params(block_params):
    """Stack each weight over blocks: (NUM_BLOCK, ...) f32."""
    return {k: jnp.stack([w[k] for w in block_params]).astype(jnp.float32)
            for k in WEIGHT_ORDER}


def causal_mask_bias():
    # mask == 0  ->  strictly causal: key position t allowed iff t < s.
    row = jnp.arange(S)[:, None]
    col = jnp.arange(S)[None, :]
    return jnp.where(col < row, 0.0, -1e32).astype(jnp.float32)      # (S, S)


def zero_pad_keep_row():
    # zero_pad=True: probabilities of query row 0 are zeroed after softmax.
    return (jnp.arange(S) > 0).astype(jnp.float32)[:, None]          # (S, 1)


def architecture_forward(question_emb, interaction_emb, packed, pe,
                         mask_bias, keep_row):
    """Full SimpleKT Architecture forward in one pallas_call (single step)."""
    weights = [packed[k] for k in WEIGHT_ORDER]
    args = [question_emb, interaction_emb, pe, mask_bias, keep_row] + weights

    def vmem_spec():
        return pl.BlockSpec(memory_space=pltpu.MemorySpace.VMEM)

    return pl.pallas_call(
        fused_forward_kernel,
        out_shape=jax.ShapeDtypeStruct((B, S, D), question_emb.dtype),
        in_specs=[vmem_spec() for _ in args],
        out_specs=vmem_spec(),
    )(*args)


# ---------------------------------------------------------------------------
# Glue: positional embedding, params, pure-JAX reference.
# ---------------------------------------------------------------------------
def cosine_positional_embedding(max_seq_len, dim):
    position = jnp.arange(max_seq_len, dtype=jnp.float32)[:, None]
    div_term = jnp.exp(
        jnp.arange(0, dim, 2, dtype=jnp.float32) * (-math.log(10000.0) / dim))
    pe = jnp.zeros((max_seq_len, dim), jnp.float32)
    pe = pe.at[:, 0::2].set(jnp.sin(position * div_term))
    pe = pe.at[:, 1::2].set(jnp.cos(position * div_term))
    return pe


def init_block_params(key):
    ks = jax.random.split(key, 5)
    s = 0.05
    return dict(
        wk=s * jax.random.normal(ks[0], (D, D), jnp.float32),
        bk=jnp.zeros((1, D), jnp.float32),
        wv=s * jax.random.normal(ks[1], (D, D), jnp.float32),
        bv=jnp.zeros((1, D), jnp.float32),
        wo=s * jax.random.normal(ks[2], (D, D), jnp.float32),
        bo=jnp.zeros((1, D), jnp.float32),
        g1=jnp.ones((1, D), jnp.float32),
        be1=jnp.zeros((1, D), jnp.float32),
        w1=s * jax.random.normal(ks[3], (D, DFF), jnp.float32),
        bf1=jnp.zeros((1, DFF), jnp.float32),
        w2=s * jax.random.normal(ks[4], (DFF, D), jnp.float32),
        bf2=jnp.zeros((1, D), jnp.float32),
        g2=jnp.ones((1, D), jnp.float32),
        be2=jnp.zeros((1, D), jnp.float32),
    )


def _block_ref(x, y, w):
    """Pure-JAX f32 reference of one TransformerLayer4SimpleKT block."""
    q = x @ w["wk"] + w["bk"][0]
    k = q
    v = y @ w["wv"] + w["bv"][0]

    def heads(t):
        return t.reshape(B, S, H, DK).transpose(0, 2, 1, 3)

    qh, kh, vh = heads(q), heads(k), heads(v)
    s = jnp.einsum("bhqd,bhkd->bhqk", qh, kh) / math.sqrt(DK)
    allowed = (jnp.arange(S)[None, :] < jnp.arange(S)[:, None])
    s = jnp.where(allowed[None, None], s, -1e32)
    p = jax.nn.softmax(s, axis=-1)
    p = p * (jnp.arange(S) > 0).astype(jnp.float32)[None, None, :, None]
    o = jnp.einsum("bhqk,bhkd->bhqd", p, vh).transpose(0, 2, 1, 3).reshape(B, S, D)
    o = o @ w["wo"] + w["bo"][0]

    def ln(t, g, b):
        mu = jnp.mean(t, -1, keepdims=True)
        var = jnp.mean((t - mu) ** 2, -1, keepdims=True)
        return (t - mu) * jax.lax.rsqrt(var + LN_EPS) * g[0] + b[0]

    x1 = ln(x + o, w["g1"], w["be1"])
    f = jnp.maximum(x1 @ w["w1"] + w["bf1"][0], 0.0) @ w["w2"] + w["bf2"][0]
    return ln(x1 + f, w["g2"], w["be2"])


def architecture_forward_ref(question_emb, interaction_emb, block_params, pe):
    x = question_emb + pe[None, :S, :]
    y = interaction_emb + pe[None, :S, :]
    for w in block_params:
        x = _block_ref(x, y, w)
    return x


if __name__ == "__main__":
    key = jax.random.PRNGKey(0)
    k_q, k_i, k_p = jax.random.split(key, 3)

    question_emb = jax.random.normal(k_q, (B, S, D), jnp.float32)
    interaction_emb = jax.random.normal(k_i, (B, S, D), jnp.float32)

    block_params = [init_block_params(k)
                    for k in jax.random.split(k_p, NUM_BLOCK)]
    pe = cosine_positional_embedding(S, D)
    packed = pack_params(block_params)
    mask_bias = causal_mask_bias()
    keep_row = zero_pad_keep_row()

    out = architecture_forward(question_emb, interaction_emb, packed, pe,
                               mask_bias, keep_row)
    out = jax.block_until_ready(out)

    ref = architecture_forward_ref(question_emb, interaction_emb,
                                   block_params, pe)
    assert out.shape == (B, S, D)
    assert bool(jnp.all(jnp.isfinite(out)))
    # kernel is f32 end-to-end; only softmax denom uses approx reciprocal
    assert jnp.allclose(out, ref, atol=1e-2, rtol=1e-2)

    print("KERNEL_OK")
</pallas_src>

<mosaic_0001>
module attributes {stable_mosaic.version = 11 : i64} {
  func.func @fused_forward_kernel(%arg0: memref<2x16x64xf32, #tpu.memory_space<vmem>>, %arg1: memref<2x16x64xf32, #tpu.memory_space<vmem>>, %arg2: memref<16x64xf32, #tpu.memory_space<vmem>>, %arg3: memref<16x16xf32, #tpu.memory_space<vmem>>, %arg4: memref<16x1xf32, #tpu.memory_space<vmem>>, %arg5: memref<2x64x64xf32, #tpu.memory_space<vmem>>, %arg6: memref<2x1x64xf32, #tpu.memory_space<vmem>>, %arg7: memref<2x64x64xf32, #tpu.memory_space<vmem>>, %arg8: memref<2x1x64xf32, #tpu.memory_space<vmem>>, %arg9: memref<2x64x64xf32, #tpu.memory_space<vmem>>, %arg10: memref<2x1x64xf32, #tpu.memory_space<vmem>>, %arg11: memref<2x1x64xf32, #tpu.memory_space<vmem>>, %arg12: memref<2x1x64xf32, #tpu.memory_space<vmem>>, %arg13: memref<2x64x128xf32, #tpu.memory_space<vmem>>, %arg14: memref<2x1x128xf32, #tpu.memory_space<vmem>>, %arg15: memref<2x128x64xf32, #tpu.memory_space<vmem>>, %arg16: memref<2x1x64xf32, #tpu.memory_space<vmem>>, %arg17: memref<2x1x64xf32, #tpu.memory_space<vmem>>, %arg18: memref<2x1x64xf32, #tpu.memory_space<vmem>>, %arg19: memref<2x16x64xf32, #tpu.memory_space<vmem>>) attributes {dimension_semantics = [], scalar_prefetch = 0 : i64, scratch_operands = 0 : i64, tpu.core_type = #tpu.core_type<tc>} {
    %c0 = arith.constant 0 : index
    %c0_0 = arith.constant 0 : index
    %0 = vector.load %arg2[%c0, %c0_0] : memref<16x64xf32, #tpu.memory_space<vmem>>, vector<16x64xf32>
    %c0_1 = arith.constant 0 : index
    %c0_2 = arith.constant 0 : index
    %c0_3 = arith.constant 0 : index
    %1 = vector.load %arg0[%c0_1, %c0_2, %c0_3] : memref<2x16x64xf32, #tpu.memory_space<vmem>>, vector<2x16x64xf32>
    %2 = vector.shape_cast %0 : vector<16x64xf32> to vector<1x16x64xf32>
    %3 = vector.broadcast %2 : vector<1x16x64xf32> to vector<2x16x64xf32>
    %4 = arith.addf %1, %3 : vector<2x16x64xf32>
    %5 = vector.shape_cast %4 : vector<2x16x64xf32> to vector<32x64xf32>
    %c0_4 = arith.constant 0 : index
    %c0_5 = arith.constant 0 : index
    %c0_6 = arith.constant 0 : index
    %6 = vector.load %arg1[%c0_4, %c0_5, %c0_6] : memref<2x16x64xf32, #tpu.memory_space<vmem>>, vector<2x16x64xf32>
    %7 = vector.shape_cast %0 : vector<16x64xf32> to vector<1x16x64xf32>
    %8 = vector.broadcast %7 : vector<1x16x64xf32> to vector<2x16x64xf32>
    %9 = arith.addf %6, %8 : vector<2x16x64xf32>
    %10 = vector.shape_cast %9 : vector<2x16x64xf32> to vector<32x64xf32>
    %c0_7 = arith.constant 0 : index
    %c0_8 = arith.constant 0 : index
    %11 = vector.load %arg3[%c0_7, %c0_8] : memref<16x16xf32, #tpu.memory_space<vmem>>, vector<16x16xf32>
    %c0_9 = arith.constant 0 : index
    %c0_10 = arith.constant 0 : index
    %12 = vector.load %arg4[%c0_9, %c0_10] : memref<16x1xf32, #tpu.memory_space<vmem>>, vector<16x1xf32>
    %c0_11 = arith.constant 0 : index
    %c0_12 = arith.constant 0 : index
    %c0_13 = arith.constant 0 : index
    %13 = vector.load %arg5[%c0_11, %c0_12, %c0_13] : memref<2x64x64xf32, #tpu.memory_space<vmem>>, vector<1x64x64xf32>
    %14 = vector.shape_cast %13 : vector<1x64x64xf32> to vector<64x64xf32>
    %cst = arith.constant dense<0.000000e+00> : vector<32x64xf32>
    %15 = tpu.matmul %5, %14, %cst {dimension_numbers = #tpu.dot_dimension_numbers<[1], [0], [0], [1], [0, 0, 1, 1], [], []>} : vector<32x64xf32>, vector<64x64xf32>, vector<32x64xf32> -> vector<32x64xf32>
    %c0_14 = arith.constant 0 : index
    %c0_15 = arith.constant 0 : index
    %c0_16 = arith.constant 0 : index
    %16 = vector.load %arg6[%c0_14, %c0_15, %c0_16] : memref<2x1x64xf32, #tpu.memory_space<vmem>>, vector<1x1x64xf32>
    %17 = vector.shape_cast %16 : vector<1x1x64xf32> to vector<1x64xf32>
    %18 = vector.broadcast %17 : vector<1x64xf32> to vector<32x64xf32>
    %19 = arith.addf %15, %18 : vector<32x64xf32>
    %c0_17 = arith.constant 0 : index
    %c0_18 = arith.constant 0 : index
    %c0_19 = arith.constant 0 : index
    %20 = vector.load %arg7[%c0_17, %c0_18, %c0_19] : memref<2x64x64xf32, #tpu.memory_space<vmem>>, vector<1x64x64xf32>
    %21 = vector.shape_cast %20 : vector<1x64x64xf32> to vector<64x64xf32>
    %cst_20 = arith.constant dense<0.000000e+00> : vector<32x64xf32>
    %22 = tpu.matmul %10, %21, %cst_20 {dimension_numbers = #tpu.dot_dimension_numbers<[1], [0], [0], [1], [0, 0, 1, 1], [], []>} : vector<32x64xf32>, vector<64x64xf32>, vector<32x64xf32> -> vector<32x64xf32>
    %c0_21 = arith.constant 0 : index
    %c0_22 = arith.constant 0 : index
    %c0_23 = arith.constant 0 : index
    %23 = vector.load %arg8[%c0_21, %c0_22, %c0_23] : memref<2x1x64xf32, #tpu.memory_space<vmem>>, vector<1x1x64xf32>
    %24 = vector.shape_cast %23 : vector<1x1x64xf32> to vector<1x64xf32>
    %25 = vector.broadcast %24 : vector<1x64xf32> to vector<32x64xf32>
    %26 = arith.addf %22, %25 : vector<32x64xf32>
    %27 = vector.shape_cast %19 : vector<32x64xf32> to vector<2x16x64xf32>
    %28 = vector.extract_strided_slice %27 {offsets = [0, 0, 0], sizes = [2, 16, 16], strides = [1, 1, 1]} : vector<2x16x64xf32> to vector<2x16x16xf32>
    %29 = vector.extract_strided_slice %27 {offsets = [0, 0, 16], sizes = [2, 16, 16], strides = [1, 1, 1]} : vector<2x16x64xf32> to vector<2x16x16xf32>
    %30 = vector.extract_strided_slice %27 {offsets = [0, 0, 32], sizes = [2, 16, 16], strides = [1, 1, 1]} : vector<2x16x64xf32> to vector<2x16x16xf32>
    %31 = vector.extract_strided_slice %27 {offsets = [0, 0, 48], sizes = [2, 16, 16], strides = [1, 1, 1]} : vector<2x16x64xf32> to vector<2x16x16xf32>
    %32 = vector.shape_cast %28 : vector<2x16x16xf32> to vector<2x1x16x16xf32>
    %33 = vector.shape_cast %29 : vector<2x16x16xf32> to vector<2x1x16x16xf32>
    %34 = vector.shape_cast %30 : vector<2x16x16xf32> to vector<2x1x16x16xf32>
    %35 = vector.shape_cast %31 : vector<2x16x16xf32> to vector<2x1x16x16xf32>
    %36 = tpu.concatenate %32, %33, %34, %35 in 1 : vector<2x1x16x16xf32>, vector<2x1x16x16xf32>, vector<2x1x16x16xf32>, vector<2x1x16x16xf32> -> vector<2x4x16x16xf32>
    %37 = vector.shape_cast %36 : vector<2x4x16x16xf32> to vector<8x16x16xf32>
    %38 = vector.shape_cast %26 : vector<32x64xf32> to vector<2x16x64xf32>
    %39 = vector.extract_strided_slice %38 {offsets = [0, 0, 0], sizes = [2, 16, 16], strides = [1, 1, 1]} : vector<2x16x64xf32> to vector<2x16x16xf32>
    %40 = vector.extract_strided_slice %38 {offsets = [0, 0, 16], sizes = [2, 16, 16], strides = [1, 1, 1]} : vector<2x16x64xf32> to vector<2x16x16xf32>
    %41 = vector.extract_strided_slice %38 {offsets = [0, 0, 32], sizes = [2, 16, 16], strides = [1, 1, 1]} : vector<2x16x64xf32> to vector<2x16x16xf32>
    %42 = vector.extract_strided_slice %38 {offsets = [0, 0, 48], sizes = [2, 16, 16], strides = [1, 1, 1]} : vector<2x16x64xf32> to vector<2x16x16xf32>
    %43 = vector.shape_cast %39 : vector<2x16x16xf32> to vector<2x1x16x16xf32>
    %44 = vector.shape_cast %40 : vector<2x16x16xf32> to vector<2x1x16x16xf32>
    %45 = vector.shape_cast %41 : vector<2x16x16xf32> to vector<2x1x16x16xf32>
    %46 = vector.shape_cast %42 : vector<2x16x16xf32> to vector<2x1x16x16xf32>
    %47 = tpu.concatenate %43, %44, %45, %46 in 1 : vector<2x1x16x16xf32>, vector<2x1x16x16xf32>, vector<2x1x16x16xf32>, vector<2x1x16x16xf32> -> vector<2x4x16x16xf32>
    %48 = vector.shape_cast %47 : vector<2x4x16x16xf32> to vector<8x16x16xf32>
    "tpu.trace_start"() <{level = 10 : i32, message = "nsk,ntk->nst"}> : () -> ()
    %cst_24 = arith.constant dense<0.000000e+00> : vector<8x16x16xf32>
    %49 = tpu.matmul %37, %37, %cst_24 {dimension_numbers = #tpu.dot_dimension_numbers<[2], [2], [1], [1], [0, 0, 0, 1, 1, 1], [0], [0]>} : vector<8x16x16xf32>, vector<8x16x16xf32>, vector<8x16x16xf32> -> vector<8x16x16xf32>
    "tpu.trace_stop"() : () -> ()
    %cst_25 = arith.constant 2.500000e-01 : f32
    %50 = vector.broadcast %cst_25 : f32 to vector<8x16x16xf32>
    %51 = arith.mulf %49, %50 : vector<8x16x16xf32>
    %52 = vector.shape_cast %11 : vector<16x16xf32> to vector<1x16x16xf32>
    %53 = vector.broadcast %52 : vector<1x16x16xf32> to vector<8x16x16xf32>
    %54 = arith.addf %51, %53 : vector<8x16x16xf32>
    %cst_26 = arith.constant dense<0xFF800000> : vector<8x16xf32>
    %55 = vector.multi_reduction <maximumf>, %54, %cst_26 [2] : vector<8x16x16xf32> to vector<8x16xf32>
    %56 = vector.shape_cast %55 : vector<8x16xf32> to vector<8x16x1xf32>
    %57 = vector.broadcast %56 : vector<8x16x1xf32> to vector<8x16x16xf32>
    %58 = arith.subf %54, %57 : vector<8x16x16xf32>
    %59 = math.exp %58 : vector<8x16x16xf32>
    %cst_27 = arith.constant dense<0.000000e+00> : vector<8x16xf32>
    %60 = vector.multi_reduction <add>, %59, %cst_27 [2] : vector<8x16x16xf32> to vector<8x16xf32>
    %61 = vector.shape_cast %60 : vector<8x16xf32> to vector<8x16x1xf32>
    %62 = tpu.reciprocal %61 {approx = true} : vector<8x16x1xf32> -> vector<8x16x1xf32>
    %63 = vector.broadcast %62 : vector<8x16x1xf32> to vector<8x16x16xf32>
    %64 = arith.mulf %59, %63 : vector<8x16x16xf32>
    %65 = vector.shape_cast %12 : vector<16x1xf32> to vector<1x16x1xf32>
    %66 = vector.broadcast %65 : vector<1x16x1xf32> to vector<8x16x16xf32>
    %67 = arith.mulf %64, %66 : vector<8x16x16xf32>
    "tpu.trace_start"() <{level = 10 : i32, message = "nst,ntk->nsk"}> : () -> ()
    %cst_28 = arith.constant dense<0.000000e+00> : vector<8x16x16xf32>
    %68 = tpu.matmul %67, %48, %cst_28 {dimension_numbers = #tpu.dot_dimension_numbers<[2], [1], [1], [2], [0, 0, 0, 1, 1, 2], [0], [0]>} : vector<8x16x16xf32>, vector<8x16x16xf32>, vector<8x16x16xf32> -> vector<8x16x16xf32>
    "tpu.trace_stop"() : () -> ()
    %69 = vector.shape_cast %68 : vector<8x16x16xf32> to vector<2x4x16x16xf32>
    %70 = vector.extract_strided_slice %69 {offsets = [0, 0, 0, 0], sizes = [2, 1, 16, 16], strides = [1, 1, 1, 1]} : vector<2x4x16x16xf32> to vector<2x1x16x16xf32>
    %71 = vector.shape_cast %70 : vector<2x1x16x16xf32> to vector<2x16x16xf32>
    %72 = vector.extract_strided_slice %69 {offsets = [0, 1, 0, 0], sizes = [2, 1, 16, 16], strides = [1, 1, 1, 1]} : vector<2x4x16x16xf32> to vector<2x1x16x16xf32>
    %73 = vector.shape_cast %72 : vector<2x1x16x16xf32> to vector<2x16x16xf32>
    %74 = vector.extract_strided_slice %69 {offsets = [0, 2, 0, 0], sizes = [2, 1, 16, 16], strides = [1, 1, 1, 1]} : vector<2x4x16x16xf32> to vector<2x1x16x16xf32>
    %75 = vector.shape_cast %74 : vector<2x1x16x16xf32> to vector<2x16x16xf32>
    %76 = vector.extract_strided_slice %69 {offsets = [0, 3, 0, 0], sizes = [2, 1, 16, 16], strides = [1, 1, 1, 1]} : vector<2x4x16x16xf32> to vector<2x1x16x16xf32>
    %77 = vector.shape_cast %76 : vector<2x1x16x16xf32> to vector<2x16x16xf32>
    %78 = tpu.concatenate %71, %73, %75, %77 in 2 : vector<2x16x16xf32>, vector<2x16x16xf32>, vector<2x16x16xf32>, vector<2x16x16xf32> -> vector<2x16x64xf32>
    %79 = vector.shape_cast %78 : vector<2x16x64xf32> to vector<32x64xf32>
    %c0_29 = arith.constant 0 : index
    %c0_30 = arith.constant 0 : index
    %c0_31 = arith.constant 0 : index
    %80 = vector.load %arg9[%c0_29, %c0_30, %c0_31] : memref<2x64x64xf32, #tpu.memory_space<vmem>>, vector<1x64x64xf32>
    %81 = vector.shape_cast %80 : vector<1x64x64xf32> to vector<64x64xf32>
    %cst_32 = arith.constant dense<0.000000e+00> : vector<32x64xf32>
    %82 = tpu.matmul %79, %81, %cst_32 {dimension_numbers = #tpu.dot_dimension_numbers<[1], [0], [0], [1], [0, 0, 1, 1], [], []>} : vector<32x64xf32>, vector<64x64xf32>, vector<32x64xf32> -> vector<32x64xf32>
    %c0_33 = arith.constant 0 : index
    %c0_34 = arith.constant 0 : index
    %c0_35 = arith.constant 0 : index
    %83 = vector.load %arg10[%c0_33, %c0_34, %c0_35] : memref<2x1x64xf32, #tpu.memory_space<vmem>>, vector<1x1x64xf32>
    %84 = vector.shape_cast %83 : vector<1x1x64xf32> to vector<1x64xf32>
    %85 = vector.broadcast %84 : vector<1x64xf32> to vector<32x64xf32>
    %86 = arith.addf %82, %85 : vector<32x64xf32>
    %87 = arith.addf %5, %86 : vector<32x64xf32>
    %cst_36 = arith.constant dense<0.000000e+00> : vector<32xf32>
    %88 = vector.multi_reduction <add>, %87, %cst_36 [1] : vector<32x64xf32> to vector<32xf32>
    %89 = vector.shape_cast %88 : vector<32xf32> to vector<32x1xf32>
    %cst_37 = arith.constant 6.400000e+01 : f32
    %90 = vector.broadcast %cst_37 : f32 to vector<32x1xf32>
    %91 = arith.divf %89, %90 : vector<32x1xf32>
    %92 = vector.broadcast %91 : vector<32x1xf32> to vector<32x64xf32>
    %93 = arith.subf %87, %92 : vector<32x64xf32>
    %94 = arith.mulf %93, %93 : vector<32x64xf32>
    %cst_38 = arith.constant dense<0.000000e+00> : vector<32xf32>
    %95 = vector.multi_reduction <add>, %94, %cst_38 [1] : vector<32x64xf32> to vector<32xf32>
    %96 = vector.shape_cast %95 : vector<32xf32> to vector<32x1xf32>
    %cst_39 = arith.constant 6.400000e+01 : f32
    %97 = vector.broadcast %cst_39 : f32 to vector<32x1xf32>
    %98 = arith.divf %96, %97 : vector<32x1xf32>
    %99 = vector.broadcast %91 : vector<32x1xf32> to vector<32x64xf32>
    %100 = arith.subf %87, %99 : vector<32x64xf32>
    %cst_40 = arith.constant 9.99999974E-6 : f32
    %101 = vector.broadcast %cst_40 : f32 to vector<32x1xf32>
    %102 = arith.addf %98, %101 : vector<32x1xf32>
    %103 = math.rsqrt %102 : vector<32x1xf32>
    %104 = vector.broadcast %103 : vector<32x1xf32> to vector<32x64xf32>
    %105 = arith.mulf %100, %104 : vector<32x64xf32>
    %c0_41 = arith.constant 0 : index
    %c0_42 = arith.constant 0 : index
    %c0_43 = arith.constant 0 : index
    %106 = vector.load %arg11[%c0_41, %c0_42, %c0_43] : memref<2x1x64xf32, #tpu.memory_space<vmem>>, vector<1x1x64xf32>
    %107 = vector.shape_cast %106 : vector<1x1x64xf32> to vector<1x64xf32>
    %108 = vector.broadcast %107 : vector<1x64xf32> to vector<32x64xf32>
    %109 = arith.mulf %105, %108 : vector<32x64xf32>
    %c0_44 = arith.constant 0 : index
    %c0_45 = arith.constant 0 : index
    %c0_46 = arith.constant 0 : index
    %110 = vector.load %arg12[%c0_44, %c0_45, %c0_46] : memref<2x1x64xf32, #tpu.memory_space<vmem>>, vector<1x1x64xf32>
    %111 = vector.shape_cast %110 : vector<1x1x64xf32> to vector<1x64xf32>
    %112 = vector.broadcast %111 : vector<1x64xf32> to vector<32x64xf32>
    %113 = arith.addf %109, %112 : vector<32x64xf32>
    %c0_47 = arith.constant 0 : index
    %c0_48 = arith.constant 0 : index
    %c0_49 = arith.constant 0 : index
    %114 = vector.load %arg13[%c0_47, %c0_48, %c0_49] : memref<2x64x128xf32, #tpu.memory_space<vmem>>, vector<1x64x128xf32>
    %115 = vector.shape_cast %114 : vector<1x64x128xf32> to vector<64x128xf32>
    %cst_50 = arith.constant dense<0.000000e+00> : vector<32x128xf32>
    %116 = tpu.matmul %113, %115, %cst_50 {dimension_numbers = #tpu.dot_dimension_numbers<[1], [0], [0], [1], [0, 0, 1, 1], [], []>} : vector<32x64xf32>, vector<64x128xf32>, vector<32x128xf32> -> vector<32x128xf32>
    %c0_51 = arith.constant 0 : index
    %c0_52 = arith.constant 0 : index
    %c0_53 = arith.constant 0 : index
    %117 = vector.load %arg14[%c0_51, %c0_52, %c0_53] : memref<2x1x128xf32, #tpu.memory_space<vmem>>, vector<1x1x128xf32>
    %118 = vector.shape_cast %117 : vector<1x1x128xf32> to vector<1x128xf32>
    %119 = vector.broadcast %118 : vector<1x128xf32> to vector<32x128xf32>
    %120 = arith.addf %116, %119 : vector<32x128xf32>
    %cst_54 = arith.constant 0.000000e+00 : f32
    %121 = vector.broadcast %cst_54 : f32 to vector<32x128xf32>
    %122 = arith.maximumf %120, %121 : vector<32x128xf32>
    %c0_55 = arith.constant 0 : index
    %c0_56 = arith.constant 0 : index
    %c0_57 = arith.constant 0 : index
    %123 = vector.load %arg15[%c0_55, %c0_56, %c0_57] : memref<2x128x64xf32, #tpu.memory_space<vmem>>, vector<1x128x64xf32>
    %124 = vector.shape_cast %123 : vector<1x128x64xf32> to vector<128x64xf32>
    %cst_58 = arith.constant dense<0.000000e+00> : vector<32x64xf32>
    %125 = tpu.matmul %122, %124, %cst_58 {dimension_numbers = #tpu.dot_dimension_numbers<[1], [0], [0], [1], [0, 0, 1, 1], [], []>} : vector<32x128xf32>, vector<128x64xf32>, vector<32x64xf32> -> vector<32x64xf32>
    %c0_59 = arith.constant 0 : index
    %c0_60 = arith.constant 0 : index
    %c0_61 = arith.constant 0 : index
    %126 = vector.load %arg16[%c0_59, %c0_60, %c0_61] : memref<2x1x64xf32, #tpu.memory_space<vmem>>, vector<1x1x64xf32>
    %127 = vector.shape_cast %126 : vector<1x1x64xf32> to vector<1x64xf32>
    %128 = vector.broadcast %127 : vector<1x64xf32> to vector<32x64xf32>
    %129 = arith.addf %125, %128 : vector<32x64xf32>
    %130 = arith.addf %113, %129 : vector<32x64xf32>
    %cst_62 = arith.constant dense<0.000000e+00> : vector<32xf32>
    %131 = vector.multi_reduction <add>, %130, %cst_62 [1] : vector<32x64xf32> to vector<32xf32>
    %132 = vector.shape_cast %131 : vector<32xf32> to vector<32x1xf32>
    %cst_63 = arith.constant 6.400000e+01 : f32
    %133 = vector.broadcast %cst_63 : f32 to vector<32x1xf32>
    %134 = arith.divf %132, %133 : vector<32x1xf32>
    %135 = vector.broadcast %134 : vector<32x1xf32> to vector<32x64xf32>
    %136 = arith.subf %130, %135 : vector<32x64xf32>
    %137 = arith.mulf %136, %136 : vector<32x64xf32>
    %cst_64 = arith.constant dense<0.000000e+00> : vector<32xf32>
    %138 = vector.multi_reduction <add>, %137, %cst_64 [1] : vector<32x64xf32> to vector<32xf32>
    %139 = vector.shape_cast %138 : vector<32xf32> to vector<32x1xf32>
    %cst_65 = arith.constant 6.400000e+01 : f32
    %140 = vector.broadcast %cst_65 : f32 to vector<32x1xf32>
    %141 = arith.divf %139, %140 : vector<32x1xf32>
    %142 = vector.broadcast %134 : vector<32x1xf32> to vector<32x64xf32>
    %143 = arith.subf %130, %142 : vector<32x64xf32>
    %cst_66 = arith.constant 9.99999974E-6 : f32
    %144 = vector.broadcast %cst_66 : f32 to vector<32x1xf32>
    %145 = arith.addf %141, %144 : vector<32x1xf32>
    %146 = math.rsqrt %145 : vector<32x1xf32>
    %147 = vector.broadcast %146 : vector<32x1xf32> to vector<32x64xf32>
    %148 = arith.mulf %143, %147 : vector<32x64xf32>
    %c0_67 = arith.constant 0 : index
    %c0_68 = arith.constant 0 : index
    %c0_69 = arith.constant 0 : index
    %149 = vector.load %arg17[%c0_67, %c0_68, %c0_69] : memref<2x1x64xf32, #tpu.memory_space<vmem>>, vector<1x1x64xf32>
    %150 = vector.shape_cast %149 : vector<1x1x64xf32> to vector<1x64xf32>
    %151 = vector.broadcast %150 : vector<1x64xf32> to vector<32x64xf32>
    %152 = arith.mulf %148, %151 : vector<32x64xf32>
    %c0_70 = arith.constant 0 : index
    %c0_71 = arith.constant 0 : index
    %c0_72 = arith.constant 0 : index
    %153 = vector.load %arg18[%c0_70, %c0_71, %c0_72] : memref<2x1x64xf32, #tpu.memory_space<vmem>>, vector<1x1x64xf32>
    %154 = vector.shape_cast %153 : vector<1x1x64xf32> to vector<1x64xf32>
    %155 = vector.broadcast %154 : vector<1x64xf32> to vector<32x64xf32>
    %156 = arith.addf %152, %155 : vector<32x64xf32>
    %c1 = arith.constant 1 : index
    %c0_73 = arith.constant 0 : index
    %c0_74 = arith.constant 0 : index
    %157 = vector.load %arg5[%c1, %c0_73, %c0_74] : memref<2x64x64xf32, #tpu.memory_space<vmem>>, vector<1x64x64xf32>
    %158 = vector.shape_cast %157 : vector<1x64x64xf32> to vector<64x64xf32>
    %cst_75 = arith.constant dense<0.000000e+00> : vector<32x64xf32>
    %159 = tpu.matmul %156, %158, %cst_75 {dimension_numbers = #tpu.dot_dimension_numbers<[1], [0], [0], [1], [0, 0, 1, 1], [], []>} : vector<32x64xf32>, vector<64x64xf32>, vector<32x64xf32> -> vector<32x64xf32>
    %c1_76 = arith.constant 1 : index
    %c0_77 = arith.constant 0 : index
    %c0_78 = arith.constant 0 : index
    %160 = vector.load %arg6[%c1_76, %c0_77, %c0_78] : memref<2x1x64xf32, #tpu.memory_space<vmem>>, vector<1x1x64xf32>
    %161 = vector.shape_cast %160 : vector<1x1x64xf32> to vector<1x64xf32>
    %162 = vector.broadcast %161 : vector<1x64xf32> to vector<32x64xf32>
    %163 = arith.addf %159, %162 : vector<32x64xf32>
    %c1_79 = arith.constant 1 : index
    %c0_80 = arith.constant 0 : index
    %c0_81 = arith.constant 0 : index
    %164 = vector.load %arg7[%c1_79, %c0_80, %c0_81] : memref<2x64x64xf32, #tpu.memory_space<vmem>>, vector<1x64x64xf32>
    %165 = vector.shape_cast %164 : vector<1x64x64xf32> to vector<64x64xf32>
    %cst_82 = arith.constant dense<0.000000e+00> : vector<32x64xf32>
    %166 = tpu.matmul %10, %165, %cst_82 {dimension_numbers = #tpu.dot_dimension_numbers<[1], [0], [0], [1], [0, 0, 1, 1], [], []>} : vector<32x64xf32>, vector<64x64xf32>, vector<32x64xf32> -> vector<32x64xf32>
    %c1_83 = arith.constant 1 : index
    %c0_84 = arith.constant 0 : index
    %c0_85 = arith.constant 0 : index
    %167 = vector.load %arg8[%c1_83, %c0_84, %c0_85] : memref<2x1x64xf32, #tpu.memory_space<vmem>>, vector<1x1x64xf32>
    %168 = vector.shape_cast %167 : vector<1x1x64xf32> to vector<1x64xf32>
    %169 = vector.broadcast %168 : vector<1x64xf32> to vector<32x64xf32>
    %170 = arith.addf %166, %169 : vector<32x64xf32>
    %171 = vector.shape_cast %163 : vector<32x64xf32> to vector<2x16x64xf32>
    %172 = vector.extract_strided_slice %171 {offsets = [0, 0, 0], sizes = [2, 16, 16], strides = [1, 1, 1]} : vector<2x16x64xf32> to vector<2x16x16xf32>
    %173 = vector.extract_strided_slice %171 {offsets = [0, 0, 16], sizes = [2, 16, 16], strides = [1, 1, 1]} : vector<2x16x64xf32> to vector<2x16x16xf32>
    %174 = vector.extract_strided_slice %171 {offsets = [0, 0, 32], sizes = [2, 16, 16], strides = [1, 1, 1]} : vector<2x16x64xf32> to vector<2x16x16xf32>
    %175 = vector.extract_strided_slice %171 {offsets = [0, 0, 48], sizes = [2, 16, 16], strides = [1, 1, 1]} : vector<2x16x64xf32> to vector<2x16x16xf32>
    %176 = vector.shape_cast %172 : vector<2x16x16xf32> to vector<2x1x16x16xf32>
    %177 = vector.shape_cast %173 : vector<2x16x16xf32> to vector<2x1x16x16xf32>
    %178 = vector.shape_cast %174 : vector<2x16x16xf32> to vector<2x1x16x16xf32>
    %179 = vector.shape_cast %175 : vector<2x16x16xf32> to vector<2x1x16x16xf32>
    %180 = tpu.concatenate %176, %177, %178, %179 in 1 : vector<2x1x16x16xf32>, vector<2x1x16x16xf32>, vector<2x1x16x16xf32>, vector<2x1x16x16xf32> -> vector<2x4x16x16xf32>
    %181 = vector.shape_cast %180 : vector<2x4x16x16xf32> to vector<8x16x16xf32>
    %182 = vector.shape_cast %170 : vector<32x64xf32> to vector<2x16x64xf32>
    %183 = vector.extract_strided_slice %182 {offsets = [0, 0, 0], sizes = [2, 16, 16], strides = [1, 1, 1]} : vector<2x16x64xf32> to vector<2x16x16xf32>
    %184 = vector.extract_strided_slice %182 {offsets = [0, 0, 16], sizes = [2, 16, 16], strides = [1, 1, 1]} : vector<2x16x64xf32> to vector<2x16x16xf32>
    %185 = vector.extract_strided_slice %182 {offsets = [0, 0, 32], sizes = [2, 16, 16], strides = [1, 1, 1]} : vector<2x16x64xf32> to vector<2x16x16xf32>
    %186 = vector.extract_strided_slice %182 {offsets = [0, 0, 48], sizes = [2, 16, 16], strides = [1, 1, 1]} : vector<2x16x64xf32> to vector<2x16x16xf32>
    %187 = vector.shape_cast %183 : vector<2x16x16xf32> to vector<2x1x16x16xf32>
    %188 = vector.shape_cast %184 : vector<2x16x16xf32> to vector<2x1x16x16xf32>
    %189 = vector.shape_cast %185 : vector<2x16x16xf32> to vector<2x1x16x16xf32>
    %190 = vector.shape_cast %186 : vector<2x16x16xf32> to vector<2x1x16x16xf32>
    %191 = tpu.concatenate %187, %188, %189, %190 in 1 : vector<2x1x16x16xf32>, vector<2x1x16x16xf32>, vector<2x1x16x16xf32>, vector<2x1x16x16xf32> -> vector<2x4x16x16xf32>
    %192 = vector.shape_cast %191 : vector<2x4x16x16xf32> to vector<8x16x16xf32>
    "tpu.trace_start"() <{level = 10 : i32, message = "nsk,ntk->nst"}> : () -> ()
    %cst_86 = arith.constant dense<0.000000e+00> : vector<8x16x16xf32>
    %193 = tpu.matmul %181, %181, %cst_86 {dimension_numbers = #tpu.dot_dimension_numbers<[2], [2], [1], [1], [0, 0, 0, 1, 1, 1], [0], [0]>} : vector<8x16x16xf32>, vector<8x16x16xf32>, vector<8x16x16xf32> -> vector<8x16x16xf32>
    "tpu.trace_stop"() : () -> ()
    %cst_87 = arith.constant 2.500000e-01 : f32
    %194 = vector.broadcast %cst_87 : f32 to vector<8x16x16xf32>
    %195 = arith.mulf %193, %194 : vector<8x16x16xf32>
    %196 = vector.shape_cast %11 : vector<16x16xf32> to vector<1x16x16xf32>
    %197 = vector.broadcast %196 : vector<1x16x16xf32> to vector<8x16x16xf32>
    %198 = arith.addf %195, %197 : vector<8x16x16xf32>
    %cst_88 = arith.constant dense<0xFF800000> : vector<8x16xf32>
    %199 = vector.multi_reduction <maximumf>, %198, %cst_88 [2] : vector<8x16x16xf32> to vector<8x16xf32>
    %200 = vector.shape_cast %199 : vector<8x16xf32> to vector<8x16x1xf32>
    %201 = vector.broadcast %200 : vector<8x16x1xf32> to vector<8x16x16xf32>
    %202 = arith.subf %198, %201 : vector<8x16x16xf32>
    %203 = math.exp %202 : vector<8x16x16xf32>
    %cst_89 = arith.constant dense<0.000000e+00> : vector<8x16xf32>
    %204 = vector.multi_reduction <add>, %203, %cst_89 [2] : vector<8x16x16xf32> to vector<8x16xf32>
    %205 = vector.shape_cast %204 : vector<8x16xf32> to vector<8x16x1xf32>
    %206 = tpu.reciprocal %205 {approx = true} : vector<8x16x1xf32> -> vector<8x16x1xf32>
    %207 = vector.broadcast %206 : vector<8x16x1xf32> to vector<8x16x16xf32>
    %208 = arith.mulf %203, %207 : vector<8x16x16xf32>
    %209 = vector.shape_cast %12 : vector<16x1xf32> to vector<1x16x1xf32>
    %210 = vector.broadcast %209 : vector<1x16x1xf32> to vector<8x16x16xf32>
    %211 = arith.mulf %208, %210 : vector<8x16x16xf32>
    "tpu.trace_start"() <{level = 10 : i32, message = "nst,ntk->nsk"}> : () -> ()
    %cst_90 = arith.constant dense<0.000000e+00> : vector<8x16x16xf32>
    %212 = tpu.matmul %211, %192, %cst_90 {dimension_numbers = #tpu.dot_dimension_numbers<[2], [1], [1], [2], [0, 0, 0, 1, 1, 2], [0], [0]>} : vector<8x16x16xf32>, vector<8x16x16xf32>, vector<8x16x16xf32> -> vector<8x16x16xf32>
    "tpu.trace_stop"() : () -> ()
    %213 = vector.shape_cast %212 : vector<8x16x16xf32> to vector<2x4x16x16xf32>
    %214 = vector.extract_strided_slice %213 {offsets = [0, 0, 0, 0], sizes = [2, 1, 16, 16], strides = [1, 1, 1, 1]} : vector<2x4x16x16xf32> to vector<2x1x16x16xf32>
    %215 = vector.shape_cast %214 : vector<2x1x16x16xf32> to vector<2x16x16xf32>
    %216 = vector.extract_strided_slice %213 {offsets = [0, 1, 0, 0], sizes = [2, 1, 16, 16], strides = [1, 1, 1, 1]} : vector<2x4x16x16xf32> to vector<2x1x16x16xf32>
    %217 = vector.shape_cast %216 : vector<2x1x16x16xf32> to vector<2x16x16xf32>
    %218 = vector.extract_strided_slice %213 {offsets = [0, 2, 0, 0], sizes = [2, 1, 16, 16], strides = [1, 1, 1, 1]} : vector<2x4x16x16xf32> to vector<2x1x16x16xf32>
    %219 = vector.shape_cast %218 : vector<2x1x16x16xf32> to vector<2x16x16xf32>
    %220 = vector.extract_strided_slice %213 {offsets = [0, 3, 0, 0], sizes = [2, 1, 16, 16], strides = [1, 1, 1, 1]} : vector<2x4x16x16xf32> to vector<2x1x16x16xf32>
    %221 = vector.shape_cast %220 : vector<2x1x16x16xf32> to vector<2x16x16xf32>
    %222 = tpu.concatenate %215, %217, %219, %221 in 2 : vector<2x16x16xf32>, vector<2x16x16xf32>, vector<2x16x16xf32>, vector<2x16x16xf32> -> vector<2x16x64xf32>
    %223 = vector.shape_cast %222 : vector<2x16x64xf32> to vector<32x64xf32>
    %c1_91 = arith.constant 1 : index
    %c0_92 = arith.constant 0 : index
    %c0_93 = arith.constant 0 : index
    %224 = vector.load %arg9[%c1_91, %c0_92, %c0_93] : memref<2x64x64xf32, #tpu.memory_space<vmem>>, vector<1x64x64xf32>
    %225 = vector.shape_cast %224 : vector<1x64x64xf32> to vector<64x64xf32>
    %cst_94 = arith.constant dense<0.000000e+00> : vector<32x64xf32>
    %226 = tpu.matmul %223, %225, %cst_94 {dimension_numbers = #tpu.dot_dimension_numbers<[1], [0], [0], [1], [0, 0, 1, 1], [], []>} : vector<32x64xf32>, vector<64x64xf32>, vector<32x64xf32> -> vector<32x64xf32>
    %c1_95 = arith.constant 1 : index
    %c0_96 = arith.constant 0 : index
    %c0_97 = arith.constant 0 : index
    %227 = vector.load %arg10[%c1_95, %c0_96, %c0_97] : memref<2x1x64xf32, #tpu.memory_space<vmem>>, vector<1x1x64xf32>
    %228 = vector.shape_cast %227 : vector<1x1x64xf32> to vector<1x64xf32>
    %229 = vector.broadcast %228 : vector<1x64xf32> to vector<32x64xf32>
    %230 = arith.addf %226, %229 : vector<32x64xf32>
    %231 = arith.addf %156, %230 : vector<32x64xf32>
    %cst_98 = arith.constant dense<0.000000e+00> : vector<32xf32>
    %232 = vector.multi_reduction <add>, %231, %cst_98 [1] : vector<32x64xf32> to vector<32xf32>
    %233 = vector.shape_cast %232 : vector<32xf32> to vector<32x1xf32>
    %cst_99 = arith.constant 6.400000e+01 : f32
    %234 = vector.broadcast %cst_99 : f32 to vector<32x1xf32>
    %235 = arith.divf %233, %234 : vector<32x1xf32>
    %236 = vector.broadcast %235 : vector<32x1xf32> to vector<32x64xf32>
    %237 = arith.subf %231, %236 : vector<32x64xf32>
    %238 = arith.mulf %237, %237 : vector<32x64xf32>
    %cst_100 = arith.constant dense<0.000000e+00> : vector<32xf32>
    %239 = vector.multi_reduction <add>, %238, %cst_100 [1] : vector<32x64xf32> to vector<32xf32>
    %240 = vector.shape_cast %239 : vector<32xf32> to vector<32x1xf32>
    %cst_101 = arith.constant 6.400000e+01 : f32
    %241 = vector.broadcast %cst_101 : f32 to vector<32x1xf32>
    %242 = arith.divf %240, %241 : vector<32x1xf32>
    %243 = vector.broadcast %235 : vector<32x1xf32> to vector<32x64xf32>
    %244 = arith.subf %231, %243 : vector<32x64xf32>
    %cst_102 = arith.constant 9.99999974E-6 : f32
    %245 = vector.broadcast %cst_102 : f32 to vector<32x1xf32>
    %246 = arith.addf %242, %245 : vector<32x1xf32>
    %247 = math.rsqrt %246 : vector<32x1xf32>
    %248 = vector.broadcast %247 : vector<32x1xf32> to vector<32x64xf32>
    %249 = arith.mulf %244, %248 : vector<32x64xf32>
    %c1_103 = arith.constant 1 : index
    %c0_104 = arith.constant 0 : index
    %c0_105 = arith.constant 0 : index
    %250 = vector.load %arg11[%c1_103, %c0_104, %c0_105] : memref<2x1x64xf32, #tpu.memory_space<vmem>>, vector<1x1x64xf32>
    %251 = vector.shape_cast %250 : vector<1x1x64xf32> to vector<1x64xf32>
    %252 = vector.broadcast %251 : vector<1x64xf32> to vector<32x64xf32>
    %253 = arith.mulf %249, %252 : vector<32x64xf32>
    %c1_106 = arith.constant 1 : index
    %c0_107 = arith.constant 0 : index
    %c0_108 = arith.constant 0 : index
    %254 = vector.load %arg12[%c1_106, %c0_107, %c0_108] : memref<2x1x64xf32, #tpu.memory_space<vmem>>, vector<1x1x64xf32>
    %255 = vector.shape_cast %254 : vector<1x1x64xf32> to vector<1x64xf32>
    %256 = vector.broadcast %255 : vector<1x64xf32> to vector<32x64xf32>
    %257 = arith.addf %253, %256 : vector<32x64xf32>
    %c1_109 = arith.constant 1 : index
    %c0_110 = arith.constant 0 : index
    %c0_111 = arith.constant 0 : index
    %258 = vector.load %arg13[%c1_109, %c0_110, %c0_111] : memref<2x64x128xf32, #tpu.memory_space<vmem>>, vector<1x64x128xf32>
    %259 = vector.shape_cast %258 : vector<1x64x128xf32> to vector<64x128xf32>
    %cst_112 = arith.constant dense<0.000000e+00> : vector<32x128xf32>
    %260 = tpu.matmul %257, %259, %cst_112 {dimension_numbers = #tpu.dot_dimension_numbers<[1], [0], [0], [1], [0, 0, 1, 1], [], []>} : vector<32x64xf32>, vector<64x128xf32>, vector<32x128xf32> -> vector<32x128xf32>
    %c1_113 = arith.constant 1 : index
    %c0_114 = arith.constant 0 : index
    %c0_115 = arith.constant 0 : index
    %261 = vector.load %arg14[%c1_113, %c0_114, %c0_115] : memref<2x1x128xf32, #tpu.memory_space<vmem>>, vector<1x1x128xf32>
    %262 = vector.shape_cast %261 : vector<1x1x128xf32> to vector<1x128xf32>
    %263 = vector.broadcast %262 : vector<1x128xf32> to vector<32x128xf32>
    %264 = arith.addf %260, %263 : vector<32x128xf32>
    %cst_116 = arith.constant 0.000000e+00 : f32
    %265 = vector.broadcast %cst_116 : f32 to vector<32x128xf32>
    %266 = arith.maximumf %264, %265 : vector<32x128xf32>
    %c1_117 = arith.constant 1 : index
    %c0_118 = arith.constant 0 : index
    %c0_119 = arith.constant 0 : index
    %267 = vector.load %arg15[%c1_117, %c0_118, %c0_119] : memref<2x128x64xf32, #tpu.memory_space<vmem>>, vector<1x128x64xf32>
    %268 = vector.shape_cast %267 : vector<1x128x64xf32> to vector<128x64xf32>
    %cst_120 = arith.constant dense<0.000000e+00> : vector<32x64xf32>
    %269 = tpu.matmul %266, %268, %cst_120 {dimension_numbers = #tpu.dot_dimension_numbers<[1], [0], [0], [1], [0, 0, 1, 1], [], []>} : vector<32x128xf32>, vector<128x64xf32>, vector<32x64xf32> -> vector<32x64xf32>
    %c1_121 = arith.constant 1 : index
    %c0_122 = arith.constant 0 : index
    %c0_123 = arith.constant 0 : index
    %270 = vector.load %arg16[%c1_121, %c0_122, %c0_123] : memref<2x1x64xf32, #tpu.memory_space<vmem>>, vector<1x1x64xf32>
    %271 = vector.shape_cast %270 : vector<1x1x64xf32> to vector<1x64xf32>
    %272 = vector.broadcast %271 : vector<1x64xf32> to vector<32x64xf32>
    %273 = arith.addf %269, %272 : vector<32x64xf32>
    %274 = arith.addf %257, %273 : vector<32x64xf32>
    %cst_124 = arith.constant dense<0.000000e+00> : vector<32xf32>
    %275 = vector.multi_reduction <add>, %274, %cst_124 [1] : vector<32x64xf32> to vector<32xf32>
    %276 = vector.shape_cast %275 : vector<32xf32> to vector<32x1xf32>
    %cst_125 = arith.constant 6.400000e+01 : f32
    %277 = vector.broadcast %cst_125 : f32 to vector<32x1xf32>
    %278 = arith.divf %276, %277 : vector<32x1xf32>
    %279 = vector.broadcast %278 : vector<32x1xf32> to vector<32x64xf32>
    %280 = arith.subf %274, %279 : vector<32x64xf32>
    %281 = arith.mulf %280, %280 : vector<32x64xf32>
    %cst_126 = arith.constant dense<0.000000e+00> : vector<32xf32>
    %282 = vector.multi_reduction <add>, %281, %cst_126 [1] : vector<32x64xf32> to vector<32xf32>
    %283 = vector.shape_cast %282 : vector<32xf32> to vector<32x1xf32>
    %cst_127 = arith.constant 6.400000e+01 : f32
    %284 = vector.broadcast %cst_127 : f32 to vector<32x1xf32>
    %285 = arith.divf %283, %284 : vector<32x1xf32>
    %286 = vector.broadcast %278 : vector<32x1xf32> to vector<32x64xf32>
    %287 = arith.subf %274, %286 : vector<32x64xf32>
    %cst_128 = arith.constant 9.99999974E-6 : f32
    %288 = vector.broadcast %cst_128 : f32 to vector<32x1xf32>
    %289 = arith.addf %285, %288 : vector<32x1xf32>
    %290 = math.rsqrt %289 : vector<32x1xf32>
    %291 = vector.broadcast %290 : vector<32x1xf32> to vector<32x64xf32>
    %292 = arith.mulf %287, %291 : vector<32x64xf32>
    %c1_129 = arith.constant 1 : index
    %c0_130 = arith.constant 0 : index
    %c0_131 = arith.constant 0 : index
    %293 = vector.load %arg17[%c1_129, %c0_130, %c0_131] : memref<2x1x64xf32, #tpu.memory_space<vmem>>, vector<1x1x64xf32>
    %294 = vector.shape_cast %293 : vector<1x1x64xf32> to vector<1x64xf32>
    %295 = vector.broadcast %294 : vector<1x64xf32> to vector<32x64xf32>
    %296 = arith.mulf %292, %295 : vector<32x64xf32>
    %c1_132 = arith.constant 1 : index
    %c0_133 = arith.constant 0 : index
    %c0_134 = arith.constant 0 : index
    %297 = vector.load %arg18[%c1_132, %c0_133, %c0_134] : memref<2x1x64xf32, #tpu.memory_space<vmem>>, vector<1x1x64xf32>
    %298 = vector.shape_cast %297 : vector<1x1x64xf32> to vector<1x64xf32>
    %299 = vector.broadcast %298 : vector<1x64xf32> to vector<32x64xf32>
    %300 = arith.addf %296, %299 : vector<32x64xf32>
    %301 = vector.shape_cast %300 : vector<32x64xf32> to vector<2x16x64xf32>
    %c0_135 = arith.constant 0 : index
    %c0_136 = arith.constant 0 : index
    %c0_137 = arith.constant 0 : index
    %302 = vector.load %arg19[%c0_135, %c0_136, %c0_137] : memref<2x16x64xf32, #tpu.memory_space<vmem>>, vector<2x16x64xf32>
    tpu.vector_store %arg19[%c0_135, %c0_136, %c0_137], %301 {strides = array<i32>} : memref<2x16x64xf32, #tpu.memory_space<vmem>>, vector<2x16x64xf32>,
    return
  }
}

</mosaic_0001>

<bundles_post_ra>
// kernel: tpu_custom_call.1
= control target key start
LH: loop header
LB: loop body
LE: loop exit
PB: predicated region body
PF: predicated region fallthrough
CT: control target
= control target key end

     0   :  { %s7466_s0 = inlined_call_operand.hbm [shape: f32[2,16,64], index: 0, kind: input, shape index: {}]   ;;  %s7467_s1 = inlined_call_operand.hbm [shape: f32[2,16,64], index: 1, kind: input, shape index: {}]   ;;  %s7468_s2 = inlined_call_operand.vmem [shape: f32[16,64], index: 2, kind: input, shape index: {}]   ;;  %s7469_s3 = inlined_call_operand.hbm [shape: f32[16,16], index: 3, kind: input, shape index: {}]   ;;  %s7470_s4 = inlined_call_operand.vmem [shape: f32[16,1], index: 4, kind: input, shape index: {}]   ;;  %s7471_s5 = inlined_call_operand.vmem [shape: f32[2,64,64], index: 5, kind: input, shape index: {}]   ;;  %s7472_s6 = inlined_call_operand.vmem [shape: f32[2,1,64], index: 6, kind: input, shape index: {}]   ;;  %s7473_s7 = inlined_call_operand.vmem [shape: f32[2,64,64], index: 7, kind: input, shape index: {}]   ;;  %s7474_s8 = inlined_call_operand.vmem [shape: f32[2,1,64], index: 8, kind: input, shape index: {}]   ;;  %s7475_s9 = inlined_call_operand.vmem [shape: f32[2,64,64], index: 9, kind: input, shape index: {}]   ;;  %s7476_s10 = inlined_call_operand.vmem [shape: f32[2,1,64], index: 10, kind: input, shape index: {}]   ;;  %s7477_s11 = inlined_call_operand.vmem [shape: f32[2,1,64], index: 11, kind: input, shape index: {}]   ;;  %s7478_s12 = inlined_call_operand.vmem [shape: f32[2,1,64], index: 12, kind: input, shape index: {}]   ;;  %s7479_s13 = inlined_call_operand.hbm [shape: f32[2,64,128], index: 13, kind: input, shape index: {}]   ;;  %s7480_s14 = inlined_call_operand.vmem [shape: f32[2,1,128], index: 14, kind: input, shape index: {}]   ;;  %s7481_s15 = inlined_call_operand.vmem [shape: f32[2,128,64], index: 15, kind: input, shape index: {}]   ;;  %s7482_s16 = inlined_call_operand.vmem [shape: f32[2,1,64], index: 16, kind: input, shape index: {}]   ;;  %s7483_s17 = inlined_call_operand.vmem [shape: f32[2,1,64], index: 17, kind: input, shape index: {}]   ;;  %s7484_s18 = inlined_call_operand.vmem [shape: f32[2,1,64], index: 18, kind: input, shape index: {}]   ;;  %s7485_s19 = inlined_call_operand.hbm [shape: f32[2,16,64], index: 19, kind: output, shape index: {}]  }
   0x1   :  { %7487 = sst [smem:[#allocation15_spill]] %s7466_s0 }
   0x2   :  { %7488 = sst [smem:[#allocation16_spill]] %s7467_s1 }
   0x3   :  { %7489 = sst [smem:[#allocation17_spill]] %s7468_s2 }
   0x4   :  { %7490 = sst [smem:[#allocation18_spill]] %s7469_s3 }
   0x5   :  { %24 = vsyncpa [#allocation3], 0 }
   0x6   :  { %25 = vsyncpa [#allocation6], 0 }
   0x7   :  { %26 = vsyncpa [#allocation9], 0 }
   0x8   :  { %27 = vsyncpa [#allocation4], 0  ;;  %s6097_s0 = smov [#allocation5]   ;;  %s6098_s20 = smov [#allocation2]  }
   0x9   :  { %s45_s30 = sshll.u32 %s6097_s0, 4  ;;  %s33_s21 = sshll.u32 %s6098_s20, 4  ;;  %s46_s30 = int_to_ptr.vmem [resolvable:$true] %s45_s30  ;;  %s34_s21 = int_to_ptr.vmem [resolvable:$true] %s33_s21 }
   0xa   :  { %s5997_s1 = scalar_lea.vmem %s46_s30, 512  ;;  %p6002_p1 = scmp.lt.s32.totalorder %s46_s30, %s46_s30 }
   0xb   :  { %p5998_p0 = scmp.ne.s32.totalorder %s46_s30, %s5997_s1  ;;  %p6003_p2 = scmp.lt.s32.totalorder %s5997_s1, %s5997_s1 }
   0xd   :  { %p6004_p3 = por %p6003_p2, %p6002_p1 }
   0xf   :  { %p6005_p4 = pnand %p6004_p3, %p5998_p0 }
  0x11   :  { %6008 = shalt.err (!%p6005_p4)
}
  0x12   :  { %s6099_s22 = smov 128   ;;  %s6100_s2 = smov 8  }
  0x13   :  { %s7491_s25 = sld [smem:[#allocation16_spill]]  ;;  %s6017_s3 = scalar_lea.vmem %s34_s21, 512 }
  0x14   :  { %p6018_p5 = scmp.ne.s32.totalorder %s34_s21, %s6017_s3  ;;  %p6022_p6 = scmp.lt.s32.totalorder %s34_s21, %s34_s21 }
  0x15   :  { %p6023_p7 = scmp.lt.s32.totalorder %s6017_s3, %s6017_s3 }
  0x17   :  { %p6024_p8 = por %p6023_p7, %p6022_p6 }
  0x19   :  { %51 = dma.hbm_to_vmem [thread:$0]  %s7491_s25, 512, %s46_s30, [#allocation6], %s6099_s22, %s6099_s22, %s6100_s2  }
  0x1a   :  { %p6025_p9 = pnand %p6024_p8, %p6018_p5 }
  0x1c   :  { %6028 = shalt.err (!%p6025_p9)
}
  0x1d   :  { %s7492_s28 = sld [smem:[#allocation15_spill]]  ;;  %s6101_s29 = smov [#allocation7]  }
  0x1e   :  { %s59_s0 = sshll.u32 %s6101_s29, 4  ;;  %s6102_s20 = smov [#allocation8]   ;;  %s60_s0 = int_to_ptr.vmem [resolvable:$true] %s59_s0 }
  0x1f   :  { %s89_s1 = sshll.u32 %s6102_s20, 4  ;;  %s6037_s30 = scalar_lea.vmem %s60_s0, 256  ;;  %s90_s1 = int_to_ptr.vmem [resolvable:$true] %s89_s1 }
  0x20   :  { %p6038_p10 = scmp.ne.s32.totalorder %s60_s0, %s6037_s30  ;;  %p6042_p11 = scmp.lt.s32.totalorder %s60_s0, %s60_s0 }
  0x21   :  { %p6043_p12 = scmp.lt.s32.totalorder %s6037_s30, %s6037_s30 }
  0x23   :  { %39 = dma.hbm_to_vmem [thread:$0]  %s7492_s28, 512, %s34_s21, [#allocation3], %s6099_s22, %s6099_s22, %s6100_s2  }
  0x24   :  { %p6044_p13 = por %p6043_p12, %p6042_p11 }
  0x26   :  { %p6045_p0 = pnand %p6044_p13, %p6038_p10 }
  0x28   :  { %6048 = shalt.err (!%p6045_p0)
}
  0x29   :  { %s7493_s25 = sld [smem:[#allocation18_spill]]  ;;  %s6057_s21 = scalar_lea.vmem %s90_s1, 2048 }
  0x2a   :  { %p6058_p1 = scmp.ne.s32.totalorder %s90_s1, %s6057_s21  ;;  %p6062_p2 = scmp.lt.s32.totalorder %s90_s1, %s90_s1 }
  0x2b   :  { %p6063_p3 = scmp.lt.s32.totalorder %s6057_s21, %s6057_s21 }
  0x2d   :  { %p6064_p4 = por %p6063_p3, %p6062_p2 }
  0x2f   :  { %65 = dma.hbm_to_vmem [thread:$0]  %s7493_s25, 256, %s60_s0, [#allocation6], %s6099_s22, %s6099_s22, %s6100_s2  }
  0x30   :  { %p6065_p5 = pnand %p6064_p4, %p6058_p1 }
  0x32   :  { %6068 = shalt.err (!%p6065_p5)
}
  0x33   :  { %95 = dma.hbm_to_vmem [thread:$0]  %s7479_s13, 2048, %s90_s1, [#allocation9], %s6099_s22, %s6099_s22, %s6100_s2  }
  0x34   :  { %6089 = dma.done.wait [#allocation3], 512  }
  0x35   :  { %6090 = vsyncadd [#allocation3], 4294966784 }
  0x36   :  { %6091 = dma.done.wait [#allocation6], 768  }
  0x37   :  { %6092 = vsyncadd [#allocation6], 4294966528 }
  0x38   :  { %6093 = dma.done.wait [#allocation9], 2048  }
  0x39   :  { %6094 = vsyncadd [#allocation9], 4294965248  ;;  %v147_v0 = vld [vmem:[%s7471_s5 + $0x38] sm:$0xff]  ;;  %v146_v1 = vld [vmem:[%s7471_s5 + $0x30] sm:$0xff]  ;;  %s7494_s23 = sld [smem:[#allocation17_spill]]  ;;  %vm155_vm0 = vcmask 523264  }
  0x3a   :  { %5335 = vmatprep.subr.mxu1 %v147_v0  ;;  %v145_v2 = vld [vmem:[%s7471_s5 + $0x28] sm:$0xff]  ;;  %v120_v4 = vld [vmem:[#allocation2] sm:$0xff]  ;;  %v143_v7 = vld [vmem:[%s7471_s5 + $0x18] sm:$0xff]  ;;  %vm433_vm1 = vcmask 130048   ;;  %s6103_s21 = smov 96   ;;  %s6104_s3 = smov 112  }
  0x3b   :  { %5336 = vmatpush3.msra.mxu1 %v147_v0  ;;  %v144_v5 = vld [vmem:[%s7471_s5 + $0x20] sm:$0xff]  ;;  %v142_v8 = vld [vmem:[%s7471_s5 + $0x10] sm:$0xff]  ;;  %v141_v9 = vld [vmem:[%s7471_s5 + $0x8] sm:$0xff]  ;;  %s6105_s26 = smov 80   ;;  %v6106_v43 = vmov 0   ;;  %s6107_s24 = smov 16  }
  0x3c   :  { %5337 = vmatprep.subr.mxu1 %v146_v1  ;;  %v121_v11 = vld [vmem:[#allocation2 + $0x8] sm:$0xff]  ;;  %v122_v12 = vld [vmem:[#allocation2 + $0x10] sm:$0xff]  ;;  %v140_v13 = vld [vmem:[%s7471_s5] sm:$0xff]  ;;  %5825 = vset.pattern.permute.xlu1 %v6106_v43  ;;  %s6108_s25 = smov 32   ;;  %s6109_s27 = smov 48   ;;  %vm2000_vm2 = vcmask 261120  }
  0x3d   :  { %5338 = vmatpush3.msra.mxu1 %v146_v1  ;;  %v123_v16 = vld [vmem:[#allocation2 + $0x18] sm:$0xff]  ;;  %v259_v19 = vld [vmem:[%s7473_s7 + $0x30] sm:$0xff]  ;;  %v258_v20 = vld [vmem:[%s7473_s7 + $0x28] sm:$0xff]  ;;  %5826 = vset.pattern.permute.xlu0 %v6106_v43  ;;  %vm2005_vm3 = vcmask 392192  }
  0x3e   :  { %5339 = vmatprep.subr.mxu1 %v145_v2  ;;  %v260_v18 = vld [vmem:[%s7473_s7 + $0x38] sm:$0xff]  ;;  %v128_v21 = vld [vmem:[#allocation5] sm:$0xff]  ;;  %v255_v25 = vld [vmem:[%s7473_s7 + $0x10] sm:$0xff] }
  0x3f   :  { %v6247_v3 = vld [vmem:[%s7494_s23] sm:$0xff]  ;;  %5340 = vmatpush3.msra.mxu1 %v145_v2  ;;  %v119_v10 = vld [vmem:[%s7494_s23 + $0x8] sm:$0xff]  ;;  %v256_v24 = vld [vmem:[%s7473_s7 + $0x18] sm:$0xff] }
  0x40   :  { %v6253_v6 = vadd.f32 %v120_v4, %v6247_v3  ;;  %5341 = vmatprep.subr.mxu1 %v144_v5  ;;  %v6272_v14 = vadd.f32 %v121_v11, %v119_v10  ;;  %v6275_v15 = vadd.f32 %v122_v12, %v6247_v3  ;;  %v6279_v17 = vadd.f32 %v123_v16, %v119_v10  ;;  %v257_v23 = vld [vmem:[%s7473_s7 + $0x20] sm:$0xff]  ;;  %v129_v26 = vld [vmem:[#allocation5 + $0x8] sm:$0xff]  ;;  %v130_v30 = vld [vmem:[#allocation5 + $0x10] sm:$0xff] }
  0x41   :  { %5342 = vmatpush3.msra.mxu1 %v144_v5  ;;  %v6295_v22 = vadd.f32 %v128_v21, %v6247_v3  ;;  %v254_v27 = vld [vmem:[%s7473_s7 + $0x8] sm:$0xff]  ;;  %v253_v28 = vld [vmem:[%s7473_s7] sm:$0xff]  ;;  %v6314_v29 = vadd.f32 %v129_v26, %v119_v10  ;;  %v6319_v31 = vadd.f32 %v130_v30, %v6247_v3  ;;  %v131_v32 = vld [vmem:[#allocation5 + $0x18] sm:$0xff] }
  0x42   :  { %5351 = vmatprep.mubr.msk.f32.mxu1 %vm155_vm0, %v6253_v6  ;;  %5343 = vmatprep.subr.mxu1 %v143_v7  ;;  %v6321_v33 = vadd.f32 %v131_v32, %v119_v10  ;;  %v4876_v34 = vld [vmem:[%s7472_s6] ss:$0 sm:$0xff]  ;;  %v6408_v63 = vld [vmem:[#allocation7 + $0x8] sm:$0xff] }
  0x43   :  { %5344 = vmatpush3.msra.mxu1 %v143_v7  ;;  %v138_v44 = vld [vmem:[%s7470_s4] sm:$0xff] }
  0x44   :  { %5345 = vmatprep.subr.mxu1 %v142_v8  ;;  %v6383_v57 = vld [vmem:[%s7474_s8] ss:$0 sm:$0xff] }
  0x45   :  { %5346 = vmatpush3.msra.mxu1 %v142_v8  ;;  %v6410_v2 = vld [vmem:[#allocation7] sm:$0xff] }
  0x46   :  { %5347 = vmatprep.subr.mxu1 %v141_v9 }
  0x47   :  { %5348 = vmatpush3.msra.mxu1 %v141_v9 }
  0x48   :  { %5349 = vmatprep.subr.mxu1 %v140_v13 }
  0x49   :  { %5350 = vmatpush3.msra.mxu1 %v140_v13 }
  0x4a   :  { %5352 = vmatmul.mubr.msk.f32.vlgmr.msra.gmra.mxu1 %vm155_vm0, %v6272_v14  ;;  %5357 = vmatprep.subr.mxu1 %v260_v18 }
  0x4b   :  { %5354 = vmatprep.mubr.msk.f32.mxu1 %vm155_vm0, %v6275_v15  ;;  %5358 = vmatpush3.msra.mxu1 %v260_v18 }
  0x4c   :  { %5359 = vmatprep.subr.mxu1 %v259_v19 }
  0x4d   :  { %5360 = vmatpush3.msra.mxu1 %v259_v19 }
  0x4e   :  { %5355 = vmatmul.mubr.msk.f32.gmra.mxu1 %vm155_vm0, %v6279_v17  ;;  %5361 = vmatprep.subr.mxu1 %v258_v20 }
  0x4f   :  { %5373 = vmatprep.mubr.msk.f32.mxu1 %vm155_vm0, %v6295_v22  ;;  %5362 = vmatpush3.msra.mxu1 %v258_v20 }
  0x50   :  { %5363 = vmatprep.subr.mxu1 %v257_v23 }
  0x51   :  { %5364 = vmatpush3.msra.mxu1 %v257_v23 }
  0x52   :  { %5365 = vmatprep.subr.mxu1 %v256_v24 }
  0x53   :  { %5366 = vmatpush3.msra.mxu1 %v256_v24 }
  0x54   :  { %5367 = vmatprep.subr.mxu1 %v255_v25 }
  0x55   :  { %5368 = vmatpush3.msra.mxu1 %v255_v25 }
  0x56   :  { %5369 = vmatprep.subr.mxu1 %v254_v27 }
  0x57   :  { %5370 = vmatpush3.msra.mxu1 %v254_v27 }
  0x58   :  { %5371 = vmatprep.subr.mxu1 %v253_v28 }
  0x59   :  { %5372 = vmatpush3.msra.mxu1 %v253_v28 }
  0x5a   :  { %5374 = vmatmul.mubr.msk.f32.vlgmr.msra.gmra.mxu1 %vm155_vm0, %v6314_v29 }
  0x5b   :  { %5376 = vmatprep.mubr.msk.f32.mxu1 %vm155_vm0, %v6319_v31 }
  0x5e   :  { %5377 = vmatmul.mubr.msk.f32.gmra.mxu1 %vm155_vm0, %v6321_v33 }
 0x10a   :  { %v5353_v35 = vpop.f32.mrf.mxu1 }
 0x10b   :  { %v240_v36 = vadd.f32 %v5353_v35, %v4876_v34 }
 0x10c   :  { %v234_v37 = vpop.f32.mrf.mxu1 }
 0x10d   :  { %v235_v38 = vadd.f32 %v4876_v34, %v234_v37  ;;  %379 = vrot.lane.b32.xlu1 %v240_v36, %s6103_s21  ;;  %371 = vrot.lane.b32.xlu0 %v240_v36, %s6104_s3 }
 0x10e   :  { %5379 = vmatprep.subr.msk.mxu0 %vm433_vm1, %v240_v36  ;;  %v5356_v39 = vpop.f32.mrf.mxu1 }
 0x10f   :  { %5380 = vmatpush3.xpose.msk.msra.mxu0 %vm433_vm1, %v240_v36  ;;  %5383 = vmatprep.mubr.msk.f32.mxu0 %vm433_vm1, %v235_v38  ;;  %v250_v41 = vadd.f32 %v5356_v39, %v4876_v34 }
 0x110   :  { %5381 = vmatprep.subr.msk.mxu0 %vm433_vm1, %v235_v38  ;;  %v244_v40 = vpop.f32.mrf.mxu1 }
 0x111   :  { %387 = vrot.lane.b32.xlu1 %v240_v36, %s6105_s26  ;;  %369 = vrot.lane.b32.xlu0 %v235_v38, %s6104_s3  ;;  %v245_v42 = vadd.f32 %v4876_v34, %v244_v40 }
 0x113   :  { %5382 = vmatpush3.xpose.msk.msra.mxu0 %vm433_vm1, %v235_v38 }
 0x115   :  { %385 = vrot.lane.b32.xlu1 %v235_v38, %s6105_s26  ;;  %377 = vrot.lane.b32.xlu0 %v235_v38, %s6103_s21 }
 0x116   :  { %5384 = vmatmul.mubr.msk.f32.vlgmr.msra.gmra.mxu0 %vm433_vm1, %v240_v36 }
 0x119   :  { %373 = vrot.lane.b32.xlu1 %v245_v42, %s6104_s3  ;;  %375 = vrot.lane.b32.xlu0 %v250_v41, %s6104_s3 }
 0x11a   :  { %v5375_v54 = vpop.f32.mrf.mxu1 }
 0x11b   :  { %v6391_v58 = vadd.f32 %v5375_v54, %v6383_v57 }
 0x11c   :  { %v346_v59 = vpop.f32.mrf.mxu1 }
 0x11d   :  { %391 = vrot.lane.b32.xlu1 %v250_v41, %s6105_s26  ;;  %383 = vrot.lane.b32.xlu0 %v250_v41, %s6103_s21  ;;  %v6398_v61 = vadd.f32 %v6383_v57, %v346_v59 }
 0x11e   :  { %v6422_v9 = vpop.f32.mrf.mxu1 }
 0x120   :  { %v6424_v10 = vpop.f32.mrf.mxu1 }
 0x121   :  { %389 = vrot.lane.b32.xlu1 %v245_v42, %s6105_s26  ;;  %381 = vrot.lane.b32.xlu0 %v245_v42, %s6103_s21 }
 0x125   :  { %1276 = vperm.xlu1 %5825, %v138_v44  }
 0x17f   :  { %v380_v45 = vpop.permute.xlu1 %379  ;;  %v372_v46 = vpop.permute.xlu0 %371 }
 0x180   :  { %5386 = vmatprep.subr.msk.mxu1 %vm433_vm1, %v372_v46  ;;  %5393 = vmatprep.subr.msk.mxu0 %vm433_vm1, %v380_v45 }
 0x181   :  { %5387 = vmatpush3.xpose.msk.msra.mxu1 %vm433_vm1, %v372_v46  ;;  %5394 = vmatpush3.xpose.msk.msra.mxu0 %vm433_vm1, %v380_v45 }
 0x183   :  { %v388_v47 = vpop.permute.xlu1 %387  ;;  %v370_v48 = vpop.permute.xlu0 %369 }
 0x184   :  { %5388 = vmatprep.subr.msk.mxu1 %vm433_vm1, %v370_v48  ;;  %5390 = vmatprep.mubr.msk.f32.mxu1 %vm433_vm1, %v370_v48 }
 0x185   :  { %5389 = vmatpush3.xpose.msk.msra.mxu1 %vm433_vm1, %v370_v48 }
 0x186   :  { %5400 = vmatprep.subr.msk.mxu1 %vm433_vm1, %v388_v47 }
 0x187   :  { %v386_v49 = vpop.permute.xlu1 %385  ;;  %v378_v50 = vpop.permute.xlu0 %377 }
 0x188   :  { %5391 = vmatmul.mubr.msk.f32.vlgmr.msra.gmra.mxu1 %vm433_vm1, %v372_v46  ;;  %5395 = vmatprep.subr.msk.mxu0 %vm433_vm1, %v378_v50 }
 0x189   :  { %5397 = vmatprep.mubr.msk.f32.mxu0 %vm433_vm1, %v378_v50  ;;  %5396 = vmatpush3.xpose.msk.msra.mxu0 %vm433_vm1, %v378_v50 }
 0x18a   :  { %5401 = vmatpush3.xpose.msk.msra.mxu1 %vm433_vm1, %v388_v47  ;;  %5404 = vmatprep.mubr.msk.f32.mxu1 %vm433_vm1, %v386_v49 }
 0x18b   :  { %5402 = vmatprep.subr.msk.mxu1 %vm433_vm1, %v386_v49  ;;  %5407 = vmatprep.subr.msk.mxu0 %vm433_vm1, %v250_v41  ;;  %v376_v51 = vpop.permute.xlu0 %375  ;;  %v374_v52 = vpop.permute.xlu1 %373 }
 0x18c   :  { %5398 = vmatmul.mubr.msk.f32.vlgmr.msra.gmra.mxu0 %vm433_vm1, %v380_v45 }
 0x18d   :  { %5408 = vmatpush3.xpose.msk.msra.mxu0 %vm433_vm1, %v250_v41  ;;  %5411 = vmatprep.mubr.msk.f32.mxu0 %vm433_vm1, %v245_v42 }
 0x18e   :  { %5403 = vmatpush3.xpose.msk.msra.mxu1 %vm433_vm1, %v386_v49  ;;  %5409 = vmatprep.subr.msk.mxu0 %vm433_vm1, %v245_v42 }
 0x18f   :  { %v384_v53 = vpop.permute.xlu0 %383  ;;  %5414 = vmatprep.subr.msk.mxu1 %vm433_vm1, %v376_v51  ;;  %v392_v55 = vpop.permute.xlu1 %391 }
 0x191   :  { %5405 = vmatmul.mubr.msk.f32.vlgmr.msra.gmra.mxu1 %vm433_vm1, %v388_v47  ;;  %5410 = vmatpush3.xpose.msk.msra.mxu0 %vm433_vm1, %v245_v42 }
 0x192   :  { %5415 = vmatpush3.xpose.msk.msra.mxu1 %vm433_vm1, %v376_v51  ;;  %5418 = vmatprep.mubr.msk.f32.mxu1 %vm433_vm1, %v374_v52 }
 0x193   :  { %5416 = vmatprep.subr.msk.mxu1 %vm433_vm1, %v374_v52  ;;  %5421 = vmatprep.subr.msk.mxu0 %vm433_vm1, %v384_v53  ;;  %v382_v56 = vpop.permute.xlu0 %381  ;;  %v390_v60 = vpop.permute.xlu1 %389 }
 0x194   :  { %5412 = vmatmul.mubr.msk.f32.vlgmr.msra.gmra.mxu0 %vm433_vm1, %v250_v41 }
 0x195   :  { %5422 = vmatpush3.xpose.msk.msra.mxu0 %vm433_vm1, %v384_v53  ;;  %5425 = vmatprep.mubr.msk.f32.mxu0 %vm433_vm1, %v382_v56 }
 0x196   :  { %5417 = vmatpush3.xpose.msk.msra.mxu1 %vm433_vm1, %v374_v52  ;;  %5423 = vmatprep.subr.msk.mxu0 %vm433_vm1, %v382_v56 }
 0x197   :  { %5428 = vmatprep.subr.msk.mxu1 %vm433_vm1, %v392_v55 }
 0x199   :  { %5419 = vmatmul.mubr.msk.f32.vlgmr.msra.gmra.mxu1 %vm433_vm1, %v376_v51  ;;  %5424 = vmatpush3.xpose.msk.msra.mxu0 %vm433_vm1, %v382_v56 }
 0x19a   :  { %5429 = vmatpush3.xpose.msk.msra.mxu1 %vm433_vm1, %v392_v55  ;;  %5432 = vmatprep.mubr.msk.f32.mxu1 %vm433_vm1, %v390_v60 }
 0x19b   :  { %5430 = vmatprep.subr.msk.mxu1 %vm433_vm1, %v390_v60  ;;  %5435 = vmatprep.subr.mxu0 %v6391_v58 }
 0x19c   :  { %5426 = vmatmul.mubr.msk.f32.vlgmr.msra.gmra.mxu0 %vm433_vm1, %v384_v53 }
 0x19d   :  { %5436 = vmatpush3.msra.mxu0 %v6391_v58 }
 0x19e   :  { %5431 = vmatpush3.xpose.msk.msra.mxu1 %vm433_vm1, %v390_v60  ;;  %5437 = vmatprep.subr.mxu0 %v6398_v61 }
 0x19f   :  { %5438 = vmatpush3.msra.mxu0 %v6398_v61 }
 0x1a1   :  { %5433 = vmatmul.mubr.msk.f32.vlgmr.msra.gmra.mxu1 %vm433_vm1, %v392_v55 }
 0x1d6   :  { %v5385_v62 = vpop.f32.mrf.mxu0 }
 0x1d7   :  { %v1067_v0 = vmul.f32 0.25, %v5385_v62 }
 0x1d8   :  { %v504_v1 = vpop.f32.mrf.mxu0 }
 0x1d9   :  { %v1066_v3 = vmul.f32 0.25, %v504_v1  ;;  %v6413_v4 = vadd.f32 %v1067_v0, %v6408_v63 }
 0x1db   :  { %v1101_v5 = vsel %vm433_vm1, %v6413_v4, -inf  ;;  %v6418_v7 = vadd.f32 %v1066_v3, %v6410_v2 }
 0x1dc   :  { %1102 = vmax.xlane.f32.xlu1 %v1101_v5 }
 0x1dd   :  { %v1098_v8 = vsel %vm433_vm1, %v6418_v7, -inf }
 0x1de   :  { %1099 = vmax.xlane.f32.xlu0 %v1098_v8 }
 0x248   :  { %v5392_v11 = vpop.f32.mrf.mxu1 }
 0x249   :  { %v1069_v12 = vmul.f32 0.25, %v5392_v11 }
 0x24a   :  { %v583_v13 = vpop.f32.mrf.mxu1 }
 0x24b   :  { %v6427_v16 = vadd.f32 %v1069_v12, %v6408_v63  ;;  %v1068_v19 = vmul.f32 0.25, %v583_v13 }
 0x24c   :  { %v5399_v18 = vpop.f32.mrf.mxu0 }
 0x24d   :  { %v1071_v20 = vmul.f32 0.25, %v5399_v18  ;;  %v1107_v21 = vsel %vm433_vm1, %v6427_v16, -inf  ;;  %v6440_v30 = vadd.f32 %v1068_v19, %v6410_v2 }
 0x24e   :  { %1108 = vmax.xlane.f32.xlu0 %v1107_v21  ;;  %v662_v23 = vpop.f32.mrf.mxu0  ;;  %v6504_v21 = vadd.f32 %v6422_v9, %v6383_v57 }
 0x24f   :  { %v1070_v24 = vmul.f32 0.25, %v662_v23  ;;  %v6432_v25 = vadd.f32 %v1071_v20, %v6408_v63  ;;  %v1104_v39 = vsel %vm433_vm1, %v6440_v30, -inf  ;;  %v139_v20 = vld [vmem:[%s7470_s4 + $0x8] sm:$0xff] }
 0x251   :  { %v5406_v26 = vpop.f32.mrf.mxu1  ;;  %v1113_v27 = vsel %vm433_vm1, %v6432_v25, -inf  ;;  %v6437_v28 = vadd.f32 %v1070_v24, %v6410_v2 }
 0x252   :  { %v1073_v32 = vmul.f32 0.25, %v5406_v26  ;;  %1114 = vmax.xlane.f32.xlu0 %v1113_v27 }
 0x253   :  { %v741_v34 = vpop.f32.mrf.mxu1  ;;  %v1110_v35 = vsel %vm433_vm1, %v6437_v28, -inf }
 0x254   :  { %v1072_v36 = vmul.f32 0.25, %v741_v34  ;;  %1111 = vmax.xlane.f32.xlu1 %v1110_v35  ;;  %v5413_v37 = vpop.f32.mrf.mxu0  ;;  %v6447_v40 = vadd.f32 %v1073_v32, %v6408_v63 }
 0x255   :  { %v1075_v38 = vmul.f32 0.25, %v5413_v37 }
 0x256   :  { %1105 = vmax.xlane.f32.xlu0 %v1104_v39  ;;  %v820_v41 = vpop.f32.mrf.mxu0  ;;  %v6450_v42 = vadd.f32 %v1072_v36, %v6410_v2  ;;  %v1119_v46 = vsel %vm433_vm1, %v6447_v40, -inf }
 0x257   :  { %v1074_v43 = vmul.f32 0.25, %v820_v41  ;;  %v6460_v48 = vadd.f32 %v1075_v38, %v6408_v63 }
 0x258   :  { %v1116_v44 = vsel %vm433_vm1, %v6450_v42, -inf }
 0x259   :  { %v5420_v45 = vpop.f32.mrf.mxu1  ;;  %1117 = vmax.xlane.f32.xlu1 %v1116_v44  ;;  %v6457_v47 = vadd.f32 %v1074_v43, %v6410_v2  ;;  %v1125_v55 = vsel %vm433_vm1, %v6460_v48, -inf }
 0x25a   :  { %v1077_v49 = vmul.f32 0.25, %v5420_v45  ;;  %1120 = vmax.xlane.f32.xlu0 %v1119_v46 }
 0x25b   :  { %v899_v50 = vpop.f32.mrf.mxu1  ;;  %v1122_v51 = vsel %vm433_vm1, %v6457_v47, -inf }
 0x25c   :  { %v1076_v52 = vmul.f32 0.25, %v899_v50  ;;  %v5427_v53 = vpop.f32.mrf.mxu0  ;;  %v6467_v56 = vadd.f32 %v1077_v49, %v6408_v63 }
 0x25d   :  { %1123 = vmax.xlane.f32.xlu1 %v1122_v51  ;;  %v1079_v54 = vmul.f32 0.25, %v5427_v53 }
 0x25e   :  { %1126 = vmax.xlane.f32.xlu0 %v1125_v55  ;;  %v978_v59 = vpop.f32.mrf.mxu0  ;;  %v6470_v60 = vadd.f32 %v1076_v52, %v6410_v2  ;;  %v1131_v3 = vsel %vm433_vm1, %v6467_v56, -inf }
 0x25f   :  { %v1078_v62 = vmul.f32 0.25, %v978_v59  ;;  %v6480_v8 = vadd.f32 %v1079_v54, %v6408_v63 }
 0x260   :  { %v1128_v0 = vsel %vm433_vm1, %v6470_v60, -inf }
 0x261   :  { %v5434_v1 = vpop.f32.mrf.mxu1  ;;  %1129 = vmax.xlane.f32.xlu1 %v1128_v0  ;;  %v6477_v5 = vadd.f32 %v1078_v62, %v6410_v2  ;;  %v1137_v13 = vsel %vm433_vm1, %v6480_v8, -inf }
 0x262   :  { %v1081_v11 = vmul.f32 0.25, %v5434_v1  ;;  %1132 = vmax.xlane.f32.xlu0 %v1131_v3 }
 0x263   :  { %v1134_v12 = vsel %vm433_vm1, %v6477_v5, -inf  ;;  %v1057_v27 = vpop.f32.mrf.mxu1 }
 0x264   :  { %v6487_v18 = vadd.f32 %v1081_v11, %v6408_v63  ;;  %v6500_v63 = vpop.permute.xlu1 %1276  ;;  %v1080_v32 = vmul.f32 0.25, %v1057_v27 }
 0x265   :  { %1135 = vmax.xlane.f32.xlu1 %v1134_v12 }
 0x266   :  { %1138 = vmax.xlane.f32.xlu0 %v1137_v13  ;;  %v1143_v19 = vsel %vm433_vm1, %v6487_v18, -inf  ;;  %v6522_v34 = vadd.f32 %v1080_v32, %v6410_v2 }
 0x267   :  { %v1100_v35 = vpop.xlane.xlu0 %1099 }
 0x268   :  { %v1103_v23 = vpop.xlane.xlu1 %1102  ;;  %v1146_v36 = vsub.f32 %v6418_v7, %v1100_v35 }
 0x269   :  { %v1147_v24 = vsub.f32 %v6413_v4, %v1103_v23  ;;  %v1140_v4 = vsel %vm433_vm1, %v6522_v34, -inf }
 0x26a   :  { %1144 = vmax.xlane.f32.xlu0 %v1143_v19  ;;  %v1162_v37 = vmul.f32 1.442695, %v1146_v36 }
 0x26b   :  { %v1164_v26 = vmul.f32 1.442695, %v1147_v24 }
 0x26d   :  { %5827 = vpow2.f32 %v1164_v26 }
 0x26e   :  { %5829 = vpow2.f32 %v1162_v37 }
 0x276   :  { %399 = vrot.lane.b32.xlu1 %v6391_v58, %s6104_s3 }
 0x27a   :  { %397 = vrot.lane.b32.xlu1 %v6398_v61, %s6104_s3  ;;  %v6517_v9 = vpop.eup %5827 }
 0x27e   :  { %411 = vrot.lane.b32.xlu1 %v6391_v58, %s6103_s21 }
 0x280   :  { %1281 = vperm.xlu0 %5826, %v139_v20  }
 0x282   :  { %423 = vrot.lane.b32.xlu1 %v6391_v58, %s6105_s26  ;;  %v1197_v58 = vsel %vm433_vm1, %v6517_v9, 0.0 }
 0x284   :  { %415 = vrot.lane.b32.xlu0 %v6504_v21, %s6103_s21 }
 0x286   :  { %409 = vrot.lane.b32.xlu1 %v6398_v61, %s6103_s21 }
 0x28a   :  { %421 = vrot.lane.b32.xlu1 %v6398_v61, %s6105_s26  ;;  %v6528_v61 = vadd.f32 %v6383_v57, %v6424_v10 }
 0x28e   :  { %403 = vrot.lane.b32.xlu1 %v6504_v21, %s6104_s3 }
 0x2a3   :  { %1198 = vadd.xlane.f32.xlu0 %v1197_v58 }
 0x2b2   :  { %1141 = vmax.xlane.f32.xlu1 %v1140_v4 }
 0x2c3   :  { %401 = vrot.lane.b32.xlu1 %v6528_v61, %s6104_s3 }
 0x2c7   :  { %427 = vrot.lane.b32.xlu1 %v6504_v21, %s6105_s26 }
 0x2d7   :  { %v1109_v2 = vpop.xlane.xlu0 %1108 }
 0x2d8   :  { %v1149_v38 = vsub.f32 %v6427_v16, %v1109_v2 }
 0x2da   :  { %v1168_v39 = vmul.f32 1.442695, %v1149_v38 }
 0x2db   :  { %v1115_v41 = vpop.xlane.xlu0 %1114 }
 0x2dc   :  { %5831 = vpow2.f32 %v1168_v39  ;;  %v1151_v57 = vsub.f32 %v6432_v25, %v1115_v41  ;;  %v6541_v25 = vpop.eup %5829 }
 0x2dd   :  { %v1112_v10 = vpop.xlane.xlu1 %1111  ;;  %v1194_v1 = vsel %vm433_vm1, %v6541_v25, 0.0 }
 0x2de   :  { %v1172_v43 = vmul.f32 1.442695, %v1151_v57  ;;  %v1150_v44 = vsub.f32 %v6437_v28, %v1112_v10 }
 0x2df   :  { %v1106_v45 = vpop.xlane.xlu0 %1105 }
 0x2e0   :  { %5833 = vpow2.f32 %v1172_v43  ;;  %v1148_v46 = vsub.f32 %v6440_v30, %v1106_v45  ;;  %v1170_v50 = vmul.f32 1.442695, %v1150_v44 }
 0x2e2   :  { %v1166_v49 = vmul.f32 1.442695, %v1148_v46  ;;  %v1118_v7 = vpop.xlane.xlu1 %1117 }
 0x2e3   :  { %v1152_v51 = vsub.f32 %v6450_v42, %v1118_v7  ;;  %v1121_v16 = vpop.xlane.xlu0 %1120 }
 0x2e4   :  { %5835 = vpow2.f32 %v1166_v49  ;;  %v1153_v52 = vsub.f32 %v6447_v40, %v1121_v16 }
 0x2e5   :  { %5837 = vpow2.f32 %v1170_v50  ;;  %v1174_v55 = vmul.f32 1.442695, %v1152_v51 }
 0x2e6   :  { %v1176_v53 = vmul.f32 1.442695, %v1153_v52  ;;  %v1124_v54 = vpop.xlane.xlu1 %1123 }
 0x2e7   :  { %v1154_v28 = vsub.f32 %v6457_v47, %v1124_v54  ;;  %v1127_v59 = vpop.xlane.xlu0 %1126 }
 0x2e8   :  { %5839 = vpow2.f32 %v1176_v53  ;;  %v1155_v30 = vsub.f32 %v6460_v48, %v1127_v59 }
 0x2e9   :  { %v6545_v62 = vpop.eup %5831  ;;  %5841 = vpow2.f32 %v1174_v55  ;;  %v1178_v3 = vmul.f32 1.442695, %v1154_v28 }
 0x2ea   :  { %v1180_v0 = vmul.f32 1.442695, %v1155_v30  ;;  %v1130_v42 = vpop.xlane.xlu1 %1129  ;;  %v1203_v40 = vsel %vm433_vm1, %v6545_v62, 0.0 }
 0x2eb   :  { %v1156_v11 = vsub.f32 %v6470_v60, %v1130_v42  ;;  %1195 = vadd.xlane.f32.xlu1 %v1194_v1  ;;  %v1133_v47 = vpop.xlane.xlu0 %1132  ;;  %1204 = vadd.xlane.f32.xlu0 %v1203_v40 }
 0x2ec   :  { %5843 = vpow2.f32 %v1180_v0  ;;  %v1157_v48 = vsub.f32 %v6467_v56, %v1133_v47 }
 0x2ed   :  { %v6553_v12 = vpop.eup %5833  ;;  %5845 = vpow2.f32 %v1178_v3  ;;  %v1182_v23 = vmul.f32 1.442695, %v1156_v11 }
 0x2ee   :  { %v1184_v13 = vmul.f32 1.442695, %v1157_v48  ;;  %v1136_v19 = vpop.xlane.xlu1 %1135  ;;  %v1209_v20 = vsel %vm433_vm1, %v6553_v12, 0.0 }
 0x2ef   :  { %v1158_v24 = vsub.f32 %v6477_v5, %v1136_v19  ;;  %1210 = vadd.xlane.f32.xlu0 %v1209_v20  ;;  %v1139_v26 = vpop.xlane.xlu0 %1138 }
 0x2f0   :  { %5847 = vpow2.f32 %v1184_v13  ;;  %v1159_v60 = vsub.f32 %v6480_v8, %v1139_v26 }
 0x2f1   :  { %v6559_v58 = vpop.eup %5835  ;;  %5849 = vpow2.f32 %v1182_v23  ;;  %v1186_v4 = vmul.f32 1.442695, %v1158_v24 }
 0x2f2   :  { %v1188_v27 = vmul.f32 1.442695, %v1159_v60  ;;  %v400_v56 = vpop.permute.xlu1 %399  ;;  %v1200_v32 = vsel %vm433_vm1, %v6559_v58, 0.0  ;;  %v6563_v36 = vpop.eup %5837 }
 0x2f3   :  { %5442 = vmatprep.subr.mxu1 %v400_v56  ;;  %v1145_v35 = vpop.xlane.xlu0 %1144  ;;  %1201 = vadd.xlane.f32.xlu1 %v1200_v32  ;;  %v1206_v39 = vsel %vm433_vm1, %v6563_v36, 0.0 }
 0x2f4   :  { %5851 = vpow2.f32 %v1188_v27  ;;  %v1161_v5 = vsub.f32 %v6487_v18, %v1145_v35  ;;  %5443 = vmatpush3.msra.mxu1 %v400_v56 }
 0x2f5   :  { %v6566_v37 = vpop.eup %5839  ;;  %5853 = vpow2.f32 %v1186_v4 }
 0x2f6   :  { %v1192_v8 = vmul.f32 1.442695, %v1161_v5  ;;  %v398_v2 = vpop.permute.xlu1 %397  ;;  %v1215_v38 = vsel %vm433_vm1, %v6566_v37, 0.0  ;;  %v6572_v41 = vpop.eup %5841 }
 0x2f7   :  { %5444 = vmatprep.subr.mxu1 %v398_v2  ;;  %1216 = vadd.xlane.f32.xlu0 %v1215_v38  ;;  %v1212_v43 = vsel %vm433_vm1, %v6572_v41, 0.0 }
 0x2f8   :  { %5855 = vpow2.f32 %v1192_v8  ;;  %1207 = vadd.xlane.f32.xlu1 %v1206_v39  ;;  %5445 = vmatpush3.msra.mxu1 %v398_v2 }
 0x2f9   :  { %v6574_v18 = vpop.eup %5843 }
 0x2fa   :  { %v6576_v57 = vpop.permute.xlu1 %411  ;;  %v1221_v10 = vsel %vm433_vm1, %v6574_v18, 0.0  ;;  %v6583_v44 = vpop.eup %5845 }
 0x2fb   :  { %5449 = vmatprep.subr.mxu0 %v6576_v57  ;;  %1222 = vadd.xlane.f32.xlu0 %v1221_v10  ;;  %v1218_v7 = vsel %vm433_vm1, %v6583_v44, 0.0  ;;  %v6623_v47 = vpop.permute.xlu0 %1281 }
 0x2fc   :  { %1213 = vadd.xlane.f32.xlu1 %v1212_v43 }
 0x2fd   :  { %v6585_v45 = vpop.eup %5847 }
 0x2fe   :  { %v6587_v46 = vpop.permute.xlu1 %423  ;;  %v1227_v49 = vsel %vm433_vm1, %v6585_v45, 0.0  ;;  %v6594_v50 = vpop.eup %5849 }
 0x2ff   :  { %5456 = vmatprep.subr.mxu1 %v6587_v46  ;;  %1228 = vadd.xlane.f32.xlu0 %v1227_v49  ;;  %v1224_v52 = vsel %vm433_vm1, %v6594_v50, 0.0  ;;  %v6627_v13 = vpop.permute.xlu0 %415 }
 0x300   :  { %1219 = vadd.xlane.f32.xlu1 %v1218_v7 }
 0x301   :  { %v6596_v51 = vpop.eup %5851 }
 0x302   :  { %v1233_v16 = vsel %vm433_vm1, %v6596_v51, 0.0  ;;  %v6602_v53 = vpop.eup %5853  ;;  %v410_v59 = vpop.permute.xlu1 %409 }
 0x303   :  { %1234 = vadd.xlane.f32.xlu0 %v1233_v16  ;;  %v1230_v28 = vsel %vm433_vm1, %v6602_v53, 0.0 }
 0x304   :  { %1225 = vadd.xlane.f32.xlu1 %v1224_v52 }
 0x305   :  { %v6604_v54 = vpop.eup %5855 }
 0x306   :  { %v1239_v55 = vsel %vm433_vm1, %v6604_v54, 0.0  ;;  %v6612_v30 = vpop.permute.xlu1 %421 }
 0x307   :  { %1240 = vadd.xlane.f32.xlu0 %v1239_v55 }
 0x308   :  { %1231 = vadd.xlane.f32.xlu1 %v1230_v28 }
 0x30a   :  { %v6614_v0 = vpop.permute.xlu1 %403 }
 0x31d   :  { %413 = vrot.lane.b32.xlu0 %v6528_v61, %s6103_s21 }
 0x32c   :  { %v1199_v19 = vpop.xlane.xlu0 %1198 }
 0x33b   :  { %v1142_v42 = vpop.xlane.xlu1 %1141 }
 0x33c   :  { %v1160_v1 = vsub.f32 %v6522_v34, %v1142_v42 }
 0x33e   :  { %v1190_v40 = vmul.f32 1.442695, %v1160_v1 }
 0x33f   :  { %v6625_v48 = vpop.permute.xlu1 %401 }
 0x340   :  { %5857 = vpow2.f32 %v1190_v40 }
 0x341   :  { %5859 = vrcp.f32 %v1199_v19 }
 0x343   :  { %v6629_v20 = vpop.permute.xlu1 %427 }
 0x34d   :  { %v6617_v3 = vpop.eup %5857 }
 0x34e   :  { %v1236_v11 = vsel %vm433_vm1, %v6617_v3, 0.0  ;;  %v5860_v60 = vpop.eup %5859 }
 0x34f   :  { %1237 = vadd.xlane.f32.xlu1 %v1236_v11  ;;  %v1259_v4 = vmul.f32 %v5860_v60, %v6517_v9 }
 0x351   :  { %v1285_v38 = vmul.f32 %v6623_v47, %v1259_v4 }
 0x360   :  { %425 = vrot.lane.b32.xlu1 %v6528_v61, %s6105_s26 }
 0x374   :  { %v1196_v34 = vpop.xlane.xlu1 %1195  ;;  %v1205_v23 = vpop.xlane.xlu0 %1204 }
 0x375   :  { %5861 = vrcp.f32 %v1196_v34 }
 0x376   :  { %5863 = vrcp.f32 %v1205_v23 }
 0x378   :  { %v1211_v24 = vpop.xlane.xlu0 %1210 }
 0x37c   :  { %v1202_v26 = vpop.xlane.xlu1 %1201 }
 0x37d   :  { %5865 = vrcp.f32 %v1202_v26 }
 0x37e   :  { %5867 = vrcp.f32 %v1211_v24 }
 0x380   :  { %v1217_v27 = vpop.xlane.xlu0 %1216 }
 0x381   :  { %v1208_v56 = vpop.xlane.xlu1 %1207 }
 0x382   :  { %v5862_v32 = vpop.eup %5861  ;;  %5869 = vrcp.f32 %v1208_v56 }
 0x383   :  { %5871 = vrcp.f32 %v1217_v27  ;;  %v1258_v35 = vmul.f32 %v5862_v32, %v6541_v25  ;;  %v5864_v39 = vpop.eup %5863 }
 0x384   :  { %v1223_v5 = vpop.xlane.xlu0 %1222  ;;  %v1261_v25 = vmul.f32 %v5864_v39, %v6545_v62  ;;  %v2016_v39 = vld [vmem:[%s7475_s9 + $0x30] sm:$0xff] }
 0x385   :  { %v1214_v8 = vpop.xlane.xlu1 %1213  ;;  %v1284_v2 = vmul.f32 %v6500_v63, %v1258_v35 }
 0x386   :  { %5873 = vrcp.f32 %v1214_v8 }
 0x387   :  { %5875 = vrcp.f32 %v1223_v5  ;;  %5439 = vmatprep.mubr.msk.f32.mxu0 %vm433_vm1, %v1284_v2 }
 0x388   :  { %5440 = vmatmul.mubr.msk.f32.vlgmr.msra.gmra.mxu0 %vm433_vm1, %v1285_v38  ;;  %v1229_v10 = vpop.xlane.xlu0 %1228  ;;  %v2017_v38 = vld [vmem:[%s7475_s9 + $0x38] sm:$0xff] }
 0x389   :  { %5450 = vmatpush3.msra.mxu0 %v6576_v57  ;;  %v1220_v9 = vpop.xlane.xlu1 %1219  ;;  %v1287_v57 = vmul.f32 %v6623_v47, %v1261_v25 }
 0x38a   :  { %v5866_v43 = vpop.eup %5865  ;;  %5451 = vmatprep.subr.mxu0 %v410_v59  ;;  %5877 = vrcp.f32 %v1220_v9  ;;  %v2012_v9 = vld [vmem:[%s7475_s9 + $0x10] sm:$0xff] }
 0x38b   :  { %5879 = vrcp.f32 %v1229_v10  ;;  %5452 = vmatpush3.msra.mxu0 %v410_v59  ;;  %v1260_v49 = vmul.f32 %v5866_v43, %v6559_v58  ;;  %v5868_v7 = vpop.eup %5867  ;;  %v2013_v10 = vld [vmem:[%s7475_s9 + $0x18] sm:$0xff]  ;;  %v2011_v43 = vld [vmem:[%s7475_s9 + $0x8] sm:$0xff] }
 0x38c   :  { %5463 = vmatprep.subr.mxu0 %v6504_v21  ;;  %v1235_v16 = vpop.xlane.xlu0 %1234  ;;  %v1263_v62 = vmul.f32 %v5868_v7, %v6553_v12 }
 0x38d   :  { %v1226_v52 = vpop.xlane.xlu1 %1225  ;;  %v1286_v55 = vmul.f32 %v6500_v63, %v1260_v49  ;;  %v2010_v49 = vld [vmem:[%s7475_s9] sm:$0xff] }
 0x38e   :  { %5881 = vrcp.f32 %v1226_v52  ;;  %v1289_v11 = vmul.f32 %v6623_v47, %v1263_v62 }
 0x38f   :  { %v5870_v28 = vpop.eup %5869  ;;  %5883 = vrcp.f32 %v1235_v16  ;;  %5446 = vmatprep.mubr.msk.f32.mxu1 %vm433_vm1, %v1286_v55 }
 0x390   :  { %v5872_v42 = vpop.eup %5871  ;;  %5447 = vmatmul.mubr.msk.f32.vlgmr.msra.gmra.mxu1 %vm433_vm1, %v1287_v57  ;;  %v1262_v58 = vmul.f32 %v5870_v28, %v6563_v36  ;;  %v1241_v24 = vpop.xlane.xlu0 %1240 }
 0x391   :  { %5457 = vmatpush3.msra.mxu1 %v6587_v46  ;;  %v1232_v59 = vpop.xlane.xlu1 %1231  ;;  %v1265_v12 = vmul.f32 %v5872_v42, %v6566_v37 }
 0x392   :  { %5885 = vrcp.f32 %v1232_v59  ;;  %5458 = vmatprep.subr.mxu1 %v6612_v30  ;;  %v1288_v1 = vmul.f32 %v6500_v63, %v1262_v58 }
 0x393   :  { %v5874_v40 = vpop.eup %5873  ;;  %5459 = vmatpush3.msra.mxu1 %v6612_v30  ;;  %v1291_v30 = vmul.f32 %v6623_v47, %v1265_v12  ;;  %5887 = vrcp.f32 %v1241_v24 }
 0x394   :  { %v5876_v19 = vpop.eup %5875  ;;  %5453 = vmatprep.mubr.msk.f32.mxu0 %vm433_vm1, %v1288_v1  ;;  %5470 = vmatprep.subr.mxu1 %v6614_v0  ;;  %v1264_v36 = vmul.f32 %v5874_v40, %v6572_v41 }
 0x395   :  { %5454 = vmatmul.mubr.msk.f32.vlgmr.msra.gmra.mxu0 %vm433_vm1, %v1289_v11  ;;  %v1267_v37 = vmul.f32 %v5876_v19, %v6574_v18 }
 0x396   :  { %5464 = vmatpush3.msra.mxu0 %v6504_v21  ;;  %v1290_v46 = vmul.f32 %v6500_v63, %v1264_v36 }
 0x397   :  { %v5878_v34 = vpop.eup %5877  ;;  %5465 = vmatprep.subr.mxu0 %v6528_v61  ;;  %v1293_v18 = vmul.f32 %v6623_v47, %v1267_v37 }
 0x398   :  { %v5880_v23 = vpop.eup %5879  ;;  %5466 = vmatpush3.msra.mxu0 %v6528_v61  ;;  %5460 = vmatprep.mubr.msk.f32.mxu1 %vm433_vm1, %v1290_v46  ;;  %v1266_v41 = vmul.f32 %v5878_v34, %v6583_v44 }
 0x399   :  { %5477 = vmatprep.subr.mxu0 %v6627_v13  ;;  %5461 = vmatmul.mubr.msk.f32.vlgmr.msra.gmra.mxu1 %vm433_vm1, %v1291_v30  ;;  %v1269_v60 = vmul.f32 %v5880_v23, %v6585_v45 }
 0x39a   :  { %5471 = vmatpush3.msra.mxu1 %v6614_v0  ;;  %v1292_v21 = vmul.f32 %v6500_v63, %v1266_v41  ;;  %v414_v0 = vpop.permute.xlu0 %413 }
 0x39b   :  { %v5882_v26 = vpop.eup %5881  ;;  %5472 = vmatprep.subr.mxu1 %v6625_v48  ;;  %v1295_v45 = vmul.f32 %v6623_v47, %v1269_v60 }
 0x39c   :  { %v5884_v61 = vpop.eup %5883  ;;  %5473 = vmatpush3.msra.mxu1 %v6625_v48  ;;  %5467 = vmatprep.mubr.msk.f32.mxu0 %vm433_vm1, %v1292_v21  ;;  %v1268_v44 = vmul.f32 %v5882_v26, %v6594_v50 }
 0x39d   :  { %5484 = vmatprep.subr.mxu1 %v6629_v20  ;;  %5468 = vmatmul.mubr.msk.f32.vlgmr.msra.gmra.mxu0 %vm433_vm1, %v1293_v18  ;;  %v1271_v32 = vmul.f32 %v5884_v61, %v6596_v51 }
 0x39e   :  { %5478 = vmatpush3.msra.mxu0 %v6627_v13  ;;  %v1294_v27 = vmul.f32 %v6500_v63, %v1268_v44 }
 0x39f   :  { %v5886_v56 = vpop.eup %5885  ;;  %5479 = vmatprep.subr.mxu0 %v414_v0  ;;  %v1297_v13 = vmul.f32 %v6623_v47, %v1271_v32 }
 0x3a0   :  { %5480 = vmatpush3.msra.mxu0 %v414_v0  ;;  %5474 = vmatprep.mubr.msk.f32.mxu1 %vm433_vm1, %v1294_v27  ;;  %v1270_v50 = vmul.f32 %v5886_v56, %v6602_v53  ;;  %v5888_v35 = vpop.eup %5887 }
 0x3a1   :  { %5475 = vmatmul.mubr.msk.f32.vlgmr.msra.gmra.mxu1 %vm433_vm1, %v1295_v45  ;;  %v1273_v5 = vmul.f32 %v5888_v35, %v6604_v54  ;;  %5491 = vmatprep.subr.mxu0 %v2017_v38  ;;  %v2015_v54 = vld [vmem:[%s7475_s9 + $0x28] sm:$0xff]  ;;  %v4934_v35 = vld [vmem:[%s7476_s10] ss:$0 sm:$0xff] }
 0x3a2   :  { %5485 = vmatpush3.msra.mxu1 %v6629_v20  ;;  %v1296_v48 = vmul.f32 %v6500_v63, %v1270_v50 }
 0x3a3   :  { %v1299_v2 = vmul.f32 %v6623_v47, %v1273_v5 }
 0x3a4   :  { %5481 = vmatprep.mubr.msk.f32.mxu0 %vm433_vm1, %v1296_v48 }
 0x3a5   :  { %5482 = vmatmul.mubr.msk.f32.vlgmr.msra.gmra.mxu0 %vm433_vm1, %v1297_v13 }
 0x3a6   :  { %5492 = vmatpush3.msra.mxu0 %v2017_v38 }
 0x3a7   :  { %5493 = vmatprep.subr.mxu0 %v2016_v39 }
 0x3a8   :  { %5494 = vmatpush3.msra.mxu0 %v2016_v39 }
 0x3a9   :  { %5495 = vmatprep.subr.mxu0 %v2015_v54 }
 0x3aa   :  { %5496 = vmatpush3.msra.mxu0 %v2015_v54 }
 0x3d8   :  { %v1238_v4 = vpop.xlane.xlu1 %1237 }
 0x3d9   :  { %5889 = vrcp.f32 %v1238_v4 }
 0x3dc   :  { %v426_v51 = vpop.permute.xlu1 %425 }
 0x3dd   :  { %5486 = vmatprep.subr.mxu1 %v426_v51 }
 0x3de   :  { %5487 = vmatpush3.msra.mxu1 %v426_v51 }
 0x3e6   :  { %v5890_v53 = vpop.eup %5889 }
 0x3e7   :  { %v1272_v20 = vmul.f32 %v5890_v53, %v6617_v3  ;;  %v2014_v3 = vld [vmem:[%s7475_s9 + $0x20] sm:$0xff] }
 0x3e8   :  { %5497 = vmatprep.subr.mxu0 %v2014_v3 }
 0x3e9   :  { %v1298_v8 = vmul.f32 %v6500_v63, %v1272_v20  ;;  %5498 = vmatpush3.msra.mxu0 %v2014_v3 }
 0x3ea   :  { %5499 = vmatprep.subr.mxu0 %v2013_v10 }
 0x3eb   :  { %5488 = vmatprep.mubr.msk.f32.mxu1 %vm433_vm1, %v1298_v8  ;;  %5500 = vmatpush3.msra.mxu0 %v2013_v10 }
 0x3ec   :  { %5489 = vmatmul.mubr.msk.f32.vlgmr.msra.gmra.mxu1 %vm433_vm1, %v1299_v2  ;;  %5501 = vmatprep.subr.mxu0 %v2012_v9 }
 0x3ed   :  { %5502 = vmatpush3.msra.mxu0 %v2012_v9 }
 0x3ee   :  { %5503 = vmatprep.subr.mxu0 %v2011_v43 }
 0x3ef   :  { %5504 = vmatpush3.msra.mxu0 %v2011_v43 }
 0x3f0   :  { %5505 = vmatprep.subr.mxu0 %v2010_v49 }
 0x3f1   :  { %5506 = vmatpush3.msra.mxu0 %v2010_v49 }
 0x448   :  { %v5441_v25 = vpop.f32.mrf.mxu0 }
 0x44a   :  { %v1372_v52 = vpop.f32.mrf.mxu0 }
 0x450   :  { %v5448_v7 = vpop.f32.mrf.mxu1 }
 0x451   :  { %1954 = vrot.lane.b32.xlu1 %v5448_v7, %s6107_s24 }
 0x452   :  { %v1453_v16 = vpop.f32.mrf.mxu1 }
 0x453   :  { %1952 = vrot.lane.b32.xlu0 %v1453_v16, %s6107_s24 }
 0x455   :  { %v5455_v55 = vpop.f32.mrf.mxu0 }
 0x456   :  { %1970 = vrot.lane.b32.xlu1 %v5455_v55, %s6108_s25 }
 0x457   :  { %v1534_v57 = vpop.f32.mrf.mxu0 }
 0x458   :  { %1968 = vrot.lane.b32.xlu0 %v1534_v57, %s6108_s25 }
 0x459   :  { %v5462_v28 = vpop.f32.mrf.mxu1 }
 0x45a   :  { %1986 = vrot.lane.b32.xlu1 %v5462_v28, %s6109_s27 }
 0x45b   :  { %v1615_v62 = vpop.f32.mrf.mxu1 }
 0x45c   :  { %1984 = vrot.lane.b32.xlu0 %v1615_v62, %s6109_s27 }
 0x45d   :  { %v5469_v42 = vpop.f32.mrf.mxu0 }
 0x45f   :  { %v1696_v59 = vpop.f32.mrf.mxu0 }
 0x461   :  { %v5476_v58 = vpop.f32.mrf.mxu1 }
 0x462   :  { %1958 = vrot.lane.b32.xlu1 %v5476_v58, %s6107_s24  ;;  %v2208_v58 = vld [vmem:[#allocation8 + $0x38] sm:$0xff] }
 0x463   :  { %v1777_v1 = vpop.f32.mrf.mxu1  ;;  %5513 = vmatprep.subr.mxu1 %v2208_v58 }
 0x464   :  { %1956 = vrot.lane.b32.xlu0 %v1777_v1, %s6107_s24  ;;  %5514 = vmatpush3.msra.mxu1 %v2208_v58  ;;  %v2206_v1 = vld [vmem:[#allocation8 + $0x28] sm:$0xff] }
 0x465   :  { %v5483_v40 = vpop.f32.mrf.mxu0 }
 0x466   :  { %1974 = vrot.lane.b32.xlu1 %v5483_v40, %s6108_s25  ;;  %v2205_v40 = vld [vmem:[#allocation8 + $0x20] sm:$0xff] }
 0x467   :  { %v1858_v11 = vpop.f32.mrf.mxu0 }
 0x468   :  { %1972 = vrot.lane.b32.xlu0 %v1858_v11, %s6108_s25  ;;  %v2204_v11 = vld [vmem:[#allocation8 + $0x18] sm:$0xff] }
 0x4ac   :  { %v5490_v12 = vpop.f32.mrf.mxu1 }
 0x4ad   :  { %1990 = vrot.lane.b32.xlu1 %v5490_v12, %s6109_s27  ;;  %v2203_v12 = vld [vmem:[#allocation8 + $0x10] sm:$0xff] }
 0x4ae   :  { %v1939_v19 = vpop.f32.mrf.mxu1 }
 0x4af   :  { %1988 = vrot.lane.b32.xlu0 %v1939_v19, %s6109_s27  ;;  %v2202_v19 = vld [vmem:[#allocation8 + $0x8] sm:$0xff] }
 0x4c3   :  { %v1955_v36 = vpop.permute.xlu1 %1954 }
 0x4c4   :  { %v1997_v24 = vsel %vm433_vm1, %v5441_v25, %v1955_v36  ;;  %v2201_v36 = vld [vmem:[#allocation8] sm:$0xff] }
 0x4c5   :  { %v1953_v46 = vpop.permute.xlu0 %1952 }
 0x4c6   :  { %v1996_v37 = vsel %vm433_vm1, %v1372_v52, %v1953_v46 }
 0x4c8   :  { %v1971_v34 = vpop.permute.xlu1 %1970 }
 0x4c9   :  { %v2002_v26 = vsel %vm2000_vm2, %v1997_v24, %v1971_v34 }
 0x4ca   :  { %v1969_v30 = vpop.permute.xlu0 %1968 }
 0x4cb   :  { %v2001_v41 = vsel %vm2000_vm2, %v1996_v37, %v1969_v30 }
 0x4cc   :  { %v1987_v23 = vpop.permute.xlu1 %1986 }
 0x4cd   :  { %v2007_v60 = vsel %vm2005_vm3, %v2002_v26, %v1987_v23 }
 0x4ce   :  { %v1985_v21 = vpop.permute.xlu0 %1984 }
 0x4cf   :  { %v2006_v18 = vsel %vm2005_vm3, %v2001_v41, %v1985_v21 }
 0x4d0   :  { %5507 = vmatprep.mubr.msk.f32.mxu0 %vm155_vm0, %v2006_v18 }
 0x4d1   :  { %5508 = vmatmul.mubr.msk.f32.vlgmr.msra.gmra.mxu0 %vm155_vm0, %v2007_v60  ;;  %v2332_v60 = vld [vmem:[%s7481_s15 + $0x78] sm:$0xff] }
 0x4d2   :  { %5535 = vmatprep.subr.mxu0 %v2332_v60 }
 0x4d3   :  { %5536 = vmatpush3.msra.mxu0 %v2332_v60 }
 0x4d4   :  { %v1959_v61 = vpop.permute.xlu1 %1958 }
 0x4d5   :  { %v1999_v32 = vsel %vm433_vm1, %v5469_v42, %v1959_v61  ;;  %v2331_v61 = vld [vmem:[%s7481_s15 + $0x70] sm:$0xff] }
 0x4d6   :  { %v1957_v44 = vpop.permute.xlu0 %1956  ;;  %5537 = vmatprep.subr.mxu0 %v2331_v61 }
 0x4d7   :  { %v1998_v56 = vsel %vm433_vm1, %v1696_v59, %v1957_v44  ;;  %v2207_v59 = vld [vmem:[#allocation8 + $0x30] sm:$0xff]  ;;  %v2330_v44 = vld [vmem:[%s7481_s15 + $0x68] sm:$0xff]  ;;  %5538 = vmatpush3.msra.mxu0 %v2331_v61 }
 0x4d8   :  { %v1975_v0 = vpop.permute.xlu1 %1974  ;;  %5515 = vmatprep.subr.mxu1 %v2207_v59  ;;  %5539 = vmatprep.subr.mxu0 %v2330_v44  ;;  %v4946_v61 = vld [vmem:[%s7482_s16] ss:$0 sm:$0xff] }
 0x4d9   :  { %v2004_v13 = vsel %vm2000_vm2, %v1999_v32, %v1975_v0  ;;  %5516 = vmatpush3.msra.mxu1 %v2207_v59  ;;  %v2329_v0 = vld [vmem:[%s7481_s15 + $0x60] sm:$0xff]  ;;  %5540 = vmatpush3.msra.mxu0 %v2330_v44 }
 0x4da   :  { %v1973_v27 = vpop.permute.xlu0 %1972  ;;  %5517 = vmatprep.subr.mxu1 %v2206_v1  ;;  %5541 = vmatprep.subr.mxu0 %v2329_v0  ;;  %v2325_v32 = vld [vmem:[%s7481_s15 + $0x40] sm:$0xff] }
 0x4db   :  { %v2003_v50 = vsel %vm2000_vm2, %v1998_v56, %v1973_v27  ;;  %5518 = vmatpush3.msra.mxu1 %v2206_v1  ;;  %v2328_v27 = vld [vmem:[%s7481_s15 + $0x58] sm:$0xff]  ;;  %5542 = vmatpush3.msra.mxu0 %v2329_v0  ;;  %v2327_v56 = vld [vmem:[%s7481_s15 + $0x50] sm:$0xff] }
 0x4dc   :  { %5519 = vmatprep.subr.mxu1 %v2205_v40  ;;  %5543 = vmatprep.subr.mxu0 %v2328_v27 }
 0x4dd   :  { %5520 = vmatpush3.msra.mxu1 %v2205_v40  ;;  %5544 = vmatpush3.msra.mxu0 %v2328_v27 }
 0x4de   :  { %5521 = vmatprep.subr.mxu1 %v2204_v11  ;;  %5545 = vmatprep.subr.mxu0 %v2327_v56 }
 0x4df   :  { %5522 = vmatpush3.msra.mxu1 %v2204_v11  ;;  %5546 = vmatpush3.msra.mxu0 %v2327_v56 }
 0x4e0   :  { %5523 = vmatprep.subr.mxu1 %v2203_v12 }
 0x4e1   :  { %5524 = vmatpush3.msra.mxu1 %v2203_v12 }
 0x4e2   :  { %5525 = vmatprep.subr.mxu1 %v2202_v19 }
 0x4e3   :  { %5526 = vmatpush3.msra.mxu1 %v2202_v19  ;;  %v4941_v19 = vld [vmem:[%s7480_s14] ss:$0 sm:$0xff] }
 0x4e4   :  { %5527 = vmatprep.subr.mxu1 %v2201_v36 }
 0x4e5   :  { %5528 = vmatpush3.msra.mxu1 %v2201_v36 }
 0x51f   :  { %v1991_v45 = vpop.permute.xlu1 %1990 }
 0x520   :  { %v2009_v51 = vsel %vm2005_vm3, %v2004_v13, %v1991_v45  ;;  %v2326_v45 = vld [vmem:[%s7481_s15 + $0x48] sm:$0xff] }
 0x521   :  { %v1989_v48 = vpop.permute.xlu0 %1988  ;;  %5547 = vmatprep.subr.mxu0 %v2326_v45 }
 0x522   :  { %v2008_v4 = vsel %vm2005_vm3, %v2003_v50, %v1989_v48  ;;  %5548 = vmatpush3.msra.mxu0 %v2326_v45  ;;  %v2324_v48 = vld [vmem:[%s7481_s15 + $0x38] sm:$0xff] }
 0x523   :  { %5510 = vmatprep.mubr.msk.f32.mxu0 %vm155_vm0, %v2008_v4  ;;  %5549 = vmatprep.subr.mxu0 %v2325_v32 }
 0x524   :  { %5511 = vmatmul.mubr.msk.f32.gmra.mxu0 %vm155_vm0, %v2009_v51  ;;  %v2323_v51 = vld [vmem:[%s7481_s15 + $0x30] sm:$0xff] }
 0x525   :  { %5550 = vmatpush3.msra.mxu0 %v2325_v32 }
 0x526   :  { %5551 = vmatprep.subr.mxu0 %v2324_v48 }
 0x527   :  { %5552 = vmatpush3.msra.mxu0 %v2324_v48 }
 0x528   :  { %5553 = vmatprep.subr.mxu0 %v2323_v51 }
 0x529   :  { %5554 = vmatpush3.msra.mxu0 %v2323_v51 }
 0x591   :  { %v5509_v53 = vpop.f32.mrf.mxu0 }
 0x592   :  { %v2109_v5 = vadd.f32 %v5509_v53, %v4934_v35 }
 0x593   :  { %v2103_v20 = vpop.f32.mrf.mxu0 }
 0x594   :  { %v2104_v8 = vadd.f32 %v4934_v35, %v2103_v20  ;;  %v2123_v2 = vadd.f32 %v2109_v5, %v6272_v14  ;;  %v2322_v5 = vld [vmem:[%s7481_s15 + $0x28] sm:$0xff] }
 0x595   :  { %5555 = vmatprep.subr.mxu0 %v2322_v5 }
 0x596   :  { %v2129_v38 = vsel %vm155_vm0, %v2123_v2, 0.0  ;;  %v2122_v39 = vadd.f32 %v2104_v8, %v6253_v6  ;;  %v2321_v8 = vld [vmem:[%s7481_s15 + $0x20] sm:$0xff]  ;;  %5556 = vmatpush3.msra.mxu0 %v2322_v5 }
 0x597   :  { %2130 = vadd.xlane.f32.xlu1 %v2129_v38  ;;  %5557 = vmatprep.subr.mxu0 %v2321_v8 }
 0x598   :  { %v2126_v54 = vsel %vm155_vm0, %v2122_v39, 0.0  ;;  %5558 = vmatpush3.msra.mxu0 %v2321_v8 }
 0x599   :  { %2127 = vadd.xlane.f32.xlu0 %v2126_v54 }
 0x5e4   :  { %v5512_v3 = vpop.f32.mrf.mxu0 }
 0x5e5   :  { %v2119_v9 = vadd.f32 %v5512_v3, %v4934_v35 }
 0x5e6   :  { %v2113_v10 = vpop.f32.mrf.mxu0 }
 0x5e7   :  { %v2114_v43 = vadd.f32 %v4934_v35, %v2113_v10  ;;  %v2125_v7 = vadd.f32 %v2119_v9, %v6279_v17 }
 0x5e9   :  { %v2124_v25 = vadd.f32 %v2114_v43, %v6275_v15  ;;  %v2135_v14 = vsel %vm155_vm0, %v2125_v7, 0.0  ;;  %v4940_v43 = vld [vmem:[%s7478_s12] ss:$0 sm:$0xff] }
 0x5eb   :  { %v2132_v49 = vsel %vm155_vm0, %v2124_v25, 0.0 }
 0x5ec   :  { %2133 = vadd.xlane.f32.xlu0 %v2132_v49 }
 0x5f0   :  { %2136 = vadd.xlane.f32.xlu0 %v2135_v14 }
 0x620   :  { %v2131_v16 = vpop.xlane.xlu1 %2130 }
 0x621   :  { %v2140_v6 = vmul.f32 0.015625, %v2131_v16 }
 0x622   :  { %v2128_v52 = vpop.xlane.xlu0 %2127 }
 0x623   :  { %v6758_v55 = vsub.f32 %v2123_v2, %v2140_v6  ;;  %v2139_v57 = vmul.f32 0.015625, %v2128_v52 }
 0x625   :  { %v6760_v28 = vsub.f32 %v2122_v39, %v2139_v57  ;;  %v2148_v62 = vmul.f32 %v6758_v55, %v6758_v55  ;;  %v4939_v39 = vld [vmem:[%s7477_s11] ss:$0 sm:$0xff]  ;;  %v2320_v57 = vld [vmem:[%s7481_s15 + $0x18] sm:$0xff] }
 0x626   :  { %5559 = vmatprep.subr.mxu0 %v2320_v57 }
 0x627   :  { %v2154_v15 = vsel %vm155_vm0, %v2148_v62, 0.0  ;;  %v2147_v17 = vmul.f32 %v6760_v28, %v6760_v28  ;;  %5560 = vmatpush3.msra.mxu0 %v2320_v57  ;;  %v2318_v62 = vld [vmem:[%s7481_s15 + $0x8] sm:$0xff] }
 0x628   :  { %2155 = vadd.xlane.f32.xlu0 %v2154_v15  ;;  %v2317_v15 = vld [vmem:[%s7481_s15] sm:$0xff]  ;;  %v4950_v57 = vld [vmem:[%s7471_s5 + $0x48] sm:$0xff] }
 0x629   :  { %v2151_v42 = vsel %vm155_vm0, %v2147_v17, 0.0 }
 0x62a   :  { %2152 = vadd.xlane.f32.xlu1 %v2151_v42 }
 0x675   :  { %v2134_v46 = vpop.xlane.xlu0 %2133 }
 0x676   :  { %v2141_v34 = vmul.f32 0.015625, %v2134_v46 }
 0x678   :  { %v6768_v30 = vsub.f32 %v2124_v25, %v2141_v34 }
 0x679   :  { %v2137_v37 = vpop.xlane.xlu0 %2136 }
 0x67a   :  { %v2142_v23 = vmul.f32 0.015625, %v2137_v37  ;;  %v2149_v24 = vmul.f32 %v6768_v30, %v6768_v30 }
 0x67c   :  { %v6772_v41 = vsub.f32 %v2125_v7, %v2142_v23  ;;  %v2157_v21 = vsel %vm155_vm0, %v2149_v24, 0.0 }
 0x67d   :  { %2158 = vadd.xlane.f32.xlu1 %v2157_v21 }
 0x67e   :  { %v2150_v26 = vmul.f32 %v6772_v41, %v6772_v41 }
 0x680   :  { %v2160_v18 = vsel %vm155_vm0, %v2150_v26, 0.0 }
 0x681   :  { %2161 = vadd.xlane.f32.xlu0 %v2160_v18 }
 0x6b1   :  { %v2156_v50 = vpop.xlane.xlu0 %2155 }
 0x6b2   :  { %v2164_v13 = vmul.f32 0.015625, %v2156_v50 }
 0x6b3   :  { %v2153_v4 = vpop.xlane.xlu1 %2152 }
 0x6b4   :  { %v2168_v35 = vadd.f32 1e-05, %v2164_v13  ;;  %v2163_v53 = vmul.f32 0.015625, %v2153_v4 }
 0x6b6   :  { %5891 = vrsqrt.f32 %v2168_v35  ;;  %v2167_v20 = vadd.f32 1e-05, %v2163_v53 }
 0x6b8   :  { %5893 = vrsqrt.f32 %v2167_v20 }
 0x6c3   :  { %v5892_v2 = vpop.eup %5891 }
 0x6c4   :  { %v2176_v38 = vmul.f32 %v5892_v2, %v6758_v55 }
 0x6c5   :  { %v5894_v54 = vpop.eup %5893 }
 0x6c6   :  { %v2175_v3 = vmul.f32 %v5894_v54, %v6760_v28  ;;  %v2187_v10 = vmul.f32 %v4939_v39, %v2176_v38  ;;  %v2319_v28 = vld [vmem:[%s7481_s15 + $0x10] sm:$0xff] }
 0x6c7   :  { %5561 = vmatprep.subr.mxu0 %v2319_v28 }
 0x6c8   :  { %v2186_v9 = vmul.f32 %v4939_v39, %v2175_v3  ;;  %v2198_v49 = vadd.f32 %v4940_v43, %v2187_v10  ;;  %5562 = vmatpush3.msra.mxu0 %v2319_v28  ;;  %v4949_v28 = vld [vmem:[%s7471_s5 + $0x40] sm:$0xff] }
 0x6c9   :  { %5563 = vmatprep.subr.mxu0 %v2318_v62 }
 0x6ca   :  { %v2197_v25 = vadd.f32 %v4940_v43, %v2186_v9  ;;  %5564 = vmatpush3.msra.mxu0 %v2318_v62 }
 0x6cb   :  { %5565 = vmatprep.subr.mxu0 %v2317_v15 }
 0x6cc   :  { %5529 = vmatprep.mubr.msk.f32.mxu1 %vm155_vm0, %v2197_v25  ;;  %5566 = vmatpush3.msra.mxu0 %v2317_v15 }
 0x6cd   :  { %5530 = vmatmul.mubr.msk.f32.vlgmr.msra.gmra.mxu1 %vm155_vm0, %v2198_v49 }
 0x706   :  { %v2159_v7 = vpop.xlane.xlu1 %2158 }
 0x707   :  { %v2165_v14 = vmul.f32 0.015625, %v2159_v7  ;;  %v4956_v7 = vld [vmem:[%s7471_s5 + $0x78] sm:$0xff] }
 0x708   :  { %5573 = vmatprep.subr.mxu1 %v4956_v7 }
 0x709   :  { %v2169_v16 = vadd.f32 1e-05, %v2165_v14  ;;  %5574 = vmatpush3.msra.mxu1 %v4956_v7  ;;  %v4955_v14 = vld [vmem:[%s7471_s5 + $0x70] sm:$0xff] }
 0x70a   :  { %v2162_v6 = vpop.xlane.xlu0 %2161  ;;  %5575 = vmatprep.subr.mxu1 %v4955_v14 }
 0x70b   :  { %5895 = vrsqrt.f32 %v2169_v16  ;;  %v2166_v52 = vmul.f32 0.015625, %v2162_v6  ;;  %5576 = vmatpush3.msra.mxu1 %v4955_v14  ;;  %v4954_v16 = vld [vmem:[%s7471_s5 + $0x68] sm:$0xff]  ;;  %v4953_v6 = vld [vmem:[%s7471_s5 + $0x60] sm:$0xff] }
 0x70c   :  { %5577 = vmatprep.subr.mxu1 %v4954_v16 }
 0x70d   :  { %v2170_v55 = vadd.f32 1e-05, %v2166_v52  ;;  %5578 = vmatpush3.msra.mxu1 %v4954_v16  ;;  %v4952_v52 = vld [vmem:[%s7471_s5 + $0x58] sm:$0xff] }
 0x70e   :  { %5579 = vmatprep.subr.mxu1 %v4953_v6 }
 0x70f   :  { %5897 = vrsqrt.f32 %v2170_v55  ;;  %5580 = vmatpush3.msra.mxu1 %v4953_v6  ;;  %v4951_v55 = vld [vmem:[%s7471_s5 + $0x50] sm:$0xff] }
 0x710   :  { %5581 = vmatprep.subr.mxu1 %v4952_v52 }
 0x711   :  { %5582 = vmatpush3.msra.mxu1 %v4952_v52 }
 0x712   :  { %5583 = vmatprep.subr.mxu1 %v4951_v55 }
 0x713   :  { %5584 = vmatpush3.msra.mxu1 %v4951_v55  ;;  %v6953_v55 = vld [vmem:[%s7474_s8 + $0x1] ss:$0 sm:$0xff] }
 0x714   :  { %5585 = vmatprep.subr.mxu1 %v4950_v57 }
 0x715   :  { %5586 = vmatpush3.msra.mxu1 %v4950_v57 }
 0x716   :  { %5587 = vmatprep.subr.mxu1 %v4949_v28 }
 0x717   :  { %5588 = vmatpush3.msra.mxu1 %v4949_v28 }
 0x718   :  { %v5896_v17 = vpop.eup %5895 }
 0x719   :  { %v2177_v42 = vmul.f32 %v5896_v17, %v6768_v30 }
 0x71b   :  { %v2188_v58 = vmul.f32 %v4939_v39, %v2177_v42 }
 0x71c   :  { %v5898_v59 = vpop.eup %5897 }
 0x71d   :  { %v2199_v1 = vadd.f32 %v4940_v43, %v2188_v58  ;;  %v2178_v40 = vmul.f32 %v5898_v59, %v6772_v41 }
 0x71f   :  { %5532 = vmatprep.mubr.msk.f32.mxu1 %vm155_vm0, %v2199_v1  ;;  %v2189_v11 = vmul.f32 %v4939_v39, %v2178_v40 }
 0x721   :  { %v2200_v12 = vadd.f32 %v4940_v43, %v2189_v11 }
 0x723   :  { %5533 = vmatmul.mubr.msk.f32.gmra.mxu1 %vm155_vm0, %v2200_v12 }
 0x78d   :  { %v5531_v36 = vpop.f32.mrf.mxu1 }
 0x78e   :  { %v2300_v46 = vadd.f32 %v5531_v36, %v4941_v19 }
 0x78f   :  { %v2294_v34 = vpop.f32.mrf.mxu1 }
 0x790   :  { %v2295_v37 = vadd.f32 %v4941_v19, %v2294_v34  ;;  %v2314_v23 = vmax.f32 %v2300_v46, 0.0 }
 0x792   :  { %v2313_v30 = vmax.f32 %v2295_v37, 0.0 }
 0x794   :  { %5567 = vmatprep.mubr.f32.mxu0 %v2313_v30 }
 0x795   :  { %5568 = vmatmul.mubr.f32.vlgmr.msra.gmra.mxu0 %v2314_v23 }
 0x7e3   :  { %v5534_v24 = vpop.f32.mrf.mxu1 }
 0x7e4   :  { %v2310_v41 = vadd.f32 %v5534_v24, %v4941_v19 }
 0x7e5   :  { %v2304_v21 = vpop.f32.mrf.mxu1 }
 0x7e6   :  { %v2305_v26 = vadd.f32 %v4941_v19, %v2304_v21  ;;  %v2316_v60 = vmax.f32 %v2310_v41, 0.0  ;;  %v4970_v19 = vld [vmem:[%s7473_s7 + $0x78] sm:$0xff]  ;;  %v4947_v21 = vld [vmem:[%s7483_s17] ss:$0 sm:$0xff] }
 0x7e7   :  { %5595 = vmatprep.subr.mxu1 %v4970_v19 }
 0x7e8   :  { %v2315_v18 = vmax.f32 %v2305_v26, 0.0 }
 0x7ea   :  { %5570 = vmatprep.mubr.f32.mxu0 %v2315_v18 }
 0x7eb   :  { %5571 = vmatmul.mubr.f32.gmra.mxu0 %v2316_v60 }
 0x855   :  { %v5569_v44 = vpop.f32.mrf.mxu0 }
 0x856   :  { %v2412_v0 = vadd.f32 %v5569_v44, %v4946_v61  ;;  %v4948_v44 = vld [vmem:[%s7484_s18] ss:$0 sm:$0xff] }
 0x857   :  { %v2406_v27 = vpop.f32.mrf.mxu0 }
 0x858   :  { %v2407_v56 = vadd.f32 %v4946_v61, %v2406_v27  ;;  %v2426_v45 = vadd.f32 %v2412_v0, %v2198_v49 }
 0x85a   :  { %v2432_v32 = vsel %vm155_vm0, %v2426_v45, 0.0  ;;  %v2425_v50 = vadd.f32 %v2407_v56, %v2197_v25  ;;  %v4969_v56 = vld [vmem:[%s7473_s7 + $0x70] sm:$0xff] }
 0x85b   :  { %2433 = vadd.xlane.f32.xlu0 %v2432_v32  ;;  %v4967_v32 = vld [vmem:[%s7473_s7 + $0x60] sm:$0xff] }
 0x85c   :  { %v2429_v48 = vsel %vm155_vm0, %v2425_v50, 0.0 }
 0x85d   :  { %2430 = vadd.xlane.f32.xlu1 %v2429_v48  ;;  %v4965_v48 = vld [vmem:[%s7473_s7 + $0x50] sm:$0xff] }
 0x8ab   :  { %v5572_v13 = vpop.f32.mrf.mxu0 }
 0x8ac   :  { %v2422_v4 = vadd.f32 %v5572_v13, %v4946_v61  ;;  %v4964_v13 = vld [vmem:[%s7473_s7 + $0x48] sm:$0xff] }
 0x8ad   :  { %v2416_v51 = vpop.f32.mrf.mxu0 }
 0x8ae   :  { %v2417_v35 = vadd.f32 %v4946_v61, %v2416_v51  ;;  %v2428_v53 = vadd.f32 %v2422_v4, %v2200_v12  ;;  %v4963_v4 = vld [vmem:[%s7473_s7 + $0x40] sm:$0xff] }
 0x8b0   :  { %v2438_v5 = vsel %vm155_vm0, %v2428_v53, 0.0  ;;  %v2427_v20 = vadd.f32 %v2417_v35, %v2199_v1 }
 0x8b1   :  { %2439 = vadd.xlane.f32.xlu0 %v2438_v5 }
 0x8b2   :  { %v2435_v8 = vsel %vm155_vm0, %v2427_v20, 0.0 }
 0x8b3   :  { %2436 = vadd.xlane.f32.xlu1 %v2435_v8 }
 0x8e4   :  { %v2434_v2 = vpop.xlane.xlu0 %2433 }
 0x8e5   :  { %v2442_v38 = vmul.f32 0.015625, %v2434_v2 }
 0x8e6   :  { %v2431_v39 = vpop.xlane.xlu1 %2430 }
 0x8e7   :  { %v2446_v54 = vsub.f32 %v2426_v45, %v2442_v38  ;;  %v2441_v3 = vmul.f32 0.015625, %v2431_v39  ;;  %v4968_v45 = vld [vmem:[%s7473_s7 + $0x68] sm:$0xff] }
 0x8e9   :  { %v2445_v10 = vsub.f32 %v2425_v50, %v2441_v3  ;;  %v2450_v9 = vmul.f32 %v2446_v54, %v2446_v54  ;;  %v4966_v50 = vld [vmem:[%s7473_s7 + $0x58] sm:$0xff] }
 0x8eb   :  { %v2456_v43 = vsel %vm155_vm0, %v2450_v9, 0.0  ;;  %v2449_v25 = vmul.f32 %v2445_v10, %v2445_v10 }
 0x8ec   :  { %2457 = vadd.xlane.f32.xlu0 %v2456_v43 }
 0x8ed   :  { %v2453_v49 = vsel %vm155_vm0, %v2449_v25, 0.0  ;;  %v4958_v25 = vld [vmem:[%s7472_s6 + $0x1] ss:$0 sm:$0xff] }
 0x8ee   :  { %2454 = vadd.xlane.f32.xlu1 %v2453_v49 }
 0x93a   :  { %v2440_v62 = vpop.xlane.xlu0 %2439 }
 0x93b   :  { %v2444_v15 = vmul.f32 0.015625, %v2440_v62 }
 0x93c   :  { %v2437_v17 = vpop.xlane.xlu1 %2436 }
 0x93d   :  { %v2448_v42 = vsub.f32 %v2428_v53, %v2444_v15  ;;  %v2443_v58 = vmul.f32 0.015625, %v2437_v17 }
 0x93f   :  { %v2447_v59 = vsub.f32 %v2427_v20, %v2443_v58  ;;  %v2452_v1 = vmul.f32 %v2448_v42, %v2448_v42 }
 0x941   :  { %v2462_v40 = vsel %vm155_vm0, %v2452_v1, 0.0  ;;  %v2451_v11 = vmul.f32 %v2447_v59, %v2447_v59 }
 0x942   :  { %2463 = vadd.xlane.f32.xlu0 %v2462_v40 }
 0x943   :  { %v2459_v12 = vsel %vm155_vm0, %v2451_v11, 0.0 }
 0x944   :  { %2460 = vadd.xlane.f32.xlu1 %v2459_v12 }
 0x975   :  { %v2458_v36 = vpop.xlane.xlu0 %2457 }
 0x976   :  { %v2466_v46 = vmul.f32 0.015625, %v2458_v36 }
 0x977   :  { %v2455_v34 = vpop.xlane.xlu1 %2454 }
 0x978   :  { %v2470_v37 = vadd.f32 1e-05, %v2466_v46  ;;  %v2465_v30 = vmul.f32 0.015625, %v2455_v34  ;;  %v7005_v34 = vld [vmem:[#allocation7 + $0x8] sm:$0xff] }
 0x97a   :  { %5899 = vrsqrt.f32 %v2470_v37  ;;  %v2469_v23 = vadd.f32 1e-05, %v2465_v30 }
 0x97c   :  { %5901 = vrsqrt.f32 %v2469_v23 }
 0x987   :  { %v5900_v24 = vpop.eup %5899 }
 0x988   :  { %v2478_v41 = vmul.f32 %v5900_v24, %v2446_v54 }
 0x989   :  { %v5902_v26 = vpop.eup %5901 }
 0x98a   :  { %v2477_v18 = vmul.f32 %v5902_v26, %v2445_v10  ;;  %v2489_v60 = vmul.f32 %v4947_v21, %v2478_v41  ;;  %v7015_v41 = vld [vmem:[#allocation7] sm:$0xff] }
 0x98c   :  { %v2488_v61 = vmul.f32 %v4947_v21, %v2477_v18  ;;  %v6889_v27 = vadd.f32 %v4948_v44, %v2489_v60 }
 0x98e   :  { %v6887_v0 = vadd.f32 %v4948_v44, %v2488_v61 }
 0x990   :  { %5589 = vmatprep.mubr.msk.f32.mxu1 %vm155_vm0, %v6887_v0 }
 0x991   :  { %5590 = vmatmul.mubr.msk.f32.vlgmr.msra.gmra.mxu1 %vm155_vm0, %v6889_v27 }
 0x992   :  { %5596 = vmatpush3.msra.mxu1 %v4970_v19 }
 0x993   :  { %5597 = vmatprep.subr.mxu1 %v4969_v56 }
 0x994   :  { %5598 = vmatpush3.msra.mxu1 %v4969_v56 }
 0x995   :  { %5599 = vmatprep.subr.mxu1 %v4968_v45 }
 0x996   :  { %5600 = vmatpush3.msra.mxu1 %v4968_v45 }
 0x997   :  { %5601 = vmatprep.subr.mxu1 %v4967_v32 }
 0x998   :  { %5602 = vmatpush3.msra.mxu1 %v4967_v32 }
 0x999   :  { %5603 = vmatprep.subr.mxu1 %v4966_v50 }
 0x99a   :  { %5604 = vmatpush3.msra.mxu1 %v4966_v50 }
 0x99b   :  { %5605 = vmatprep.subr.mxu1 %v4965_v48 }
 0x99c   :  { %5606 = vmatpush3.msra.mxu1 %v4965_v48 }
 0x99d   :  { %5607 = vmatprep.subr.mxu1 %v4964_v13 }
 0x99e   :  { %5608 = vmatpush3.msra.mxu1 %v4964_v13 }
 0x99f   :  { %5609 = vmatprep.subr.mxu1 %v4963_v4 }
 0x9a0   :  { %5610 = vmatpush3.msra.mxu1 %v4963_v4 }
 0x9cb   :  { %v2464_v51 = vpop.xlane.xlu0 %2463 }
 0x9cc   :  { %v2468_v35 = vmul.f32 0.015625, %v2464_v51 }
 0x9cd   :  { %v2461_v53 = vpop.xlane.xlu1 %2460 }
 0x9ce   :  { %v2472_v5 = vadd.f32 1e-05, %v2468_v35  ;;  %v2467_v20 = vmul.f32 0.015625, %v2461_v53 }
 0x9d0   :  { %5903 = vrsqrt.f32 %v2472_v5  ;;  %v2471_v8 = vadd.f32 1e-05, %v2467_v20 }
 0x9d2   :  { %5905 = vrsqrt.f32 %v2471_v8 }
 0x9dd   :  { %v5904_v2 = vpop.eup %5903 }
 0x9de   :  { %v2480_v38 = vmul.f32 %v5904_v2, %v2448_v42 }
 0x9df   :  { %v5906_v39 = vpop.eup %5905 }
 0x9e0   :  { %v2479_v54 = vmul.f32 %v5906_v39, %v2447_v59  ;;  %v2491_v3 = vmul.f32 %v4947_v21, %v2480_v38 }
 0x9e2   :  { %v2490_v10 = vmul.f32 %v4947_v21, %v2479_v54  ;;  %v6918_v43 = vadd.f32 %v4948_v44, %v2491_v3 }
 0x9e4   :  { %v6916_v9 = vadd.f32 %v4948_v44, %v2490_v10 }
 0x9e6   :  { %5592 = vmatprep.mubr.msk.f32.mxu1 %vm155_vm0, %v6916_v9 }
 0x9e7   :  { %5593 = vmatmul.mubr.msk.f32.gmra.mxu1 %vm155_vm0, %v6918_v43 }
 0x9e8   :  { %5611 = vmatprep.mubr.msk.f32.mxu1 %vm155_vm0, %v6295_v22 }
 0x9eb   :  { %5612 = vmatmul.mubr.msk.f32.vlgmr.msra.gmra.mxu1 %vm155_vm0, %v6314_v29 }
 0x9ec   :  { %5614 = vmatprep.mubr.msk.f32.mxu1 %vm155_vm0, %v6319_v31 }
 0x9ef   :  { %5615 = vmatmul.mubr.msk.f32.gmra.mxu1 %vm155_vm0, %v6321_v33 }
 0xa51   :  { %v5591_v49 = vpop.f32.mrf.mxu1 }
 0xa52   :  { %v2604_v7 = vadd.f32 %v5591_v49, %v4958_v25 }
 0xa53   :  { %v2598_v14 = vpop.f32.mrf.mxu1 }
 0xa54   :  { %v2599_v16 = vadd.f32 %v4958_v25, %v2598_v14  ;;  %2725 = vrot.lane.b32.xlu1 %v2604_v7, %s6104_s3  ;;  %5617 = vmatprep.subr.msk.mxu0 %vm433_vm1, %v2604_v7 }
 0xa55   :  { %5618 = vmatpush3.xpose.msk.msra.mxu0 %vm433_vm1, %v2604_v7 }
 0xa56   :  { %2723 = vrot.lane.b32.xlu0 %v2599_v16, %s6104_s3  ;;  %5619 = vmatprep.subr.msk.mxu0 %vm433_vm1, %v2599_v16 }
 0xa57   :  { %5621 = vmatprep.mubr.msk.f32.mxu0 %vm433_vm1, %v2599_v16 }
 0xa58   :  { %2733 = vrot.lane.b32.xlu1 %v2604_v7, %s6103_s21 }
 0xa59   :  { %5620 = vmatpush3.xpose.msk.msra.mxu0 %vm433_vm1, %v2599_v16 }
 0xa5a   :  { %2731 = vrot.lane.b32.xlu0 %v2599_v16, %s6103_s21 }
 0xa5c   :  { %2741 = vrot.lane.b32.xlu1 %v2604_v7, %s6105_s26  ;;  %5622 = vmatmul.mubr.msk.f32.vlgmr.msra.gmra.mxu0 %vm433_vm1, %v2604_v7 }
 0xa60   :  { %2739 = vrot.lane.b32.xlu1 %v2599_v16, %s6105_s26 }
 0xaa7   :  { %v5594_v22 = vpop.f32.mrf.mxu1 }
 0xaa8   :  { %v2614_v29 = vadd.f32 %v5594_v22, %v4958_v25 }
 0xaa9   :  { %v2608_v31 = vpop.f32.mrf.mxu1 }
 0xaaa   :  { %v2609_v33 = vadd.f32 %v4958_v25, %v2608_v31  ;;  %2729 = vrot.lane.b32.xlu0 %v2614_v29, %s6104_s3 }
 0xaab   :  { %v5613_v6 = vpop.f32.mrf.mxu1 }
 0xaac   :  { %2727 = vrot.lane.b32.xlu1 %v2609_v33, %s6104_s3  ;;  %v6962_v62 = vadd.f32 %v5613_v6, %v6953_v55 }
 0xaad   :  { %v2700_v52 = vpop.f32.mrf.mxu1 }
 0xaae   :  { %2737 = vrot.lane.b32.xlu0 %v2614_v29, %s6103_s21  ;;  %v6965_v15 = vadd.f32 %v6953_v55, %v2700_v52 }
 0xaaf   :  { %v5616_v57 = vpop.f32.mrf.mxu1 }
 0xab0   :  { %2745 = vrot.lane.b32.xlu1 %v2614_v29, %s6105_s26  ;;  %v6957_v28 = vadd.f32 %v5616_v57, %v6953_v55 }
 0xab1   :  { %v7045_v50 = vpop.f32.mrf.mxu1 }
 0xab2   :  { %2735 = vrot.lane.b32.xlu0 %v2609_v33, %s6103_s21 }
 0xab4   :  { %2743 = vrot.lane.b32.xlu1 %v2609_v33, %s6105_s26 }
 0xab6   :  { %2751 = vrot.lane.b32.xlu0 %v6965_v15, %s6104_s3 }
 0xab8   :  { %2753 = vrot.lane.b32.xlu1 %v6962_v62, %s6104_s3 }
 0xaba   :  { %2763 = vrot.lane.b32.xlu0 %v6965_v15, %s6103_s21 }
 0xabc   :  { %2765 = vrot.lane.b32.xlu1 %v6962_v62, %s6103_s21 }
 0xac0   :  { %2777 = vrot.lane.b32.xlu1 %v6962_v62, %s6105_s26 }
 0xac4   :  { %2775 = vrot.lane.b32.xlu1 %v6965_v15, %s6105_s26 }
 0xac6   :  { %v2726_v17 = vpop.permute.xlu1 %2725 }
 0xac7   :  { %5624 = vmatprep.subr.msk.mxu1 %vm433_vm1, %v2726_v17 }
 0xac8   :  { %v2724_v42 = vpop.permute.xlu0 %2723  ;;  %5625 = vmatpush3.xpose.msk.msra.mxu1 %vm433_vm1, %v2726_v17 }
 0xac9   :  { %5626 = vmatprep.subr.msk.mxu1 %vm433_vm1, %v2724_v42  ;;  %5628 = vmatprep.mubr.msk.f32.mxu1 %vm433_vm1, %v2724_v42 }
 0xaca   :  { %v2734_v58 = vpop.permute.xlu1 %2733 }
 0xacb   :  { %5631 = vmatprep.subr.msk.mxu0 %vm433_vm1, %v2734_v58 }
 0xacc   :  { %v2732_v59 = vpop.permute.xlu0 %2731  ;;  %5627 = vmatpush3.xpose.msk.msra.mxu1 %vm433_vm1, %v2724_v42  ;;  %5632 = vmatpush3.xpose.msk.msra.mxu0 %vm433_vm1, %v2734_v58 }
 0xacd   :  { %5633 = vmatprep.subr.msk.mxu0 %vm433_vm1, %v2732_v59  ;;  %5635 = vmatprep.mubr.msk.f32.mxu0 %vm433_vm1, %v2732_v59 }
 0xace   :  { %v2742_v1 = vpop.permute.xlu1 %2741 }
 0xacf   :  { %5629 = vmatmul.mubr.msk.f32.vlgmr.msra.gmra.mxu1 %vm433_vm1, %v2726_v17  ;;  %5638 = vmatprep.subr.msk.mxu1 %vm433_vm1, %v2742_v1 }
 0xad0   :  { %5634 = vmatpush3.xpose.msk.msra.mxu0 %vm433_vm1, %v2732_v59  ;;  %5639 = vmatpush3.xpose.msk.msra.mxu1 %vm433_vm1, %v2742_v1 }
 0xad1   :  { %5645 = vmatprep.subr.msk.mxu0 %vm433_vm1, %v2614_v29 }
 0xad2   :  { %v2740_v40 = vpop.permute.xlu1 %2739 }
 0xad3   :  { %5636 = vmatmul.mubr.msk.f32.vlgmr.msra.gmra.mxu0 %vm433_vm1, %v2734_v58  ;;  %5640 = vmatprep.subr.msk.mxu1 %vm433_vm1, %v2740_v40 }
 0xad4   :  { %5642 = vmatprep.mubr.msk.f32.mxu1 %vm433_vm1, %v2740_v40  ;;  %5641 = vmatpush3.xpose.msk.msra.mxu1 %vm433_vm1, %v2740_v40 }
 0xad5   :  { %5646 = vmatpush3.xpose.msk.msra.mxu0 %vm433_vm1, %v2614_v29  ;;  %5649 = vmatprep.mubr.msk.f32.mxu0 %vm433_vm1, %v2609_v33 }
 0xad6   :  { %5647 = vmatprep.subr.msk.mxu0 %vm433_vm1, %v2609_v33 }
 0xad7   :  { %5643 = vmatmul.mubr.msk.f32.vlgmr.msra.gmra.mxu1 %vm433_vm1, %v2742_v1 }
 0xad9   :  { %5648 = vmatpush3.xpose.msk.msra.mxu0 %vm433_vm1, %v2609_v33 }
 0xadc   :  { %5650 = vmatmul.mubr.msk.f32.vlgmr.msra.gmra.mxu0 %vm433_vm1, %v2614_v29 }
 0xb1c   :  { %v5623_v11 = vpop.f32.mrf.mxu0  ;;  %v2730_v12 = vpop.permute.xlu0 %2729 }
 0xb1d   :  { %v3420_v19 = vmul.f32 0.25, %v5623_v11  ;;  %5652 = vmatprep.subr.msk.mxu1 %vm433_vm1, %v2730_v12 }
 0xb1e   :  { %v2857_v36 = vpop.f32.mrf.mxu0  ;;  %5653 = vmatpush3.xpose.msk.msra.mxu1 %vm433_vm1, %v2730_v12  ;;  %v2728_v46 = vpop.permute.xlu1 %2727 }
 0xb1f   :  { %v7008_v37 = vadd.f32 %v7005_v34, %v3420_v19  ;;  %v3419_v30 = vmul.f32 0.25, %v2857_v36  ;;  %5654 = vmatprep.subr.msk.mxu1 %vm433_vm1, %v2728_v46  ;;  %5656 = vmatprep.mubr.msk.f32.mxu1 %vm433_vm1, %v2728_v46 }
 0xb20   :  { %v2738_v23 = vpop.permute.xlu0 %2737 }
 0xb21   :  { %5659 = vmatprep.subr.msk.mxu0 %vm433_vm1, %v2738_v23  ;;  %v3454_v24 = vsel %vm433_vm1, %v7008_v37, -inf  ;;  %v7018_v21 = vadd.f32 %v7015_v41, %v3419_v30 }
 0xb22   :  { %3455 = vmax.xlane.f32.xlu1 %v3454_v24  ;;  %5655 = vmatpush3.xpose.msk.msra.mxu1 %vm433_vm1, %v2728_v46  ;;  %v2746_v26 = vpop.permute.xlu1 %2745 }
 0xb23   :  { %5660 = vmatpush3.xpose.msk.msra.mxu0 %vm433_vm1, %v2738_v23  ;;  %5666 = vmatprep.subr.msk.mxu1 %vm433_vm1, %v2746_v26  ;;  %v3451_v18 = vsel %vm433_vm1, %v7018_v21, -inf }
 0xb24   :  { %3452 = vmax.xlane.f32.xlu0 %v3451_v18  ;;  %v2736_v60 = vpop.permute.xlu0 %2735 }
 0xb25   :  { %5657 = vmatmul.mubr.msk.f32.vlgmr.msra.gmra.mxu1 %vm433_vm1, %v2730_v12  ;;  %5661 = vmatprep.subr.msk.mxu0 %vm433_vm1, %v2736_v60 }
 0xb26   :  { %5663 = vmatprep.mubr.msk.f32.mxu0 %vm433_vm1, %v2736_v60  ;;  %5667 = vmatpush3.xpose.msk.msra.mxu1 %vm433_vm1, %v2746_v26  ;;  %v2744_v61 = vpop.permute.xlu1 %2743 }
 0xb27   :  { %5662 = vmatpush3.xpose.msk.msra.mxu0 %vm433_vm1, %v2736_v60  ;;  %5668 = vmatprep.subr.msk.mxu1 %vm433_vm1, %v2744_v61 }
 0xb28   :  { %5670 = vmatprep.mubr.msk.f32.mxu1 %vm433_vm1, %v2744_v61  ;;  %5673 = vmatprep.subr.mxu0 %v6962_v62  ;;  %v2752_v45 = vpop.permute.xlu0 %2751 }
 0xb2a   :  { %5664 = vmatmul.mubr.msk.f32.vlgmr.msra.gmra.mxu0 %vm433_vm1, %v2738_v23  ;;  %5669 = vmatpush3.xpose.msk.msra.mxu1 %vm433_vm1, %v2744_v61  ;;  %v2754_v44 = vpop.permute.xlu1 %2753 }
 0xb2b   :  { %5674 = vmatpush3.msra.mxu0 %v6962_v62  ;;  %5680 = vmatprep.subr.mxu1 %v2754_v44 }
 0xb2c   :  { %5675 = vmatprep.subr.mxu0 %v6965_v15 }
 0xb2d   :  { %5671 = vmatmul.mubr.msk.f32.vlgmr.msra.gmra.mxu1 %vm433_vm1, %v2746_v26  ;;  %5676 = vmatpush3.msra.mxu0 %v6965_v15 }
 0xb2e   :  { %v7039_v56 = vpop.permute.xlu1 %2765  ;;  %5681 = vmatpush3.msra.mxu1 %v2754_v44 }
 0xb2f   :  { %5682 = vmatprep.subr.mxu1 %v2752_v45  ;;  %5687 = vmatprep.subr.mxu0 %v7039_v56 }
 0xb30   :  { %5683 = vmatpush3.msra.mxu1 %v2752_v45 }
 0xb32   :  { %v7042_v32 = vpop.permute.xlu1 %2777 }
 0xb33   :  { %5694 = vmatprep.subr.mxu1 %v7042_v32 }
 0xb8f   :  { %v5630_v48 = vpop.f32.mrf.mxu1 }
 0xb90   :  { %v3422_v13 = vmul.f32 0.25, %v5630_v48 }
 0xb91   :  { %v2936_v4 = vpop.f32.mrf.mxu1 }
 0xb92   :  { %v7048_v51 = vadd.f32 %v7005_v34, %v3422_v13  ;;  %v3421_v53 = vmul.f32 0.25, %v2936_v4 }
 0xb93   :  { %v5637_v35 = vpop.f32.mrf.mxu0 }
 0xb94   :  { %v3424_v5 = vmul.f32 0.25, %v5637_v35  ;;  %v3460_v20 = vsel %vm433_vm1, %v7048_v51, -inf  ;;  %v7056_v54 = vadd.f32 %v7015_v41, %v3421_v53 }
 0xb95   :  { %3461 = vmax.xlane.f32.xlu0 %v3460_v20  ;;  %v3015_v8 = vpop.f32.mrf.mxu0 }
 0xb96   :  { %v7053_v2 = vadd.f32 %v7005_v34, %v3424_v5  ;;  %v3423_v38 = vmul.f32 0.25, %v3015_v8  ;;  %v3457_v31 = vsel %vm433_vm1, %v7056_v54, -inf  ;;  %v7129_v8 = vpop.permute.xlu0 %2763 }
 0xb97   :  { %v5644_v39 = vpop.f32.mrf.mxu1 }
 0xb98   :  { %v7059_v3 = vadd.f32 %v7015_v41, %v3423_v38  ;;  %v3426_v10 = vmul.f32 0.25, %v5644_v39  ;;  %v3466_v25 = vsel %vm433_vm1, %v7053_v2, -inf }
 0xb99   :  { %3467 = vmax.xlane.f32.xlu0 %v3466_v25  ;;  %v3094_v49 = vpop.f32.mrf.mxu1 }
 0xb9a   :  { %v3425_v7 = vmul.f32 0.25, %v3094_v49  ;;  %v3463_v14 = vsel %vm433_vm1, %v7059_v3, -inf  ;;  %v7066_v16 = vadd.f32 %v7005_v34, %v3426_v10 }
 0xb9b   :  { %3464 = vmax.xlane.f32.xlu1 %v3463_v14 }
 0xb9c   :  { %v7069_v22 = vadd.f32 %v7015_v41, %v3425_v7  ;;  %v5651_v29 = vpop.f32.mrf.mxu0  ;;  %v3472_v15 = vsel %vm433_vm1, %v7066_v16, -inf }
 0xb9d   :  { %v3428_v33 = vmul.f32 0.25, %v5651_v29  ;;  %3458 = vmax.xlane.f32.xlu0 %v3457_v31 }
 0xb9e   :  { %v3173_v6 = vpop.f32.mrf.mxu0  ;;  %v3469_v52 = vsel %vm433_vm1, %v7069_v22, -inf }
 0xb9f   :  { %v3427_v57 = vmul.f32 0.25, %v3173_v6  ;;  %3470 = vmax.xlane.f32.xlu1 %v3469_v52  ;;  %v7076_v62 = vadd.f32 %v7005_v34, %v3428_v33 }
 0xba1   :  { %v7081_v17 = vadd.f32 %v7015_v41, %v3427_v57  ;;  %3473 = vmax.xlane.f32.xlu0 %v3472_v15  ;;  %v3478_v58 = vsel %vm433_vm1, %v7076_v62, -inf }
 0xba3   :  { %v3475_v42 = vsel %vm433_vm1, %v7081_v17, -inf }
 0xba4   :  { %3476 = vmax.xlane.f32.xlu1 %v3475_v42 }
 0xba5   :  { %3479 = vmax.xlane.f32.xlu0 %v3478_v58 }
 0xbad   :  { %v3453_v39 = vpop.xlane.xlu0 %3452 }
 0xbe5   :  { %v5658_v59 = vpop.f32.mrf.mxu1 }
 0xbe6   :  { %v3430_v1 = vmul.f32 0.25, %v5658_v59 }
 0xbe7   :  { %v3252_v40 = vpop.f32.mrf.mxu1 }
 0xbe8   :  { %v7088_v11 = vadd.f32 %v7005_v34, %v3430_v1  ;;  %v3429_v12 = vmul.f32 0.25, %v3252_v40 }
 0xbea   :  { %v7091_v19 = vadd.f32 %v7015_v41, %v3429_v12  ;;  %v5665_v36 = vpop.f32.mrf.mxu0  ;;  %v3484_v46 = vsel %vm433_vm1, %v7088_v11, -inf }
 0xbeb   :  { %v3432_v30 = vmul.f32 0.25, %v5665_v36  ;;  %3485 = vmax.xlane.f32.xlu0 %v3484_v46 }
 0xbec   :  { %v3331_v23 = vpop.f32.mrf.mxu0  ;;  %v3481_v24 = vsel %vm433_vm1, %v7091_v19, -inf }
 0xbed   :  { %v7098_v26 = vadd.f32 %v7005_v34, %v3432_v30  ;;  %v3431_v18 = vmul.f32 0.25, %v3331_v23  ;;  %3482 = vmax.xlane.f32.xlu1 %v3481_v24  ;;  %v5672_v60 = vpop.f32.mrf.mxu1 }
 0xbee   :  { %v3434_v61 = vmul.f32 0.25, %v5672_v60 }
 0xbef   :  { %v7101_v44 = vadd.f32 %v7015_v41, %v3431_v18  ;;  %v3490_v45 = vsel %vm433_vm1, %v7098_v26, -inf  ;;  %v3410_v48 = vpop.f32.mrf.mxu1 }
 0xbf0   :  { %v7106_v13 = vadd.f32 %v7005_v34, %v3434_v61  ;;  %3491 = vmax.xlane.f32.xlu0 %v3490_v45  ;;  %v3433_v4 = vmul.f32 0.25, %v3410_v48  ;;  %v7119_v34 = vadd.f32 %v6953_v55, %v7045_v50  ;;  %v3499_v50 = vsub.f32 %v7018_v21, %v3453_v39 }
 0xbf1   :  { %v3487_v35 = vsel %vm433_vm1, %v7101_v44, -inf }
 0xbf2   :  { %v7111_v53 = vadd.f32 %v7015_v41, %v3433_v4  ;;  %3488 = vmax.xlane.f32.xlu1 %v3487_v35  ;;  %v3496_v5 = vsel %vm433_vm1, %v7106_v13, -inf  ;;  %v7125_v41 = vpop.permute.xlu1 %2775  ;;  %v3515_v25 = vmul.f32 1.442695, %v3499_v50 }
 0xbf4   :  { %3497 = vmax.xlane.f32.xlu0 %v3496_v5  ;;  %v3493_v20 = vsel %vm433_vm1, %v7111_v53, -inf }
 0xbf6   :  { %3494 = vmax.xlane.f32.xlu1 %v3493_v20  ;;  %v3456_v38 = vpop.xlane.xlu1 %3455 }
 0xbf7   :  { %v3500_v55 = vsub.f32 %v7008_v37, %v3456_v38 }
 0xbf9   :  { %v3517_v10 = vmul.f32 1.442695, %v3500_v55 }
 0xbfb   :  { %5907 = vpow2.f32 %v3517_v10 }
 0xbfc   :  { %5909 = vpow2.f32 %v3515_v25 }
 0xc07   :  { %2755 = vrot.lane.b32.xlu1 %v7119_v34, %s6104_s3 }
 0xc08   :  { %v7139_v15 = vpop.eup %5907 }
 0xc09   :  { %v7142_v1 = vpop.eup %5909 }
 0xc0a   :  { %2757 = vrot.lane.b32.xlu0 %v6957_v28, %s6104_s3 }
 0xc0b   :  { %2781 = vrot.lane.b32.xlu1 %v6957_v28, %s6105_s26 }
 0xc0e   :  { %2769 = vrot.lane.b32.xlu0 %v6957_v28, %s6103_s21 }
 0xc1e   :  { %v3462_v49 = vpop.xlane.xlu0 %3461 }
 0xc1f   :  { %v3502_v7 = vsub.f32 %v7048_v51, %v3462_v49 }
 0xc21   :  { %v3521_v14 = vmul.f32 1.442695, %v3502_v7 }
 0xc22   :  { %v3468_v29 = vpop.xlane.xlu0 %3467 }
 0xc23   :  { %5911 = vpow2.f32 %v3521_v14  ;;  %v3504_v31 = vsub.f32 %v7053_v2, %v3468_v29 }
 0xc24   :  { %v3465_v33 = vpop.xlane.xlu1 %3464 }
 0xc25   :  { %v3525_v6 = vmul.f32 1.442695, %v3504_v31  ;;  %v3503_v52 = vsub.f32 %v7059_v3, %v3465_v33  ;;  %v3550_v3 = vsel %vm433_vm1, %v7139_v15, 0.0 }
 0xc26   :  { %v3459_v57 = vpop.xlane.xlu0 %3458 }
 0xc27   :  { %5913 = vpow2.f32 %v3525_v6  ;;  %v3501_v37 = vsub.f32 %v7056_v54, %v3459_v57  ;;  %v3523_v42 = vmul.f32 1.442695, %v3503_v52 }
 0xc28   :  { %v3471_v21 = vpop.xlane.xlu1 %3470 }
 0xc29   :  { %v3519_v58 = vmul.f32 1.442695, %v3501_v37  ;;  %v3505_v51 = vsub.f32 %v7069_v22, %v3471_v21  ;;  %v3547_v22 = vsel %vm433_vm1, %v7142_v1, 0.0 }
 0xc2a   :  { %v3474_v59 = vpop.xlane.xlu0 %3473 }
 0xc2b   :  { %5915 = vpow2.f32 %v3519_v58  ;;  %v3506_v2 = vsub.f32 %v7066_v16, %v3474_v59  ;;  %v3527_v40 = vmul.f32 1.442695, %v3505_v51 }
 0xc2c   :  { %5917 = vpow2.f32 %v3523_v42 }
 0xc2d   :  { %v3529_v12 = vmul.f32 1.442695, %v3506_v2  ;;  %3551 = vadd.xlane.f32.xlu0 %v3550_v3  ;;  %v3477_v54 = vpop.xlane.xlu1 %3476 }
 0xc2e   :  { %v3507_v36 = vsub.f32 %v7081_v17, %v3477_v54  ;;  %v3480_v46 = vpop.xlane.xlu0 %3479 }
 0xc2f   :  { %5919 = vpow2.f32 %v3529_v12  ;;  %v3508_v30 = vsub.f32 %v7076_v62, %v3480_v46  ;;  %3548 = vadd.xlane.f32.xlu1 %v3547_v22 }
 0xc30   :  { %v7151_v23 = vpop.eup %5911  ;;  %5921 = vpow2.f32 %v3527_v40  ;;  %v3531_v16 = vmul.f32 1.442695, %v3507_v36 }
 0xc31   :  { %v3533_v24 = vmul.f32 1.442695, %v3508_v30  ;;  %v3556_v18 = vsel %vm433_vm1, %v7151_v23, 0.0 }
 0xc32   :  { %3557 = vadd.xlane.f32.xlu0 %v3556_v18 }
 0xc33   :  { %5923 = vpow2.f32 %v3533_v24 }
 0xc34   :  { %v7155_v60 = vpop.eup %5913  ;;  %5925 = vpow2.f32 %v3531_v16 }
 0xc35   :  { %v3562_v17 = vsel %vm433_vm1, %v7155_v60, 0.0 }
 0xc36   :  { %3563 = vadd.xlane.f32.xlu0 %v3562_v17 }
 0xc38   :  { %v7159_v61 = vpop.eup %5915 }
 0xc39   :  { %v3553_v62 = vsel %vm433_vm1, %v7159_v61, 0.0  ;;  %v7163_v45 = vpop.eup %5917 }
 0xc3a   :  { %3554 = vadd.xlane.f32.xlu1 %v3553_v62  ;;  %v3559_v35 = vsel %vm433_vm1, %v7163_v45, 0.0 }
 0xc3c   :  { %v7165_v48 = vpop.eup %5919 }
 0xc3d   :  { %v3568_v4 = vsel %vm433_vm1, %v7165_v48, 0.0  ;;  %v7171_v5 = vpop.eup %5921 }
 0xc3e   :  { %3569 = vadd.xlane.f32.xlu0 %v3568_v4  ;;  %3560 = vadd.xlane.f32.xlu1 %v3559_v35  ;;  %v3565_v39 = vsel %vm433_vm1, %v7171_v5, 0.0 }
 0xc40   :  { %v7173_v20 = vpop.eup %5923 }
 0xc41   :  { %v3574_v38 = vsel %vm433_vm1, %v7173_v20, 0.0  ;;  %v7179_v55 = vpop.eup %5925 }
 0xc42   :  { %3575 = vadd.xlane.f32.xlu0 %v3574_v38  ;;  %3566 = vadd.xlane.f32.xlu1 %v3565_v39  ;;  %v3571_v50 = vsel %vm433_vm1, %v7179_v55, 0.0 }
 0xc46   :  { %3572 = vadd.xlane.f32.xlu1 %v3571_v50 }
 0xc74   :  { %v3486_v10 = vpop.xlane.xlu0 %3485 }
 0xc75   :  { %v3510_v25 = vsub.f32 %v7088_v11, %v3486_v10 }
 0xc76   :  { %v3483_v49 = vpop.xlane.xlu1 %3482 }
 0xc77   :  { %v3537_v7 = vmul.f32 1.442695, %v3510_v25  ;;  %v3509_v14 = vsub.f32 %v7091_v19, %v3483_v49 }
 0xc79   :  { %5927 = vpow2.f32 %v3537_v7  ;;  %v3535_v29 = vmul.f32 1.442695, %v3509_v14  ;;  %v3492_v31 = vpop.xlane.xlu0 %3491 }
 0xc7a   :  { %v3512_v33 = vsub.f32 %v7098_v26, %v3492_v31 }
 0xc7b   :  { %5929 = vpow2.f32 %v3535_v29  ;;  %v3489_v6 = vpop.xlane.xlu1 %3488 }
 0xc7c   :  { %v3541_v52 = vmul.f32 1.442695, %v3512_v33  ;;  %v3511_v57 = vsub.f32 %v7101_v44, %v3489_v6 }
 0xc7d   :  { %v3498_v37 = vpop.xlane.xlu0 %3497 }
 0xc7e   :  { %5931 = vpow2.f32 %v3541_v52  ;;  %v3539_v21 = vmul.f32 1.442695, %v3511_v57  ;;  %v3514_v42 = vsub.f32 %v7106_v13, %v3498_v37 }
 0xc7f   :  { %v3495_v11 = vpop.xlane.xlu1 %3494 }
 0xc80   :  { %5933 = vpow2.f32 %v3539_v21  ;;  %v3545_v58 = vmul.f32 1.442695, %v3514_v42  ;;  %v3513_v19 = vsub.f32 %v7111_v53, %v3495_v11 }
 0xc81   :  { %v7217_v22 = vpop.permute.xlu0 %2757 }
 0xc82   :  { %5935 = vpow2.f32 %v3545_v58  ;;  %v3543_v51 = vmul.f32 1.442695, %v3513_v19 }
 0xc83   :  { %v7219_v30 = vpop.permute.xlu1 %2755 }
 0xc84   :  { %5937 = vpow2.f32 %v3543_v51 }
 0xc85   :  { %v7221_v16 = vpop.permute.xlu0 %2769 }
 0xc86   :  { %v7189_v59 = vpop.eup %5927 }
 0xc87   :  { %v3580_v26 = vsel %vm433_vm1, %v7189_v59, 0.0  ;;  %v7223_v24 = vpop.permute.xlu1 %2781 }
 0xc88   :  { %v7193_v2 = vpop.eup %5929  ;;  %3581 = vadd.xlane.f32.xlu0 %v3580_v26 }
 0xc89   :  { %v3577_v44 = vsel %vm433_vm1, %v7193_v2, 0.0 }
 0xc8a   :  { %3578 = vadd.xlane.f32.xlu1 %v3577_v44 }
 0xc8b   :  { %v7197_v13 = vpop.eup %5931 }
 0xc8c   :  { %v3586_v53 = vsel %vm433_vm1, %v7197_v13, 0.0 }
 0xc8d   :  { %v7201_v3 = vpop.eup %5933  ;;  %3587 = vadd.xlane.f32.xlu0 %v3586_v53 }
 0xc8e   :  { %v3583_v40 = vsel %vm433_vm1, %v7201_v3, 0.0 }
 0xc8f   :  { %v7205_v12 = vpop.eup %5935  ;;  %3584 = vadd.xlane.f32.xlu1 %v3583_v40 }
 0xc90   :  { %v3592_v54 = vsel %vm433_vm1, %v7205_v12, 0.0 }
 0xc91   :  { %v7209_v36 = vpop.eup %5937  ;;  %3593 = vadd.xlane.f32.xlu0 %v3592_v54 }
 0xc92   :  { %v3589_v46 = vsel %vm433_vm1, %v7209_v36, 0.0 }
 0xc93   :  { %3590 = vadd.xlane.f32.xlu1 %v3589_v46 }
 0xca4   :  { %2779 = vrot.lane.b32.xlu1 %v7119_v34, %s6105_s26 }
 0xca7   :  { %2767 = vrot.lane.b32.xlu0 %v7119_v34, %s6103_s21 }
 0xcb6   :  { %v3552_v18 = vpop.xlane.xlu0 %3551 }
 0xcb7   :  { %5939 = vrcp.f32 %v3552_v18 }
 0xcb8   :  { %v3549_v17 = vpop.xlane.xlu1 %3548 }
 0xcb9   :  { %5941 = vrcp.f32 %v3549_v17 }
 0xcbb   :  { %v3558_v62 = vpop.xlane.xlu0 %3557 }
 0xcbc   :  { %5943 = vrcp.f32 %v3558_v62 }
 0xcbf   :  { %v3564_v4 = vpop.xlane.xlu0 %3563 }
 0xcc3   :  { %v3555_v35 = vpop.xlane.xlu1 %3554 }
 0xcc4   :  { %v5940_v38 = vpop.eup %5939  ;;  %5945 = vrcp.f32 %v3555_v35 }
 0xcc5   :  { %5947 = vrcp.f32 %v3564_v4  ;;  %v3612_v50 = vmul.f32 %v5940_v38, %v7139_v15 }
 0xcc6   :  { %v5942_v39 = vpop.eup %5941 }
 0xcc7   :  { %v3570_v10 = vpop.xlane.xlu0 %3569  ;;  %v3561_v25 = vpop.xlane.xlu1 %3560  ;;  %v3611_v49 = vmul.f32 %v5942_v39, %v7142_v1  ;;  %v3628_v14 = vmul.f32 %v3612_v50, %v6623_v47 }
 0xcc8   :  { %5949 = vrcp.f32 %v3561_v25 }
 0xcc9   :  { %v3627_v7 = vmul.f32 %v3611_v49, %v6500_v63  ;;  %5951 = vrcp.f32 %v3570_v10  ;;  %v5944_v15 = vpop.eup %5943 }
 0xcca   :  { %v3614_v6 = vmul.f32 %v5944_v15, %v7151_v23 }
 0xccb   :  { %5677 = vmatprep.mubr.msk.f32.mxu0 %vm433_vm1, %v3627_v7  ;;  %v3576_v29 = vpop.xlane.xlu0 %3575  ;;  %v3567_v31 = vpop.xlane.xlu1 %3566  ;;  %v5027_v7 = vld [vmem:[%s7475_s9 + $0x50] sm:$0xff] }
 0xccc   :  { %5953 = vrcp.f32 %v3576_v29  ;;  %5678 = vmatmul.mubr.msk.f32.vlgmr.msra.gmra.mxu0 %vm433_vm1, %v3628_v14  ;;  %v5026_v14 = vld [vmem:[%s7475_s9 + $0x48] sm:$0xff] }
 0xccd   :  { %5688 = vmatpush3.msra.mxu0 %v7039_v56  ;;  %5955 = vrcp.f32 %v3567_v31  ;;  %v3630_v56 = vmul.f32 %v3614_v6, %v6623_v47  ;;  %v5025_v31 = vld [vmem:[%s7475_s9 + $0x40] sm:$0xff] }
 0xcce   :  { %5689 = vmatprep.subr.mxu0 %v7129_v8 }
 0xccf   :  { %5690 = vmatpush3.msra.mxu0 %v7129_v8  ;;  %v3573_v1 = vpop.xlane.xlu1 %3572 }
 0xcd0   :  { %5701 = vmatprep.subr.mxu0 %v6957_v28  ;;  %5957 = vrcp.f32 %v3573_v1 }
 0xcd1   :  { %v5946_v33 = vpop.eup %5945 }
 0xcd2   :  { %v3613_v52 = vmul.f32 %v5946_v33, %v7159_v61  ;;  %v5948_v57 = vpop.eup %5947 }
 0xcd3   :  { %v3616_v42 = vmul.f32 %v5948_v57, %v7155_v60 }
 0xcd4   :  { %v3629_v37 = vmul.f32 %v3613_v52, %v6500_v63 }
 0xcd5   :  { %v5950_v21 = vpop.eup %5949  ;;  %v3632_v19 = vmul.f32 %v3616_v42, %v6623_v47 }
 0xcd6   :  { %5684 = vmatprep.mubr.msk.f32.mxu1 %vm433_vm1, %v3629_v37  ;;  %v5952_v8 = vpop.eup %5951  ;;  %v3615_v11 = vmul.f32 %v5950_v21, %v7163_v45 }
 0xcd7   :  { %5685 = vmatmul.mubr.msk.f32.vlgmr.msra.gmra.mxu1 %vm433_vm1, %v3630_v56  ;;  %v3618_v51 = vmul.f32 %v5952_v8, %v7165_v48 }
 0xcd8   :  { %5695 = vmatpush3.msra.mxu1 %v7042_v32  ;;  %v3631_v61 = vmul.f32 %v3615_v11, %v6500_v63 }
 0xcd9   :  { %v5954_v23 = vpop.eup %5953  ;;  %5696 = vmatprep.subr.mxu1 %v7125_v41 }
 0xcda   :  { %v5956_v58 = vpop.eup %5955  ;;  %5697 = vmatpush3.msra.mxu1 %v7125_v41  ;;  %5691 = vmatprep.mubr.msk.f32.mxu0 %vm433_vm1, %v3631_v61  ;;  %v3620_v26 = vmul.f32 %v5954_v23, %v7173_v20  ;;  %v3634_v41 = vmul.f32 %v3618_v51, %v6623_v47 }
 0xcdb   :  { %5708 = vmatprep.subr.mxu1 %v7217_v22  ;;  %v3617_v60 = vmul.f32 %v5956_v58, %v7171_v5  ;;  %5692 = vmatmul.mubr.msk.f32.vlgmr.msra.gmra.mxu0 %vm433_vm1, %v3632_v19 }
 0xcdc   :  { %5702 = vmatpush3.msra.mxu0 %v6957_v28  ;;  %v3636_v5 = vmul.f32 %v3620_v26, %v6623_v47 }
 0xcdd   :  { %v5958_v32 = vpop.eup %5957  ;;  %v3633_v45 = vmul.f32 %v3617_v60, %v6500_v63  ;;  %5703 = vmatprep.subr.mxu0 %v7119_v34 }
 0xcde   :  { %v3619_v48 = vmul.f32 %v5958_v32, %v7179_v55  ;;  %5704 = vmatpush3.msra.mxu0 %v7119_v34 }
 0xcdf   :  { %5698 = vmatprep.mubr.msk.f32.mxu1 %vm433_vm1, %v3633_v45  ;;  %5715 = vmatprep.subr.mxu0 %v7221_v16 }
 0xce0   :  { %5699 = vmatmul.mubr.msk.f32.vlgmr.msra.gmra.mxu1 %vm433_vm1, %v3634_v41  ;;  %v3635_v28 = vmul.f32 %v3619_v48, %v6500_v63 }
 0xce1   :  { %5709 = vmatpush3.msra.mxu1 %v7217_v22 }
 0xce2   :  { %5710 = vmatprep.subr.mxu1 %v7219_v30  ;;  %5705 = vmatprep.mubr.msk.f32.mxu0 %vm433_vm1, %v3635_v28 }
 0xce3   :  { %5711 = vmatpush3.msra.mxu1 %v7219_v30  ;;  %5706 = vmatmul.mubr.msk.f32.vlgmr.msra.gmra.mxu0 %vm433_vm1, %v3636_v5 }
 0xce4   :  { %5722 = vmatprep.subr.mxu1 %v7223_v24  ;;  %5716 = vmatpush3.msra.mxu0 %v7221_v16 }
 0xd11   :  { %v3582_v34 = vpop.xlane.xlu0 %3581 }
 0xd12   :  { %5959 = vrcp.f32 %v3582_v34 }
 0xd13   :  { %v3579_v20 = vpop.xlane.xlu1 %3578 }
 0xd14   :  { %5961 = vrcp.f32 %v3579_v20 }
 0xd16   :  { %v3588_v55 = vpop.xlane.xlu0 %3587 }
 0xd17   :  { %5963 = vrcp.f32 %v3588_v55 }
 0xd18   :  { %v3585_v44 = vpop.xlane.xlu1 %3584 }
 0xd19   :  { %5965 = vrcp.f32 %v3585_v44 }
 0xd1a   :  { %v3594_v53 = vpop.xlane.xlu0 %3593 }
 0xd1b   :  { %5967 = vrcp.f32 %v3594_v53 }
 0xd1c   :  { %v3591_v40 = vpop.xlane.xlu1 %3590 }
 0xd1d   :  { %5969 = vrcp.f32 %v3591_v40 }
 0xd1e   :  { %v2768_v54 = vpop.permute.xlu0 %2767 }
 0xd1f   :  { %v5960_v46 = vpop.eup %5959  ;;  %5717 = vmatprep.subr.mxu0 %v2768_v54 }
 0xd20   :  { %5718 = vmatpush3.msra.mxu0 %v2768_v54  ;;  %v3622_v30 = vmul.f32 %v5960_v46, %v7189_v59  ;;  %v2780_v50 = vpop.permute.xlu1 %2779 }
 0xd21   :  { %v5962_v22 = vpop.eup %5961 }
 0xd22   :  { %v3621_v16 = vmul.f32 %v5962_v22, %v7193_v2  ;;  %v3638_v62 = vmul.f32 %v3622_v30, %v6623_v47 }
 0xd24   :  { %v5964_v18 = vpop.eup %5963  ;;  %v3637_v17 = vmul.f32 %v3621_v16, %v6500_v63 }
 0xd25   :  { %v3624_v35 = vmul.f32 %v5964_v18, %v7197_v13 }
 0xd26   :  { %v5966_v4 = vpop.eup %5965  ;;  %5712 = vmatprep.mubr.msk.f32.mxu1 %vm433_vm1, %v3637_v17 }
 0xd27   :  { %5713 = vmatmul.mubr.msk.f32.vlgmr.msra.gmra.mxu1 %vm433_vm1, %v3638_v62  ;;  %v3623_v38 = vmul.f32 %v5966_v4, %v7201_v3  ;;  %v3640_v10 = vmul.f32 %v3624_v35, %v6623_v47  ;;  %v5034_v4 = vld [vmem:[%s7476_s10 + $0x1] ss:$0 sm:$0xff] }
 0xd28   :  { %v5968_v39 = vpop.eup %5967  ;;  %5723 = vmatpush3.msra.mxu1 %v7223_v24  ;;  %v5032_v24 = vld [vmem:[%s7475_s9 + $0x78] sm:$0xff] }
 0xd29   :  { %5724 = vmatprep.subr.mxu1 %v2780_v50  ;;  %v3639_v59 = vmul.f32 %v3623_v38, %v6500_v63  ;;  %v3626_v25 = vmul.f32 %v5968_v39, %v7205_v12  ;;  %v5031_v12 = vld [vmem:[%s7475_s9 + $0x70] sm:$0xff]  ;;  %5729 = vmatprep.subr.mxu0 %v5032_v24 }
 0xd2a   :  { %v5970_v2 = vpop.eup %5969  ;;  %5725 = vmatpush3.msra.mxu1 %v2780_v50 }
 0xd2b   :  { %5719 = vmatprep.mubr.msk.f32.mxu0 %vm433_vm1, %v3639_v59  ;;  %v3625_v13 = vmul.f32 %v5970_v2, %v7209_v36  ;;  %v3642_v49 = vmul.f32 %v3626_v25, %v6623_v47  ;;  %v5029_v47 = vld [vmem:[%s7475_s9 + $0x60] sm:$0xff]  ;;  %v5028_v36 = vld [vmem:[%s7475_s9 + $0x58] sm:$0xff] }
 0xd2c   :  { %5720 = vmatmul.mubr.msk.f32.vlgmr.msra.gmra.mxu0 %vm433_vm1, %v3640_v10 }
 0xd2d   :  { %v3641_v3 = vmul.f32 %v3625_v13, %v6500_v63  ;;  %5730 = vmatpush3.msra.mxu0 %v5032_v24  ;;  %v5030_v63 = vld [vmem:[%s7475_s9 + $0x68] sm:$0xff] }
 0xd2e   :  { %5731 = vmatprep.subr.mxu0 %v5031_v12 }
 0xd2f   :  { %5726 = vmatprep.mubr.msk.f32.mxu1 %vm433_vm1, %v3641_v3  ;;  %5732 = vmatpush3.msra.mxu0 %v5031_v12 }
 0xd30   :  { %5727 = vmatmul.mubr.msk.f32.vlgmr.msra.gmra.mxu1 %vm433_vm1, %v3642_v49  ;;  %5733 = vmatprep.subr.mxu0 %v5030_v63 }
 0xd31   :  { %5734 = vmatpush3.msra.mxu0 %v5030_v63 }
 0xd32   :  { %5735 = vmatprep.subr.mxu0 %v5029_v47 }
 0xd33   :  { %5736 = vmatpush3.msra.mxu0 %v5029_v47 }
 0xd34   :  { %5737 = vmatprep.subr.mxu0 %v5028_v36 }
 0xd35   :  { %5738 = vmatpush3.msra.mxu0 %v5028_v36 }
 0xd36   :  { %5739 = vmatprep.subr.mxu0 %v5027_v7 }
 0xd37   :  { %5740 = vmatpush3.msra.mxu0 %v5027_v7 }
 0xd38   :  { %5741 = vmatprep.subr.mxu0 %v5026_v14 }
 0xd39   :  { %5742 = vmatpush3.msra.mxu0 %v5026_v14 }
 0xd3a   :  { %5743 = vmatprep.subr.mxu0 %v5025_v31 }
 0xd3b   :  { %5744 = vmatpush3.msra.mxu0 %v5025_v31 }
 0xd8c   :  { %v5679_v29 = vpop.f32.mrf.mxu0 }
 0xd8e   :  { %v3715_v33 = vpop.f32.mrf.mxu0 }
 0xd97   :  { %v5686_v15 = vpop.f32.mrf.mxu1 }
 0xd98   :  { %4297 = vrot.lane.b32.xlu1 %v5686_v15, %s6107_s24 }
 0xd99   :  { %v3796_v1 = vpop.f32.mrf.mxu1 }
 0xd9a   :  { %4295 = vrot.lane.b32.xlu0 %v3796_v1, %s6107_s24 }
 0xd9b   :  { %v5693_v6 = vpop.f32.mrf.mxu0 }
 0xd9c   :  { %4313 = vrot.lane.b32.xlu1 %v5693_v6, %s6108_s25  ;;  %v4552_v6 = vld [vmem:[#allocation8 + $0x70] sm:$0xff] }
 0xd9d   :  { %v3877_v52 = vpop.f32.mrf.mxu0 }
 0xd9e   :  { %4311 = vrot.lane.b32.xlu0 %v3877_v52, %s6108_s25  ;;  %v4551_v52 = vld [vmem:[#allocation8 + $0x68] sm:$0xff] }
 0xda0   :  { %v5700_v57 = vpop.f32.mrf.mxu1 }
 0xda1   :  { %4329 = vrot.lane.b32.xlu1 %v5700_v57, %s6109_s27  ;;  %v4550_v57 = vld [vmem:[#allocation8 + $0x60] sm:$0xff] }
 0xda2   :  { %v3958_v37 = vpop.f32.mrf.mxu1 }
 0xda3   :  { %4327 = vrot.lane.b32.xlu0 %v3958_v37, %s6109_s27  ;;  %v5707_v56 = vpop.f32.mrf.mxu0  ;;  %v4549_v37 = vld [vmem:[#allocation8 + $0x58] sm:$0xff] }
 0xda5   :  { %v4039_v8 = vpop.f32.mrf.mxu0 }
 0xde7   :  { %v5714_v21 = vpop.f32.mrf.mxu1 }
 0xde8   :  { %4301 = vrot.lane.b32.xlu1 %v5714_v21, %s6107_s24  ;;  %v4547_v21 = vld [vmem:[#allocation8 + $0x48] sm:$0xff] }
 0xde9   :  { %v4120_v42 = vpop.f32.mrf.mxu1 }
 0xdea   :  { %4299 = vrot.lane.b32.xlu0 %v4120_v42, %s6107_s24  ;;  %v4546_v42 = vld [vmem:[#allocation8 + $0x40] sm:$0xff] }
 0xdec   :  { %v5721_v11 = vpop.f32.mrf.mxu0 }
 0xded   :  { %4317 = vrot.lane.b32.xlu1 %v5721_v11, %s6108_s25 }
 0xdee   :  { %v4201_v23 = vpop.f32.mrf.mxu0 }
 0xdef   :  { %4315 = vrot.lane.b32.xlu0 %v4201_v23, %s6108_s25 }
 0xdf0   :  { %v5728_v61 = vpop.f32.mrf.mxu1 }
 0xdf1   :  { %4333 = vrot.lane.b32.xlu1 %v5728_v61, %s6109_s27 }
 0xdf2   :  { %v4282_v58 = vpop.f32.mrf.mxu1 }
 0xdf3   :  { %4331 = vrot.lane.b32.xlu0 %v4282_v58, %s6109_s27 }
 0xe0a   :  { %v4298_v19 = vpop.permute.xlu1 %4297 }
 0xe0b   :  { %v4340_v41 = vsel %vm433_vm1, %v5679_v29, %v4298_v19 }
 0xe0c   :  { %v4296_v51 = vpop.permute.xlu0 %4295 }
 0xe0d   :  { %v4339_v45 = vsel %vm433_vm1, %v3715_v33, %v4296_v51  ;;  %v4553_v33 = vld [vmem:[#allocation8 + $0x78] sm:$0xff] }
 0xe0e   :  { %v4314_v60 = vpop.permute.xlu1 %4313  ;;  %5751 = vmatprep.subr.mxu1 %v4553_v33 }
 0xe0f   :  { %v4344_v5 = vsel %vm2000_vm2, %v4340_v41, %v4314_v60  ;;  %5752 = vmatpush3.msra.mxu1 %v4553_v33  ;;  %v5063_v41 = vld [vmem:[%s7481_s15 + $0xf0] sm:$0xff]  ;;  %v5044_v33 = vld [vmem:[%s7480_s14 + $0x1] ss:$0 sm:$0xff] }
 0xe10   :  { %v4312_v32 = vpop.permute.xlu0 %4311  ;;  %5753 = vmatprep.subr.mxu1 %v4552_v6 }
 0xe11   :  { %v4343_v48 = vsel %vm2000_vm2, %v4339_v45, %v4312_v32  ;;  %5754 = vmatpush3.msra.mxu1 %v4552_v6 }
 0xe12   :  { %5755 = vmatprep.subr.mxu1 %v4551_v52 }
 0xe13   :  { %v4330_v26 = vpop.permute.xlu1 %4329  ;;  %5756 = vmatpush3.msra.mxu1 %v4551_v52 }
 0xe14   :  { %v4348_v20 = vsel %vm2005_vm3, %v4344_v5, %v4330_v26  ;;  %5757 = vmatprep.subr.mxu1 %v4550_v57  ;;  %v5064_v26 = vld [vmem:[%s7481_s15 + $0xf8] sm:$0xff] }
 0xe15   :  { %v4328_v28 = vpop.permute.xlu0 %4327  ;;  %5758 = vmatpush3.msra.mxu1 %v4550_v57  ;;  %5773 = vmatprep.subr.mxu0 %v5064_v26  ;;  %v5060_v5 = vld [vmem:[%s7481_s15 + $0xd8] sm:$0xff] }
 0xe16   :  { %v4347_v34 = vsel %vm2005_vm3, %v4343_v48, %v4328_v28  ;;  %5759 = vmatprep.subr.mxu1 %v4549_v37  ;;  %v5062_v48 = vld [vmem:[%s7481_s15 + $0xe8] sm:$0xff]  ;;  %v5061_v28 = vld [vmem:[%s7481_s15 + $0xe0] sm:$0xff] }
 0xe17   :  { %5745 = vmatprep.mubr.msk.f32.mxu0 %vm155_vm0, %v4347_v34  ;;  %5760 = vmatpush3.msra.mxu1 %v4549_v37  ;;  %v5059_v34 = vld [vmem:[%s7481_s15 + $0xd0] sm:$0xff] }
 0xe18   :  { %5746 = vmatmul.mubr.msk.f32.vlgmr.msra.gmra.mxu0 %vm155_vm0, %v4348_v20  ;;  %v5058_v20 = vld [vmem:[%s7481_s15 + $0xc8] sm:$0xff] }
 0xe19   :  { %5774 = vmatpush3.msra.mxu0 %v5064_v26 }
 0xe1a   :  { %5775 = vmatprep.subr.mxu0 %v5063_v41 }
 0xe1b   :  { %5776 = vmatpush3.msra.mxu0 %v5063_v41 }
 0xe1c   :  { %5777 = vmatprep.subr.mxu0 %v5062_v48 }
 0xe1d   :  { %5778 = vmatpush3.msra.mxu0 %v5062_v48 }
 0xe1e   :  { %5779 = vmatprep.subr.mxu0 %v5061_v28 }
 0xe1f   :  { %5780 = vmatpush3.msra.mxu0 %v5061_v28 }
 0xe20   :  { %5781 = vmatprep.subr.mxu0 %v5060_v5 }
 0xe21   :  { %5782 = vmatpush3.msra.mxu0 %v5060_v5 }
 0xe22   :  { %5783 = vmatprep.subr.mxu0 %v5059_v34 }
 0xe23   :  { %5784 = vmatpush3.msra.mxu0 %v5059_v34 }
 0xe24   :  { %5785 = vmatprep.subr.mxu0 %v5058_v20 }
 0xe25   :  { %5786 = vmatpush3.msra.mxu0 %v5058_v20 }
 0xe5a   :  { %v4302_v55 = vpop.permute.xlu1 %4301 }
 0xe5b   :  { %v4342_v22 = vsel %vm433_vm1, %v5707_v56, %v4302_v55  ;;  %v4548_v56 = vld [vmem:[#allocation8 + $0x50] sm:$0xff] }
 0xe5c   :  { %v4300_v44 = vpop.permute.xlu0 %4299  ;;  %5761 = vmatprep.subr.mxu1 %v4548_v56  ;;  %v5057_v55 = vld [vmem:[%s7481_s15 + $0xc0] sm:$0xff] }
 0xe5d   :  { %v4341_v54 = vsel %vm433_vm1, %v4039_v8, %v4300_v44  ;;  %5762 = vmatpush3.msra.mxu1 %v4548_v56  ;;  %v5056_v44 = vld [vmem:[%s7481_s15 + $0xb8] sm:$0xff]  ;;  %5787 = vmatprep.subr.mxu0 %v5057_v55 }
 0xe5e   :  { %5763 = vmatprep.subr.mxu1 %v4547_v21  ;;  %5788 = vmatpush3.msra.mxu0 %v5057_v55 }
 0xe5f   :  { %v4318_v53 = vpop.permute.xlu1 %4317  ;;  %5764 = vmatpush3.msra.mxu1 %v4547_v21  ;;  %5789 = vmatprep.subr.mxu0 %v5056_v44 }
 0xe60   :  { %v4346_v18 = vsel %vm2000_vm2, %v4342_v22, %v4318_v53  ;;  %5765 = vmatprep.subr.mxu1 %v4546_v42  ;;  %v5055_v53 = vld [vmem:[%s7481_s15 + $0xb0] sm:$0xff]  ;;  %5790 = vmatpush3.msra.mxu0 %v5056_v44 }
 0xe61   :  { %v4316_v40 = vpop.permute.xlu0 %4315  ;;  %5766 = vmatpush3.msra.mxu1 %v4546_v42  ;;  %5791 = vmatprep.subr.mxu0 %v5055_v53 }
 0xe62   :  { %v4345_v30 = vsel %vm2000_vm2, %v4341_v54, %v4316_v40  ;;  %5792 = vmatpush3.msra.mxu0 %v5055_v53 }
 0xe63   :  { %v4334_v46 = vpop.permute.xlu1 %4333 }
 0xe64   :  { %v4350_v62 = vsel %vm2005_vm3, %v4346_v18, %v4334_v46  ;;  %v5054_v46 = vld [vmem:[%s7481_s15 + $0xa8] sm:$0xff]  ;;  %v5053_v18 = vld [vmem:[%s7481_s15 + $0xa0] sm:$0xff] }
 0xe65   :  { %v4332_v16 = vpop.permute.xlu0 %4331  ;;  %5793 = vmatprep.subr.mxu0 %v5054_v46 }
 0xe66   :  { %v4349_v17 = vsel %vm2005_vm3, %v4345_v30, %v4332_v16  ;;  %5794 = vmatpush3.msra.mxu0 %v5054_v46 }
 0xe67   :  { %5748 = vmatprep.mubr.msk.f32.mxu0 %vm155_vm0, %v4349_v17  ;;  %5795 = vmatprep.subr.mxu0 %v5053_v18 }
 0xe68   :  { %5749 = vmatmul.mubr.msk.f32.gmra.mxu0 %vm155_vm0, %v4350_v62 }
 0xe69   :  { %5796 = vmatpush3.msra.mxu0 %v5053_v18 }
 0xed8   :  { %v5747_v35 = vpop.f32.mrf.mxu0 }
 0xed9   :  { %v4452_v38 = vadd.f32 %v5747_v35, %v5034_v4  ;;  %v5040_v35 = vld [vmem:[%s7477_s11 + $0x1] ss:$0 sm:$0xff] }
 0xeda   :  { %v4446_v39 = vpop.f32.mrf.mxu0 }
 0xedb   :  { %v4466_v50 = vadd.f32 %v4452_v38, %v6889_v27  ;;  %v4447_v59 = vadd.f32 %v5034_v4, %v4446_v39 }
 0xedd   :  { %v4465_v2 = vadd.f32 %v4447_v59, %v6887_v0  ;;  %v4472_v10 = vsel %vm155_vm0, %v4466_v50, 0.0 }
 0xede   :  { %4473 = vadd.xlane.f32.xlu1 %v4472_v10 }
 0xedf   :  { %v4469_v25 = vsel %vm155_vm0, %v4465_v2, 0.0 }
 0xee0   :  { %4470 = vadd.xlane.f32.xlu0 %v4469_v25 }
 0xf28   :  { %v5750_v13 = vpop.f32.mrf.mxu0 }
 0xf29   :  { %v4462_v49 = vadd.f32 %v5750_v13, %v5034_v4 }
 0xf2a   :  { %v4456_v3 = vpop.f32.mrf.mxu0 }
 0xf2b   :  { %v4457_v24 = vadd.f32 %v5034_v4, %v4456_v3  ;;  %v4468_v63 = vadd.f32 %v4462_v49, %v6918_v43 }
 0xf2d   :  { %v4467_v12 = vadd.f32 %v4457_v24, %v6916_v9  ;;  %v4478_v27 = vsel %vm155_vm0, %v4468_v63, 0.0 }
 0xf2f   :  { %v4475_v47 = vsel %vm155_vm0, %v4467_v12, 0.0 }
 0xf30   :  { %4476 = vadd.xlane.f32.xlu0 %v4475_v47  ;;  %v5052_v47 = vld [vmem:[%s7481_s15 + $0x98] sm:$0xff] }
 0xf31   :  { %5797 = vmatprep.subr.mxu0 %v5052_v47 }
 0xf32   :  { %5798 = vmatpush3.msra.mxu0 %v5052_v47 }
 0xf34   :  { %4479 = vadd.xlane.f32.xlu0 %v4478_v27  ;;  %v5051_v27 = vld [vmem:[%s7481_s15 + $0x90] sm:$0xff] }
 0xf35   :  { %5799 = vmatprep.subr.mxu0 %v5051_v27 }
 0xf36   :  { %5800 = vmatpush3.msra.mxu0 %v5051_v27 }
 0xf67   :  { %v4474_v0 = vpop.xlane.xlu1 %4473 }
 0xf68   :  { %v4482_v36 = vmul.f32 0.015625, %v4474_v0  ;;  %v5050_v0 = vld [vmem:[%s7481_s15 + $0x88] sm:$0xff] }
 0xf69   :  { %v4471_v7 = vpop.xlane.xlu0 %4470  ;;  %5801 = vmatprep.subr.mxu0 %v5050_v0 }
 0xf6a   :  { %v7354_v14 = vsub.f32 %v4466_v50, %v4482_v36  ;;  %v4481_v29 = vmul.f32 0.015625, %v4471_v7  ;;  %v5049_v36 = vld [vmem:[%s7481_s15 + $0x80] sm:$0xff]  ;;  %5802 = vmatpush3.msra.mxu0 %v5050_v0 }
 0xf6b   :  { %5803 = vmatprep.subr.mxu0 %v5049_v36 }
 0xf6c   :  { %v7356_v31 = vsub.f32 %v4465_v2, %v4481_v29  ;;  %v4490_v15 = vmul.f32 %v7354_v14, %v7354_v14  ;;  %v5042_v2 = vld [vmem:[%s7478_s12 + $0x1] ss:$0 sm:$0xff]  ;;  %5804 = vmatpush3.msra.mxu0 %v5049_v36 }
 0xf6e   :  { %v4496_v9 = vsel %vm155_vm0, %v4490_v15, 0.0  ;;  %v4489_v43 = vmul.f32 %v7356_v31, %v7356_v31 }
 0xf6f   :  { %4497 = vadd.xlane.f32.xlu0 %v4496_v9 }
 0xf70   :  { %v4493_v1 = vsel %vm155_vm0, %v4489_v43, 0.0 }
 0xf71   :  { %4494 = vadd.xlane.f32.xlu1 %v4493_v1 }
 0xfb9   :  { %v4477_v8 = vpop.xlane.xlu0 %4476 }
 0xfba   :  { %v4483_v11 = vmul.f32 0.015625, %v4477_v8 }
 0xfbc   :  { %v7364_v23 = vsub.f32 %v4467_v12, %v4483_v11 }
 0xfbd   :  { %v4480_v61 = vpop.xlane.xlu0 %4479 }
 0xfbe   :  { %v4484_v58 = vmul.f32 0.015625, %v4480_v61  ;;  %v4491_v19 = vmul.f32 %v7364_v23, %v7364_v23 }
 0xfc0   :  { %v7368_v51 = vsub.f32 %v4468_v63, %v4484_v58  ;;  %v4499_v60 = vsel %vm155_vm0, %v4491_v19, 0.0  ;;  %v5066_v19 = vld [vmem:[%s7482_s16 + $0x1] ss:$0 sm:$0xff] }
 0xfc1   :  { %4500 = vadd.xlane.f32.xlu1 %v4499_v60 }
 0xfc2   :  { %v4492_v32 = vmul.f32 %v7368_v51, %v7368_v51 }
 0xfc4   :  { %v4502_v45 = vsel %vm155_vm0, %v4492_v32, 0.0 }
 0xfc5   :  { %4503 = vadd.xlane.f32.xlu0 %v4502_v45 }
 0xff8   :  { %v4498_v40 = vpop.xlane.xlu0 %4497 }
 0xff9   :  { %v4506_v54 = vmul.f32 0.015625, %v4498_v40 }
 0xffa   :  { %v4495_v22 = vpop.xlane.xlu1 %4494 }
 0xffb   :  { %v4510_v30 = vadd.f32 1e-05, %v4506_v54  ;;  %v4505_v16 = vmul.f32 0.015625, %v4495_v22 }
 0xffd   :  { %5971 = vrsqrt.f32 %v4510_v30  ;;  %v4509_v17 = vadd.f32 1e-05, %v4505_v16 }
 0xfff   :  { %5973 = vrsqrt.f32 %v4509_v17 }
0x100a   :  { %v5972_v62 = vpop.eup %5971 }
0x100b   :  { %v4518_v4 = vmul.f32 %v5972_v62, %v7354_v14 }
0x100c   :  { %v5974_v38 = vpop.eup %5973 }
0x100d   :  { %v4517_v39 = vmul.f32 %v5974_v38, %v7356_v31  ;;  %v4530_v50 = vmul.f32 %v5040_v35, %v4518_v4 }
0x100f   :  { %v4529_v59 = vmul.f32 %v5040_v35, %v4517_v39  ;;  %v4542_v25 = vadd.f32 %v5042_v2, %v4530_v50 }
0x1011   :  { %v4541_v10 = vadd.f32 %v5042_v2, %v4529_v59 }
0x1013   :  { %5767 = vmatprep.mubr.msk.f32.mxu1 %vm155_vm0, %v4541_v10 }
0x1014   :  { %5768 = vmatmul.mubr.msk.f32.vlgmr.msra.gmra.mxu1 %vm155_vm0, %v4542_v25 }
0x104a   :  { %v4501_v13 = vpop.xlane.xlu1 %4500 }
0x104b   :  { %v4507_v3 = vmul.f32 0.015625, %v4501_v13 }
0x104d   :  { %v4511_v49 = vadd.f32 1e-05, %v4507_v3 }
0x104e   :  { %v4504_v24 = vpop.xlane.xlu0 %4503 }
0x104f   :  { %5975 = vrsqrt.f32 %v4511_v49  ;;  %v4508_v12 = vmul.f32 0.015625, %v4504_v24 }
0x1051   :  { %v4512_v63 = vadd.f32 1e-05, %v4508_v12 }
0x1053   :  { %5977 = vrsqrt.f32 %v4512_v63 }
0x105c   :  { %v5976_v7 = vpop.eup %5975 }
0x105d   :  { %v4519_v14 = vmul.f32 %v5976_v7, %v7364_v23 }
0x105f   :  { %v4531_v29 = vmul.f32 %v5040_v35, %v4519_v14  ;;  %v5068_v14 = vld [vmem:[%s7483_s17 + $0x1] ss:$0 sm:$0xff]  ;;  %s6110_s17 = smov [#allocation10]  }
0x1060   :  { %v5978_v31 = vpop.eup %5977 }
0x1061   :  { %v4543_v15 = vadd.f32 %v5042_v2, %v4531_v29  ;;  %v4520_v9 = vmul.f32 %v5978_v31, %v7368_v51 }
0x1063   :  { %5770 = vmatprep.mubr.msk.f32.mxu1 %vm155_vm0, %v4543_v15  ;;  %v4532_v43 = vmul.f32 %v5040_v35, %v4520_v9 }
0x1065   :  { %v4544_v1 = vadd.f32 %v5042_v2, %v4532_v43 }
0x1067   :  { %5771 = vmatmul.mubr.msk.f32.gmra.mxu1 %vm155_vm0, %v4544_v1 }
0x10d4   :  { %v5769_v6 = vpop.f32.mrf.mxu1 }
0x10d5   :  { %v4646_v52 = vadd.f32 %v5769_v6, %v5044_v33 }
0x10d6   :  { %v4640_v57 = vpop.f32.mrf.mxu1 }
0x10d7   :  { %v4641_v37 = vadd.f32 %v5044_v33, %v4640_v57  ;;  %v4660_v21 = vmax.f32 %v4646_v52, 0.0 }
0x10d9   :  { %v4659_v56 = vmax.f32 %v4641_v37, 0.0 }
0x10db   :  { %5805 = vmatprep.mubr.f32.mxu0 %v4659_v56 }
0x10dc   :  { %5806 = vmatmul.mubr.f32.vlgmr.msra.gmra.mxu0 %v4660_v21 }
0x1127   :  { %v5772_v42 = vpop.f32.mrf.mxu1 }
0x1128   :  { %v4656_v8 = vadd.f32 %v5772_v42, %v5044_v33 }
0x1129   :  { %v4650_v11 = vpop.f32.mrf.mxu1 }
0x112a   :  { %v4651_v23 = vadd.f32 %v5044_v33, %v4650_v11  ;;  %v4662_v58 = vmax.f32 %v4656_v8, 0.0 }
0x112c   :  { %v4661_v61 = vmax.f32 %v4651_v23, 0.0 }
0x112e   :  { %5808 = vmatprep.mubr.f32.mxu0 %v4661_v61 }
0x112f   :  { %5809 = vmatmul.mubr.f32.gmra.mxu0 %v4662_v58 }
0x119c   :  { %v5807_v51 = vpop.f32.mrf.mxu0 }
0x119d   :  { %v4760_v60 = vadd.f32 %v5807_v51, %v5066_v19 }
0x119e   :  { %v4754_v32 = vpop.f32.mrf.mxu0 }
0x119f   :  { %v4774_v45 = vadd.f32 %v4760_v60, %v4542_v25  ;;  %v4755_v26 = vadd.f32 %v5066_v19, %v4754_v32 }
0x11a1   :  { %v4773_v41 = vadd.f32 %v4755_v26, %v4541_v10  ;;  %v4780_v48 = vsel %vm155_vm0, %v4774_v45, 0.0 }
0x11a2   :  { %4781 = vadd.xlane.f32.xlu0 %v4780_v48 }
0x11a3   :  { %v4777_v28 = vsel %vm155_vm0, %v4773_v41, 0.0 }
0x11a4   :  { %4778 = vadd.xlane.f32.xlu1 %v4777_v28 }
0x11ef   :  { %v5810_v5 = vpop.f32.mrf.mxu0 }
0x11f0   :  { %v4770_v34 = vadd.f32 %v5810_v5, %v5066_v19 }
0x11f1   :  { %v4764_v20 = vpop.f32.mrf.mxu0 }
0x11f2   :  { %v4776_v55 = vadd.f32 %v4770_v34, %v4544_v1  ;;  %v4765_v44 = vadd.f32 %v5066_v19, %v4764_v20 }
0x11f4   :  { %v4775_v53 = vadd.f32 %v4765_v44, %v4543_v15  ;;  %v4786_v40 = vsel %vm155_vm0, %v4776_v55, 0.0  ;;  %v5070_v15 = vld [vmem:[%s7484_s18 + $0x1] ss:$0 sm:$0xff]  ;;  %s4862_s18 = sshll.u32 %s6110_s17, 4  ;;  %s4863_s18 = int_to_ptr.vmem [resolvable:$true] %s4862_s18 }
0x11f5   :  { %4787 = vadd.xlane.f32.xlu0 %v4786_v40  ;;  %s6069_s5 = scalar_lea.vmem %s4863_s18, 512  ;;  %p6074_p7 = scmp.lt.s32.totalorder %s4863_s18, %s4863_s18 }
0x11f6   :  { %v4783_v54 = vsel %vm155_vm0, %v4775_v53, 0.0  ;;  %p6070_p6 = scmp.ne.s32.totalorder %s4863_s18, %s6069_s5  ;;  %p6075_p8 = scmp.lt.s32.totalorder %s6069_s5, %s6069_s5 }
0x11f7   :  { %4784 = vadd.xlane.f32.xlu1 %v4783_v54 }
0x11f8   :  { %p6076_p9 = por %p6075_p8, %p6074_p7 }
0x11fa   :  { %p6077_p10 = pnand %p6076_p9, %p6070_p6 }
0x122b   :  { %v4782_v46 = vpop.xlane.xlu0 %4781 }
0x122c   :  { %v4790_v22 = vmul.f32 0.015625, %v4782_v46 }
0x122d   :  { %v4779_v30 = vpop.xlane.xlu1 %4778 }
0x122e   :  { %v4794_v16 = vsub.f32 %v4774_v45, %v4790_v22  ;;  %v4789_v18 = vmul.f32 0.015625, %v4779_v30 }
0x1230   :  { %v4793_v17 = vsub.f32 %v4773_v41, %v4789_v18  ;;  %v4798_v62 = vmul.f32 %v4794_v16, %v4794_v16 }
0x1232   :  { %v4804_v4 = vsel %vm155_vm0, %v4798_v62, 0.0  ;;  %v4797_v35 = vmul.f32 %v4793_v17, %v4793_v17 }
0x1233   :  { %4805 = vadd.xlane.f32.xlu0 %v4804_v4 }
0x1234   :  { %v4801_v38 = vsel %vm155_vm0, %v4797_v35, 0.0 }
0x1235   :  { %4802 = vadd.xlane.f32.xlu1 %v4801_v38 }
0x127e   :  { %v4788_v39 = vpop.xlane.xlu0 %4787 }
0x127f   :  { %v4792_v50 = vmul.f32 0.015625, %v4788_v39 }
0x1280   :  { %v4785_v59 = vpop.xlane.xlu1 %4784 }
0x1281   :  { %v4796_v2 = vsub.f32 %v4776_v55, %v4792_v50  ;;  %v4791_v10 = vmul.f32 0.015625, %v4785_v59 }
0x1283   :  { %v4795_v25 = vsub.f32 %v4775_v53, %v4791_v10  ;;  %v4800_v13 = vmul.f32 %v4796_v2, %v4796_v2 }
0x1285   :  { %v4810_v3 = vsel %vm155_vm0, %v4800_v13, 0.0  ;;  %v4799_v49 = vmul.f32 %v4795_v25, %v4795_v25 }
0x1286   :  { %4811 = vadd.xlane.f32.xlu0 %v4810_v3 }
0x1287   :  { %v4807_v24 = vsel %vm155_vm0, %v4799_v49, 0.0 }
0x1288   :  { %4808 = vadd.xlane.f32.xlu1 %v4807_v24 }
0x12bc   :  { %v4806_v12 = vpop.xlane.xlu0 %4805 }
0x12bd   :  { %v4814_v63 = vmul.f32 0.015625, %v4806_v12 }
0x12be   :  { %v4803_v47 = vpop.xlane.xlu1 %4802 }
0x12bf   :  { %v4818_v27 = vadd.f32 1e-05, %v4814_v63  ;;  %v4813_v0 = vmul.f32 0.015625, %v4803_v47 }
0x12c1   :  { %5979 = vrsqrt.f32 %v4818_v27  ;;  %v4817_v36 = vadd.f32 1e-05, %v4813_v0 }
0x12c3   :  { %5981 = vrsqrt.f32 %v4817_v36 }
0x12ce   :  { %v5980_v7 = vpop.eup %5979 }
0x12cf   :  { %v4826_v29 = vmul.f32 %v5980_v7, %v4794_v16 }
0x12d0   :  { %v5982_v31 = vpop.eup %5981 }
0x12d1   :  { %v4825_v9 = vmul.f32 %v5982_v31, %v4793_v17  ;;  %v4838_v43 = vmul.f32 %v5068_v14, %v4826_v29 }
0x12d3   :  { %v4837_v1 = vmul.f32 %v5068_v14, %v4825_v9  ;;  %v4850_v33 = vadd.f32 %v5070_v15, %v4838_v43 }
0x12d5   :  { %v4849_v6 = vadd.f32 %v5070_v15, %v4837_v1  ;;  %4854 = vst.msk [vmem:[#allocation10 + $0x8] sm:$0xff] %vm155_vm0, %v4850_v33 }
0x12d7   :  { %4853 = vst.msk [vmem:[#allocation10] sm:$0xff] %vm155_vm0, %v4849_v6 }
0x130f   :  { %v4812_v52 = vpop.xlane.xlu0 %4811 }
0x1310   :  { %v4816_v57 = vmul.f32 0.015625, %v4812_v52 }
0x1311   :  { %v4809_v37 = vpop.xlane.xlu1 %4808 }
0x1312   :  { %v4820_v56 = vadd.f32 1e-05, %v4816_v57  ;;  %v4815_v21 = vmul.f32 0.015625, %v4809_v37 }
0x1314   :  { %5983 = vrsqrt.f32 %v4820_v56  ;;  %v4819_v42 = vadd.f32 1e-05, %v4815_v21 }
0x1316   :  { %5985 = vrsqrt.f32 %v4819_v42 }
0x1321   :  { %v5984_v8 = vpop.eup %5983 }
0x1322   :  { %v4828_v11 = vmul.f32 %v5984_v8, %v4796_v2 }
0x1323   :  { %v5986_v23 = vpop.eup %5985 }
0x1324   :  { %v4827_v61 = vmul.f32 %v5986_v23, %v4795_v25  ;;  %v4840_v58 = vmul.f32 %v5068_v14, %v4828_v11 }
0x1326   :  { %v4839_v19 = vmul.f32 %v5068_v14, %v4827_v61  ;;  %v4852_v51 = vadd.f32 %v5070_v15, %v4840_v58 }
0x1328   :  { %v4851_v60 = vadd.f32 %v5070_v15, %v4839_v19  ;;  %4856 = vst.msk [vmem:[#allocation10 + $0x18] sm:$0xff] %vm155_vm0, %v4852_v51 }
0x132a   :  { %4855 = vst.msk [vmem:[#allocation10 + $0x10] sm:$0xff] %vm155_vm0, %v4851_v60 }
0x132b   :  { %6080 = shalt.err (!%p6077_p10)
}
0x132c   :  { %4868 = dma.vmem_to_hbm [thread:$0]  %s4863_s18, 512, %s7485_s19, [#allocation4], %s6099_s22, %s6099_s22, %s6100_s2  }
0x132d   :  { %6095 = dma.done.wait [#allocation4], 512  }
0x132e   :  { %6096 = vsyncadd [#allocation4], 4294966784 }
0x132f   :  { %4872 = vsyncpa [#allocation3], 1 }
0x1330   :  { %4873 = vsyncpa [#allocation6], 1 }
0x1331   :  { %4874 = vsyncpa [#allocation9], 1 }
0x1332   :  { %4875 = vsyncpa [#allocation4], 1 }

</bundles_post_ra>
